<compile_context>
chip_gen: v5e
topology: v5e:2x2
jax: 0.10.0
libtpu: 0.0.40
codegen_flags: <defaults>
</compile_context>

<pallas_src>
import math
import jax
import jax.numpy as jnp
from jax.experimental import pallas as pl
from jax.experimental.pallas import tpu as pltpu

# ----- model sizes (small, consistent with the module's __init__) -----------
N, B, L, K = 8, 2, 8, 4            # dataset size, batch, latent dim, mixture K
DC, DB, DD = 16, 16, 16            # continuous / bernoulli / categorical dims
DH = DC + DB + DD                  # 48 logit rows per component
LP = 16                            # padded contraction dim: [z (L) | 1 | 0-pad]
RH = 56                            # per-k slab rows: 48 logits + 3 extras + 5 pad
M_SAMPLES = 1000                   # matches the hardcoded M_samples in forward()
MP = 1024                          # lane-padded sample count (multiple of 128)
LOG2PI = math.log(2.0 * math.pi)


def _mixture_kernel(z_ref, w_ref, q_ref,
                    stats_ref, rik_ref, t1_ref, t2_ref, t3_ref):
    z_aug = z_ref[0]                       # (LP, MP) f32, cols >= M_SAMPLES are 0
    q = q_ref[0]                           # (1, 32) = [qm(8) | qlv(8) | qs(4) | 0]
    qm = q[:, 0:L]
    qlv = q[:, L:2 * L]
    qs = q[:, 2 * L:2 * L + K]

    # KL( N(qm, diag(exp(qlv))) || N(0, I) )      (posterior_mean=0, var=1)
    kl_z = 0.5 * jnp.sum(jnp.exp(qlv) + qm * qm - 1.0 - qlv,
                         axis=1, keepdims=True)                       # (1,1)

    # KL( Categorical(qs) || Uniform(K) )  (torch normalizes probs by their sum)
    qs_p = qs / jnp.sum(qs, axis=1, keepdims=True)
    kl_s = jnp.sum(qs_p * (jnp.log(jnp.maximum(qs_p, 1e-30)) + math.log(K)),
                   axis=1, keepdims=True)                             # (1,1)

    lane = jax.lax.broadcasted_iota(jnp.int32, (1, MP), 1)
    valid = (lane < M_SAMPLES).astype(jnp.float32)                    # (1, MP)

    ll = jnp.zeros((1, 1), jnp.float32)
    t1 = jnp.zeros((1, MP), jnp.float32)
    t2 = jnp.zeros((1, MP), jnp.float32)
    t3 = jnp.zeros((1, MP), jnp.float32)

    for k in range(K):
        # One MXU matmul per component; the x-dependent dot terms ride as
        # extra output rows (bias folded in via the ones-row of z_aug).
        w_k = w_ref[0, k]                                             # (RH, LP)
        logits = jnp.dot(w_k, z_aug,
                         preferred_element_type=jnp.float32)          # (RH, MP)

        mean_s = logits[0:DC, :]             # sqrt(exp(-lvc_k)) * gaussian mean
        lgt_b = logits[DC:DC + DB, :]        # bernoulli logits
        lgt_d = logits[DC + DB:DH, :]        # categorical logits
        g_x = logits[DH:DH + 1, :]           # -2*sum(e*x*mean) + quad/normal consts
        b_x = logits[DH + 1:DH + 2, :]       # sum(x_b * logit_b)
        d_x = logits[DH + 2:DH + 3, :]       # picked categorical logit

        # Gaussian head: -0.5 * (sum(e*(x-mean)^2) + sum(lvc) + DC*log(2pi))
        lp1 = -0.5 * (jnp.sum(mean_s * mean_s, axis=0, keepdims=True) + g_x)

        # Bernoulli head: sum(x*logit) - sum(softplus(logit))
        sp = jnp.maximum(lgt_b, 0.0) + jnp.log(1.0 + jnp.exp(-jnp.abs(lgt_b)))
        lp2 = b_x - jnp.sum(sp, axis=0, keepdims=True)

        # Categorical head: picked_logit - logsumexp(logits)
        mx = jnp.max(lgt_d, axis=0, keepdims=True)
        lse = mx + jnp.log(jnp.sum(jnp.exp(lgt_d - mx), axis=0, keepdims=True))
        lp3 = d_x - lse

        s_k = jnp.sum((lp1 + lp2 + lp3) * valid, axis=1, keepdims=True)   # (1,1)
        ll = ll + qs[:, k:k + 1] * s_k       # LL_i += q_s_param[i,k] * sum(...)

        t1 = t1 + lp1
        t2 = t2 + lp2
        t3 = t3 + lp3

    elbo_i = ll - kl_z - kl_s

    # pack [elbo_i, LL_i, KL_i_z, KL_i_s] into a (1,4) row without concat
    lane4 = jax.lax.broadcasted_iota(jnp.int32, (1, 4), 1)
    row = (jnp.where(lane4 == 0, elbo_i, 0.0)
           + jnp.where(lane4 == 1, ll, 0.0)
           + jnp.where(lane4 == 2, kl_z, 0.0)
           + jnp.where(lane4 == 3, kl_s, 0.0))
    stats_ref[...] = row[None]                                        # (1,1,4)

    # r_ik = softmax(q_s_param[i, :])
    mq = jnp.max(qs, axis=1, keepdims=True)
    eq = jnp.exp(qs - mq)
    rik_ref[...] = (eq / jnp.sum(eq, axis=1, keepdims=True))[None]    # (1,1,K)

    # one masked store per term per grid step (padded lanes zeroed)
    t1_ref[...] = (t1 * valid)[None]
    t2_ref[...] = (t2 * valid)[None]
    t3_ref[...] = (t3 * valid)[None]


def mixture_forward(index, X_c, X_b, X_d_onehot,
                    q_z_mean, q_log_var, q_s_param,
                    wc, bc, lvc, wb, bb, wd, bd, rng_key):
    B_ = X_c.shape[0]
    start = B_ * index
    end = B_ * (index + 1)

    # --- reparametrized sampling z ~ q_z, stored transposed (M on lanes) ----
    # TODO(synk): uses jax.random instead of torch's RNG stream.
    eps = jax.random.normal(rng_key, (B_, L, M_SAMPLES), dtype=jnp.float32)
    mu = q_z_mean[start:end][:, :, None]                              # (B, L, 1)
    sig = jnp.exp(0.5 * q_log_var[start:end])[:, :, None]
    zT = mu + sig * eps                                               # (B, L, M)
    z_aug = jnp.zeros((B_, LP, MP), jnp.float32)
    z_aug = z_aug.at[:, :L, :M_SAMPLES].set(zT)
    z_aug = z_aug.at[:, L, :M_SAMPLES].set(1.0)       # bias row (valid lanes only)

    # --- fused per-(i,k) generative weight slabs ----------------------------
    e = jnp.exp(-lvc)                                                 # (K, DC)
    sqrt_e = jnp.exp(-0.5 * lvc)
    wc_s = wc * sqrt_e[:, None, :]          # fold sqrt(precision) into gauss head
    bc_s = bc * sqrt_e

    def head_rows(w, b):                    # (K,L,D),(K,D) -> (K, D, LP)
        wt = jnp.swapaxes(w, 1, 2)                                    # (K, D, L)
        pad = jnp.zeros((K, w.shape[2], LP - L - 1), jnp.float32)
        return jnp.concatenate([wt, b[:, :, None], pad], axis=2)

    base = jnp.concatenate([head_rows(wc_s, bc_s),
                            head_rows(wb, bb),
                            head_rows(wd, bd)], axis=1)               # (K, DH, LP)
    base = jnp.broadcast_to(base[None], (B_, K, DH, LP))

    # per-i extra rows (data-dependent linear terms ride on the MXU)
    xc_s = X_c[:, None, :] * sqrt_e[None]                             # (B, K, DC)
    g_w = -2.0 * jnp.einsum('ikd,kld->ikl', xc_s, wc_s)               # (B, K, L)
    g_b = (-2.0 * jnp.einsum('ikd,kd->ik', xc_s, bc_s)
           + jnp.einsum('id,kd->ik', X_c * X_c, e)
           + jnp.sum(lvc, axis=1)[None, :] + DC * LOG2PI)             # (B, K)
    b_w = jnp.einsum('id,kld->ikl', X_b, wb)
    b_b = jnp.einsum('id,kd->ik', X_b, bb)
    d_w = jnp.einsum('id,kld->ikl', X_d_onehot, wd)
    d_b = jnp.einsum('id,kd->ik', X_d_onehot, bd)

    def extra_row(wrow, brow):              # -> (B, K, 1, LP)
        pad = jnp.zeros((B_, K, LP - L - 1), jnp.float32)
        return jnp.concatenate([wrow, brow[..., None], pad], axis=-1)[:, :, None, :]

    extras = jnp.concatenate([extra_row(g_w, g_b),
                              extra_row(b_w, b_b),
                              extra_row(d_w, d_b)], axis=2)           # (B, K, 3, LP)
    slab_pad = jnp.zeros((B_, K, RH - DH - 3, LP), jnp.float32)
    w_fused = jnp.concatenate([base, extras, slab_pad], axis=2)       # (B, K, RH, LP)

    # --- coalesced per-i variational-parameter row --------------------------
    qrow = jnp.zeros((B_, 1, 32), jnp.float32)
    qrow = qrow.at[:, 0, 0:L].set(q_z_mean[start:end])
    qrow = qrow.at[:, 0, L:2 * L].set(q_log_var[start:end])
    qrow = qrow.at[:, 0, 2 * L:2 * L + K].set(q_s_param[start:end])

    batch3 = lambda i: (i, 0, 0)
    batch4 = lambda i: (i, 0, 0, 0)

    grid_spec = pltpu.PrefetchScalarGridSpec(
        num_scalar_prefetch=0,
        grid=(B_,),
        in_specs=[
            pl.BlockSpec((1, LP, MP), batch3),          # z_aug
            pl.BlockSpec((1, K, RH, LP), batch4),       # fused per-i weights
            pl.BlockSpec((1, 1, 32), batch3),           # [qm | qlv | qs]
        ],
        out_specs=[
            pl.BlockSpec((1, 1, 4), batch3),            # per-i stats
            pl.BlockSpec((1, 1, K), batch3),            # r_ik rows
            pl.BlockSpec((1, 1, MP), batch3),           # term_1 partial (per i)
            pl.BlockSpec((1, 1, MP), batch3),           # term_2 partial
            pl.BlockSpec((1, 1, MP), batch3),           # term_3 partial
        ],
    )
    out_shape = (
        jax.ShapeDtypeStruct((B_, 1, 4), jnp.float32),
        jax.ShapeDtypeStruct((B_, 1, K), jnp.float32),
        jax.ShapeDtypeStruct((B_, 1, MP), jnp.float32),
        jax.ShapeDtypeStruct((B_, 1, MP), jnp.float32),
        jax.ShapeDtypeStruct((B_, 1, MP), jnp.float32),
    )

    stats, rik_b, t1, t2, t3 = pl.pallas_call(
        _mixture_kernel,
        out_shape=out_shape,
        grid_spec=grid_spec,
        compiler_params=pltpu.CompilerParams(
            dimension_semantics=("parallel",)),           # 2 steps -> 2 TCs on v7x
    )(z_aug, w_fused, qrow)

    stats = stats[:, 0, :]
    elbo = jnp.sum(stats[:, 0])
    LL = jnp.sum(stats[:, 1])
    KL_z = stats[-1, 2]                 # reference returns KL of the last i
    KL_s = stats[-1, 3]
    rik = jnp.zeros((N, K), jnp.float32).at[start:end].set(rik_b[:, 0, :])
    term_1 = jnp.sum(t1[:, 0, :M_SAMPLES], axis=0)
    term_2 = jnp.sum(t2[:, 0, :M_SAMPLES], axis=0)
    term_3 = jnp.sum(t3[:, 0, :M_SAMPLES], axis=0)
    # TODO(synk): gumbel_softmax(q_s_param) is computed but unused in the
    # reference forward; omitted here.
    return (-elbo, LL, KL_z, KL_s, rik, term_1, term_2, term_3)


if __name__ == "__main__":
    key = jax.random.PRNGKey(0)
    keys = jax.random.split(key, 16)

    # Variational parameters (deterministic init mirroring __init__)
    q_z_mean = jax.random.uniform(keys[0], (N, L), dtype=jnp.float32)
    q_log_var = jax.random.uniform(keys[1], (N, L), dtype=jnp.float32)
    q_s_param = jax.random.dirichlet(keys[2], jnp.ones((K,)) * 0.53 * DC,
                                     shape=(N,)).astype(jnp.float32)

    # TODO(synk): the likelihood objects (gaussian/bernoulli/categorical) are
    # external to the module; implemented as per-component linear generative
    # heads z -> x with deterministic synthetic parameters.
    wc = 0.1 * jax.random.normal(keys[3], (K, L, DC), dtype=jnp.float32)
    bc = 0.1 * jax.random.normal(keys[4], (K, DC), dtype=jnp.float32)
    lvc = jnp.zeros((K, DC), jnp.float32)                 # unit variance
    wb = 0.1 * jax.random.normal(keys[5], (K, L, DB), dtype=jnp.float32)
    bb = 0.1 * jax.random.normal(keys[6], (K, DB), dtype=jnp.float32)
    wd = 0.1 * jax.random.normal(keys[7], (K, L, DD), dtype=jnp.float32)
    bd = 0.1 * jax.random.normal(keys[8], (K, DD), dtype=jnp.float32)

    # Mini-batch observations (B = 2)
    X_c = jax.random.normal(keys[9], (B, DC), dtype=jnp.float32)
    X_b = jax.random.bernoulli(keys[10], 0.5, (B, DB)).astype(jnp.float32)
    x_d_idx = jax.random.randint(keys[11], (B,), 0, DD)
    X_d = jax.nn.one_hot(x_d_idx, DD, dtype=jnp.float32)

    index = 1
    outs = mixture_forward(index, X_c, X_b, X_d,
                           q_z_mean, q_log_var, q_s_param,
                           wc, bc, lvc, wb, bb, wd, bd, keys[12])
    outs = jax.block_until_ready(outs)
    neg_elbo, LL, KL_z, KL_s, rik, term_1, term_2, term_3 = outs
    assert rik.shape == (N, K) and term_1.shape == (M_SAMPLES,)
    assert term_2.shape == (M_SAMPLES,) and term_3.shape == (M_SAMPLES,)
    print("KERNEL_OK")
</pallas_src>

<mosaic_0001>
module attributes {stable_mosaic.version = 11 : i64} {
  func.func @_mixture_kernel(%arg0: i32, %arg1: memref<1x16x1024xf32, #tpu.memory_space<vmem>>, %arg2: memref<1x4x56x16xf32, #tpu.memory_space<vmem>>, %arg3: memref<1x1x32xf32, #tpu.memory_space<vmem>>, %arg4: memref<1x1x4xf32, #tpu.memory_space<vmem>>, %arg5: memref<1x1x4xf32, #tpu.memory_space<vmem>>, %arg6: memref<1x1x1024xf32, #tpu.memory_space<vmem>>, %arg7: memref<1x1x1024xf32, #tpu.memory_space<vmem>>, %arg8: memref<1x1x1024xf32, #tpu.memory_space<vmem>>) attributes {dimension_semantics = [#tpu.dimension_semantics<parallel>], iteration_bounds = array<i64: 2>, scalar_prefetch = 0 : i64, scratch_operands = 0 : i64, tpu.core_type = #tpu.core_type<tc>, window_params = [{transform_indices = @transform_0, window_bounds = array<i64: 1, 16, 1024>}, {transform_indices = @transform_1, window_bounds = array<i64: 1, 4, 56, 16>}, {transform_indices = @transform_2, window_bounds = array<i64: 1, 1, 32>}, {transform_indices = @transform_3, window_bounds = array<i64: 1, 1, 4>}, {transform_indices = @transform_4, window_bounds = array<i64: 1, 1, 4>}, {transform_indices = @transform_5, window_bounds = array<i64: 1, 1, 1024>}, {transform_indices = @transform_6, window_bounds = array<i64: 1, 1, 1024>}, {transform_indices = @transform_7, window_bounds = array<i64: 1, 1, 1024>}]} {
    %c0 = arith.constant 0 : index
    %c0_0 = arith.constant 0 : index
    %c0_1 = arith.constant 0 : index
    %0 = vector.load %arg1[%c0, %c0_0, %c0_1] : memref<1x16x1024xf32, #tpu.memory_space<vmem>>, vector<1x16x1024xf32>
    %1 = vector.shape_cast %0 : vector<1x16x1024xf32> to vector<16x1024xf32>
    %c0_2 = arith.constant 0 : index
    %c0_3 = arith.constant 0 : index
    %c0_4 = arith.constant 0 : index
    %2 = vector.load %arg3[%c0_2, %c0_3, %c0_4] : memref<1x1x32xf32, #tpu.memory_space<vmem>>, vector<1x1x32xf32>
    %3 = vector.shape_cast %2 : vector<1x1x32xf32> to vector<1x32xf32>
    %4 = vector.extract_strided_slice %3 {offsets = [0, 0], sizes = [1, 8], strides = [1, 1]} : vector<1x32xf32> to vector<1x8xf32>
    %5 = vector.extract_strided_slice %3 {offsets = [0, 8], sizes = [1, 8], strides = [1, 1]} : vector<1x32xf32> to vector<1x8xf32>
    %6 = vector.extract_strided_slice %3 {offsets = [0, 16], sizes = [1, 4], strides = [1, 1]} : vector<1x32xf32> to vector<1x4xf32>
    %7 = math.exp %5 : vector<1x8xf32>
    %8 = arith.mulf %4, %4 : vector<1x8xf32>
    %9 = arith.addf %7, %8 : vector<1x8xf32>
    %cst = arith.constant 1.000000e+00 : f32
    %10 = vector.broadcast %cst : f32 to vector<1x8xf32>
    %11 = arith.subf %9, %10 : vector<1x8xf32>
    %12 = arith.subf %11, %5 : vector<1x8xf32>
    %cst_5 = arith.constant dense<0.000000e+00> : vector<1xf32>
    %13 = vector.multi_reduction <add>, %12, %cst_5 [1] : vector<1x8xf32> to vector<1xf32>
    %14 = vector.shape_cast %13 : vector<1xf32> to vector<1x1xf32>
    %cst_6 = arith.constant 5.000000e-01 : f32
    %15 = vector.broadcast %cst_6 : f32 to vector<1x1xf32>
    %16 = arith.mulf %15, %14 : vector<1x1xf32>
    %cst_7 = arith.constant dense<0.000000e+00> : vector<1xf32>
    %17 = vector.multi_reduction <add>, %6, %cst_7 [1] : vector<1x4xf32> to vector<1xf32>
    %18 = vector.shape_cast %17 : vector<1xf32> to vector<1x1xf32>
    %19 = vector.broadcast %18 : vector<1x1xf32> to vector<1x4xf32>
    %20 = arith.divf %6, %19 : vector<1x4xf32>
    %cst_8 = arith.constant 1.000000e-30 : f32
    %21 = vector.broadcast %cst_8 : f32 to vector<1x4xf32>
    %22 = arith.maximumf %20, %21 : vector<1x4xf32>
    %23 = math.log %22 : vector<1x4xf32>
    %cst_9 = arith.constant 1.38629436 : f32
    %24 = vector.broadcast %cst_9 : f32 to vector<1x4xf32>
    %25 = arith.addf %23, %24 : vector<1x4xf32>
    %26 = arith.mulf %20, %25 : vector<1x4xf32>
    %cst_10 = arith.constant dense<0.000000e+00> : vector<1xf32>
    %27 = vector.multi_reduction <add>, %26, %cst_10 [1] : vector<1x4xf32> to vector<1xf32>
    %28 = vector.shape_cast %27 : vector<1xf32> to vector<1x1xf32>
    %29 = tpu.iota {dimensions = array<i32: 1>} : vector<1x1024xi32>
    %c1000_i32 = arith.constant 1000 : i32
    %30 = vector.broadcast %c1000_i32 : i32 to vector<1x1024xi32>
    %31 = arith.cmpi slt, %29, %30 : vector<1x1024xi32>
    %32 = arith.extui %31 : vector<1x1024xi1> to vector<1x1024xi32>
    %33 = arith.sitofp %32 : vector<1x1024xi32> to vector<1x1024xf32>
    %cst_11 = arith.constant 0.000000e+00 : f32
    %34 = vector.broadcast %cst_11 : f32 to vector<1x1xf32>
    %cst_12 = arith.constant 0.000000e+00 : f32
    %35 = vector.broadcast %cst_12 : f32 to vector<1x1024xf32>
    %cst_13 = arith.constant 0.000000e+00 : f32
    %36 = vector.broadcast %cst_13 : f32 to vector<1x1024xf32>
    %cst_14 = arith.constant 0.000000e+00 : f32
    %37 = vector.broadcast %cst_14 : f32 to vector<1x1024xf32>
    %c0_15 = arith.constant 0 : index
    %c0_16 = arith.constant 0 : index
    %c0_17 = arith.constant 0 : index
    %c0_18 = arith.constant 0 : index
    %38 = vector.load %arg2[%c0_15, %c0_16, %c0_17, %c0_18] : memref<1x4x56x16xf32, #tpu.memory_space<vmem>>, vector<1x1x56x16xf32>
    %39 = vector.shape_cast %38 : vector<1x1x56x16xf32> to vector<56x16xf32>
    %cst_19 = arith.constant dense<0.000000e+00> : vector<56x1024xf32>
    %40 = tpu.matmul %39, %1, %cst_19 {dimension_numbers = #tpu.dot_dimension_numbers<[1], [0], [0], [1], [0, 0, 1, 1], [], []>} : vector<56x16xf32>, vector<16x1024xf32>, vector<56x1024xf32> -> vector<56x1024xf32>
    %41 = vector.extract_strided_slice %40 {offsets = [0, 0], sizes = [16, 1024], strides = [1, 1]} : vector<56x1024xf32> to vector<16x1024xf32>
    %42 = vector.extract_strided_slice %40 {offsets = [16, 0], sizes = [16, 1024], strides = [1, 1]} : vector<56x1024xf32> to vector<16x1024xf32>
    %43 = vector.extract_strided_slice %40 {offsets = [32, 0], sizes = [16, 1024], strides = [1, 1]} : vector<56x1024xf32> to vector<16x1024xf32>
    %44 = vector.extract_strided_slice %40 {offsets = [48, 0], sizes = [1, 1024], strides = [1, 1]} : vector<56x1024xf32> to vector<1x1024xf32>
    %45 = vector.extract_strided_slice %40 {offsets = [49, 0], sizes = [1, 1024], strides = [1, 1]} : vector<56x1024xf32> to vector<1x1024xf32>
    %46 = vector.extract_strided_slice %40 {offsets = [50, 0], sizes = [1, 1024], strides = [1, 1]} : vector<56x1024xf32> to vector<1x1024xf32>
    %47 = arith.mulf %41, %41 : vector<16x1024xf32>
    %cst_20 = arith.constant dense<0.000000e+00> : vector<1024xf32>
    %48 = vector.multi_reduction <add>, %47, %cst_20 [0] : vector<16x1024xf32> to vector<1024xf32>
    %49 = vector.shape_cast %48 : vector<1024xf32> to vector<1x1024xf32>
    %50 = arith.addf %49, %44 : vector<1x1024xf32>
    %cst_21 = arith.constant -5.000000e-01 : f32
    %51 = vector.broadcast %cst_21 : f32 to vector<1x1024xf32>
    %52 = arith.mulf %51, %50 : vector<1x1024xf32>
    %cst_22 = arith.constant 0.000000e+00 : f32
    %53 = vector.broadcast %cst_22 : f32 to vector<16x1024xf32>
    %54 = arith.maximumf %42, %53 : vector<16x1024xf32>
    %55 = math.absf %42 : vector<16x1024xf32>
    %cst_23 = arith.constant 0.000000e+00 : f32
    %56 = vector.broadcast %cst_23 : f32 to vector<16x1024xf32>
    %57 = arith.subf %56, %55 : vector<16x1024xf32>
    %58 = math.exp %57 : vector<16x1024xf32>
    %cst_24 = arith.constant 1.000000e+00 : f32
    %59 = vector.broadcast %cst_24 : f32 to vector<16x1024xf32>
    %60 = arith.addf %59, %58 : vector<16x1024xf32>
    %61 = math.log %60 : vector<16x1024xf32>
    %62 = arith.addf %54, %61 : vector<16x1024xf32>
    %cst_25 = arith.constant dense<0.000000e+00> : vector<1024xf32>
    %63 = vector.multi_reduction <add>, %62, %cst_25 [0] : vector<16x1024xf32> to vector<1024xf32>
    %64 = vector.shape_cast %63 : vector<1024xf32> to vector<1x1024xf32>
    %65 = arith.subf %45, %64 : vector<1x1024xf32>
    %cst_26 = arith.constant dense<0xFF800000> : vector<1024xf32>
    %66 = vector.multi_reduction <maximumf>, %43, %cst_26 [0] : vector<16x1024xf32> to vector<1024xf32>
    %67 = vector.shape_cast %66 : vector<1024xf32> to vector<1x1024xf32>
    %68 = vector.broadcast %67 : vector<1x1024xf32> to vector<16x1024xf32>
    %69 = arith.subf %43, %68 : vector<16x1024xf32>
    %70 = math.exp %69 : vector<16x1024xf32>
    %cst_27 = arith.constant dense<0.000000e+00> : vector<1024xf32>
    %71 = vector.multi_reduction <add>, %70, %cst_27 [0] : vector<16x1024xf32> to vector<1024xf32>
    %72 = vector.shape_cast %71 : vector<1024xf32> to vector<1x1024xf32>
    %73 = math.log %72 : vector<1x1024xf32>
    %74 = arith.addf %67, %73 : vector<1x1024xf32>
    %75 = arith.subf %46, %74 : vector<1x1024xf32>
    %76 = arith.addf %52, %65 : vector<1x1024xf32>
    %77 = arith.addf %76, %75 : vector<1x1024xf32>
    %78 = arith.mulf %77, %33 : vector<1x1024xf32>
    %cst_28 = arith.constant dense<0.000000e+00> : vector<1xf32>
    %79 = vector.multi_reduction <add>, %78, %cst_28 [1] : vector<1x1024xf32> to vector<1xf32>
    %80 = vector.shape_cast %79 : vector<1xf32> to vector<1x1xf32>
    %81 = vector.extract_strided_slice %6 {offsets = [0, 0], sizes = [1, 1], strides = [1, 1]} : vector<1x4xf32> to vector<1x1xf32>
    %82 = arith.mulf %81, %80 : vector<1x1xf32>
    %83 = arith.addf %34, %82 : vector<1x1xf32>
    %84 = arith.addf %35, %52 : vector<1x1024xf32>
    %85 = arith.addf %36, %65 : vector<1x1024xf32>
    %86 = arith.addf %37, %75 : vector<1x1024xf32>
    %c0_29 = arith.constant 0 : index
    %c1 = arith.constant 1 : index
    %c0_30 = arith.constant 0 : index
    %c0_31 = arith.constant 0 : index
    %87 = vector.load %arg2[%c0_29, %c1, %c0_30, %c0_31] : memref<1x4x56x16xf32, #tpu.memory_space<vmem>>, vector<1x1x56x16xf32>
    %88 = vector.shape_cast %87 : vector<1x1x56x16xf32> to vector<56x16xf32>
    %cst_32 = arith.constant dense<0.000000e+00> : vector<56x1024xf32>
    %89 = tpu.matmul %88, %1, %cst_32 {dimension_numbers = #tpu.dot_dimension_numbers<[1], [0], [0], [1], [0, 0, 1, 1], [], []>} : vector<56x16xf32>, vector<16x1024xf32>, vector<56x1024xf32> -> vector<56x1024xf32>
    %90 = vector.extract_strided_slice %89 {offsets = [0, 0], sizes = [16, 1024], strides = [1, 1]} : vector<56x1024xf32> to vector<16x1024xf32>
    %91 = vector.extract_strided_slice %89 {offsets = [16, 0], sizes = [16, 1024], strides = [1, 1]} : vector<56x1024xf32> to vector<16x1024xf32>
    %92 = vector.extract_strided_slice %89 {offsets = [32, 0], sizes = [16, 1024], strides = [1, 1]} : vector<56x1024xf32> to vector<16x1024xf32>
    %93 = vector.extract_strided_slice %89 {offsets = [48, 0], sizes = [1, 1024], strides = [1, 1]} : vector<56x1024xf32> to vector<1x1024xf32>
    %94 = vector.extract_strided_slice %89 {offsets = [49, 0], sizes = [1, 1024], strides = [1, 1]} : vector<56x1024xf32> to vector<1x1024xf32>
    %95 = vector.extract_strided_slice %89 {offsets = [50, 0], sizes = [1, 1024], strides = [1, 1]} : vector<56x1024xf32> to vector<1x1024xf32>
    %96 = arith.mulf %90, %90 : vector<16x1024xf32>
    %cst_33 = arith.constant dense<0.000000e+00> : vector<1024xf32>
    %97 = vector.multi_reduction <add>, %96, %cst_33 [0] : vector<16x1024xf32> to vector<1024xf32>
    %98 = vector.shape_cast %97 : vector<1024xf32> to vector<1x1024xf32>
    %99 = arith.addf %98, %93 : vector<1x1024xf32>
    %cst_34 = arith.constant -5.000000e-01 : f32
    %100 = vector.broadcast %cst_34 : f32 to vector<1x1024xf32>
    %101 = arith.mulf %100, %99 : vector<1x1024xf32>
    %cst_35 = arith.constant 0.000000e+00 : f32
    %102 = vector.broadcast %cst_35 : f32 to vector<16x1024xf32>
    %103 = arith.maximumf %91, %102 : vector<16x1024xf32>
    %104 = math.absf %91 : vector<16x1024xf32>
    %cst_36 = arith.constant 0.000000e+00 : f32
    %105 = vector.broadcast %cst_36 : f32 to vector<16x1024xf32>
    %106 = arith.subf %105, %104 : vector<16x1024xf32>
    %107 = math.exp %106 : vector<16x1024xf32>
    %cst_37 = arith.constant 1.000000e+00 : f32
    %108 = vector.broadcast %cst_37 : f32 to vector<16x1024xf32>
    %109 = arith.addf %108, %107 : vector<16x1024xf32>
    %110 = math.log %109 : vector<16x1024xf32>
    %111 = arith.addf %103, %110 : vector<16x1024xf32>
    %cst_38 = arith.constant dense<0.000000e+00> : vector<1024xf32>
    %112 = vector.multi_reduction <add>, %111, %cst_38 [0] : vector<16x1024xf32> to vector<1024xf32>
    %113 = vector.shape_cast %112 : vector<1024xf32> to vector<1x1024xf32>
    %114 = arith.subf %94, %113 : vector<1x1024xf32>
    %cst_39 = arith.constant dense<0xFF800000> : vector<1024xf32>
    %115 = vector.multi_reduction <maximumf>, %92, %cst_39 [0] : vector<16x1024xf32> to vector<1024xf32>
    %116 = vector.shape_cast %115 : vector<1024xf32> to vector<1x1024xf32>
    %117 = vector.broadcast %116 : vector<1x1024xf32> to vector<16x1024xf32>
    %118 = arith.subf %92, %117 : vector<16x1024xf32>
    %119 = math.exp %118 : vector<16x1024xf32>
    %cst_40 = arith.constant dense<0.000000e+00> : vector<1024xf32>
    %120 = vector.multi_reduction <add>, %119, %cst_40 [0] : vector<16x1024xf32> to vector<1024xf32>
    %121 = vector.shape_cast %120 : vector<1024xf32> to vector<1x1024xf32>
    %122 = math.log %121 : vector<1x1024xf32>
    %123 = arith.addf %116, %122 : vector<1x1024xf32>
    %124 = arith.subf %95, %123 : vector<1x1024xf32>
    %125 = arith.addf %101, %114 : vector<1x1024xf32>
    %126 = arith.addf %125, %124 : vector<1x1024xf32>
    %127 = arith.mulf %126, %33 : vector<1x1024xf32>
    %cst_41 = arith.constant dense<0.000000e+00> : vector<1xf32>
    %128 = vector.multi_reduction <add>, %127, %cst_41 [1] : vector<1x1024xf32> to vector<1xf32>
    %129 = vector.shape_cast %128 : vector<1xf32> to vector<1x1xf32>
    %130 = vector.extract_strided_slice %6 {offsets = [0, 1], sizes = [1, 1], strides = [1, 1]} : vector<1x4xf32> to vector<1x1xf32>
    %131 = arith.mulf %130, %129 : vector<1x1xf32>
    %132 = arith.addf %83, %131 : vector<1x1xf32>
    %133 = arith.addf %84, %101 : vector<1x1024xf32>
    %134 = arith.addf %85, %114 : vector<1x1024xf32>
    %135 = arith.addf %86, %124 : vector<1x1024xf32>
    %c0_42 = arith.constant 0 : index
    %c2 = arith.constant 2 : index
    %c0_43 = arith.constant 0 : index
    %c0_44 = arith.constant 0 : index
    %136 = vector.load %arg2[%c0_42, %c2, %c0_43, %c0_44] : memref<1x4x56x16xf32, #tpu.memory_space<vmem>>, vector<1x1x56x16xf32>
    %137 = vector.shape_cast %136 : vector<1x1x56x16xf32> to vector<56x16xf32>
    %cst_45 = arith.constant dense<0.000000e+00> : vector<56x1024xf32>
    %138 = tpu.matmul %137, %1, %cst_45 {dimension_numbers = #tpu.dot_dimension_numbers<[1], [0], [0], [1], [0, 0, 1, 1], [], []>} : vector<56x16xf32>, vector<16x1024xf32>, vector<56x1024xf32> -> vector<56x1024xf32>
    %139 = vector.extract_strided_slice %138 {offsets = [0, 0], sizes = [16, 1024], strides = [1, 1]} : vector<56x1024xf32> to vector<16x1024xf32>
    %140 = vector.extract_strided_slice %138 {offsets = [16, 0], sizes = [16, 1024], strides = [1, 1]} : vector<56x1024xf32> to vector<16x1024xf32>
    %141 = vector.extract_strided_slice %138 {offsets = [32, 0], sizes = [16, 1024], strides = [1, 1]} : vector<56x1024xf32> to vector<16x1024xf32>
    %142 = vector.extract_strided_slice %138 {offsets = [48, 0], sizes = [1, 1024], strides = [1, 1]} : vector<56x1024xf32> to vector<1x1024xf32>
    %143 = vector.extract_strided_slice %138 {offsets = [49, 0], sizes = [1, 1024], strides = [1, 1]} : vector<56x1024xf32> to vector<1x1024xf32>
    %144 = vector.extract_strided_slice %138 {offsets = [50, 0], sizes = [1, 1024], strides = [1, 1]} : vector<56x1024xf32> to vector<1x1024xf32>
    %145 = arith.mulf %139, %139 : vector<16x1024xf32>
    %cst_46 = arith.constant dense<0.000000e+00> : vector<1024xf32>
    %146 = vector.multi_reduction <add>, %145, %cst_46 [0] : vector<16x1024xf32> to vector<1024xf32>
    %147 = vector.shape_cast %146 : vector<1024xf32> to vector<1x1024xf32>
    %148 = arith.addf %147, %142 : vector<1x1024xf32>
    %cst_47 = arith.constant -5.000000e-01 : f32
    %149 = vector.broadcast %cst_47 : f32 to vector<1x1024xf32>
    %150 = arith.mulf %149, %148 : vector<1x1024xf32>
    %cst_48 = arith.constant 0.000000e+00 : f32
    %151 = vector.broadcast %cst_48 : f32 to vector<16x1024xf32>
    %152 = arith.maximumf %140, %151 : vector<16x1024xf32>
    %153 = math.absf %140 : vector<16x1024xf32>
    %cst_49 = arith.constant 0.000000e+00 : f32
    %154 = vector.broadcast %cst_49 : f32 to vector<16x1024xf32>
    %155 = arith.subf %154, %153 : vector<16x1024xf32>
    %156 = math.exp %155 : vector<16x1024xf32>
    %cst_50 = arith.constant 1.000000e+00 : f32
    %157 = vector.broadcast %cst_50 : f32 to vector<16x1024xf32>
    %158 = arith.addf %157, %156 : vector<16x1024xf32>
    %159 = math.log %158 : vector<16x1024xf32>
    %160 = arith.addf %152, %159 : vector<16x1024xf32>
    %cst_51 = arith.constant dense<0.000000e+00> : vector<1024xf32>
    %161 = vector.multi_reduction <add>, %160, %cst_51 [0] : vector<16x1024xf32> to vector<1024xf32>
    %162 = vector.shape_cast %161 : vector<1024xf32> to vector<1x1024xf32>
    %163 = arith.subf %143, %162 : vector<1x1024xf32>
    %cst_52 = arith.constant dense<0xFF800000> : vector<1024xf32>
    %164 = vector.multi_reduction <maximumf>, %141, %cst_52 [0] : vector<16x1024xf32> to vector<1024xf32>
    %165 = vector.shape_cast %164 : vector<1024xf32> to vector<1x1024xf32>
    %166 = vector.broadcast %165 : vector<1x1024xf32> to vector<16x1024xf32>
    %167 = arith.subf %141, %166 : vector<16x1024xf32>
    %168 = math.exp %167 : vector<16x1024xf32>
    %cst_53 = arith.constant dense<0.000000e+00> : vector<1024xf32>
    %169 = vector.multi_reduction <add>, %168, %cst_53 [0] : vector<16x1024xf32> to vector<1024xf32>
    %170 = vector.shape_cast %169 : vector<1024xf32> to vector<1x1024xf32>
    %171 = math.log %170 : vector<1x1024xf32>
    %172 = arith.addf %165, %171 : vector<1x1024xf32>
    %173 = arith.subf %144, %172 : vector<1x1024xf32>
    %174 = arith.addf %150, %163 : vector<1x1024xf32>
    %175 = arith.addf %174, %173 : vector<1x1024xf32>
    %176 = arith.mulf %175, %33 : vector<1x1024xf32>
    %cst_54 = arith.constant dense<0.000000e+00> : vector<1xf32>
    %177 = vector.multi_reduction <add>, %176, %cst_54 [1] : vector<1x1024xf32> to vector<1xf32>
    %178 = vector.shape_cast %177 : vector<1xf32> to vector<1x1xf32>
    %179 = vector.extract_strided_slice %6 {offsets = [0, 2], sizes = [1, 1], strides = [1, 1]} : vector<1x4xf32> to vector<1x1xf32>
    %180 = arith.mulf %179, %178 : vector<1x1xf32>
    %181 = arith.addf %132, %180 : vector<1x1xf32>
    %182 = arith.addf %133, %150 : vector<1x1024xf32>
    %183 = arith.addf %134, %163 : vector<1x1024xf32>
    %184 = arith.addf %135, %173 : vector<1x1024xf32>
    %c0_55 = arith.constant 0 : index
    %c3 = arith.constant 3 : index
    %c0_56 = arith.constant 0 : index
    %c0_57 = arith.constant 0 : index
    %185 = vector.load %arg2[%c0_55, %c3, %c0_56, %c0_57] : memref<1x4x56x16xf32, #tpu.memory_space<vmem>>, vector<1x1x56x16xf32>
    %186 = vector.shape_cast %185 : vector<1x1x56x16xf32> to vector<56x16xf32>
    %cst_58 = arith.constant dense<0.000000e+00> : vector<56x1024xf32>
    %187 = tpu.matmul %186, %1, %cst_58 {dimension_numbers = #tpu.dot_dimension_numbers<[1], [0], [0], [1], [0, 0, 1, 1], [], []>} : vector<56x16xf32>, vector<16x1024xf32>, vector<56x1024xf32> -> vector<56x1024xf32>
    %188 = vector.extract_strided_slice %187 {offsets = [0, 0], sizes = [16, 1024], strides = [1, 1]} : vector<56x1024xf32> to vector<16x1024xf32>
    %189 = vector.extract_strided_slice %187 {offsets = [16, 0], sizes = [16, 1024], strides = [1, 1]} : vector<56x1024xf32> to vector<16x1024xf32>
    %190 = vector.extract_strided_slice %187 {offsets = [32, 0], sizes = [16, 1024], strides = [1, 1]} : vector<56x1024xf32> to vector<16x1024xf32>
    %191 = vector.extract_strided_slice %187 {offsets = [48, 0], sizes = [1, 1024], strides = [1, 1]} : vector<56x1024xf32> to vector<1x1024xf32>
    %192 = vector.extract_strided_slice %187 {offsets = [49, 0], sizes = [1, 1024], strides = [1, 1]} : vector<56x1024xf32> to vector<1x1024xf32>
    %193 = vector.extract_strided_slice %187 {offsets = [50, 0], sizes = [1, 1024], strides = [1, 1]} : vector<56x1024xf32> to vector<1x1024xf32>
    %194 = arith.mulf %188, %188 : vector<16x1024xf32>
    %cst_59 = arith.constant dense<0.000000e+00> : vector<1024xf32>
    %195 = vector.multi_reduction <add>, %194, %cst_59 [0] : vector<16x1024xf32> to vector<1024xf32>
    %196 = vector.shape_cast %195 : vector<1024xf32> to vector<1x1024xf32>
    %197 = arith.addf %196, %191 : vector<1x1024xf32>
    %cst_60 = arith.constant -5.000000e-01 : f32
    %198 = vector.broadcast %cst_60 : f32 to vector<1x1024xf32>
    %199 = arith.mulf %198, %197 : vector<1x1024xf32>
    %cst_61 = arith.constant 0.000000e+00 : f32
    %200 = vector.broadcast %cst_61 : f32 to vector<16x1024xf32>
    %201 = arith.maximumf %189, %200 : vector<16x1024xf32>
    %202 = math.absf %189 : vector<16x1024xf32>
    %cst_62 = arith.constant 0.000000e+00 : f32
    %203 = vector.broadcast %cst_62 : f32 to vector<16x1024xf32>
    %204 = arith.subf %203, %202 : vector<16x1024xf32>
    %205 = math.exp %204 : vector<16x1024xf32>
    %cst_63 = arith.constant 1.000000e+00 : f32
    %206 = vector.broadcast %cst_63 : f32 to vector<16x1024xf32>
    %207 = arith.addf %206, %205 : vector<16x1024xf32>
    %208 = math.log %207 : vector<16x1024xf32>
    %209 = arith.addf %201, %208 : vector<16x1024xf32>
    %cst_64 = arith.constant dense<0.000000e+00> : vector<1024xf32>
    %210 = vector.multi_reduction <add>, %209, %cst_64 [0] : vector<16x1024xf32> to vector<1024xf32>
    %211 = vector.shape_cast %210 : vector<1024xf32> to vector<1x1024xf32>
    %212 = arith.subf %192, %211 : vector<1x1024xf32>
    %cst_65 = arith.constant dense<0xFF800000> : vector<1024xf32>
    %213 = vector.multi_reduction <maximumf>, %190, %cst_65 [0] : vector<16x1024xf32> to vector<1024xf32>
    %214 = vector.shape_cast %213 : vector<1024xf32> to vector<1x1024xf32>
    %215 = vector.broadcast %214 : vector<1x1024xf32> to vector<16x1024xf32>
    %216 = arith.subf %190, %215 : vector<16x1024xf32>
    %217 = math.exp %216 : vector<16x1024xf32>
    %cst_66 = arith.constant dense<0.000000e+00> : vector<1024xf32>
    %218 = vector.multi_reduction <add>, %217, %cst_66 [0] : vector<16x1024xf32> to vector<1024xf32>
    %219 = vector.shape_cast %218 : vector<1024xf32> to vector<1x1024xf32>
    %220 = math.log %219 : vector<1x1024xf32>
    %221 = arith.addf %214, %220 : vector<1x1024xf32>
    %222 = arith.subf %193, %221 : vector<1x1024xf32>
    %223 = arith.addf %199, %212 : vector<1x1024xf32>
    %224 = arith.addf %223, %222 : vector<1x1024xf32>
    %225 = arith.mulf %224, %33 : vector<1x1024xf32>
    %cst_67 = arith.constant dense<0.000000e+00> : vector<1xf32>
    %226 = vector.multi_reduction <add>, %225, %cst_67 [1] : vector<1x1024xf32> to vector<1xf32>
    %227 = vector.shape_cast %226 : vector<1xf32> to vector<1x1xf32>
    %228 = vector.extract_strided_slice %6 {offsets = [0, 3], sizes = [1, 1], strides = [1, 1]} : vector<1x4xf32> to vector<1x1xf32>
    %229 = arith.mulf %228, %227 : vector<1x1xf32>
    %230 = arith.addf %181, %229 : vector<1x1xf32>
    %231 = arith.addf %182, %199 : vector<1x1024xf32>
    %232 = arith.addf %183, %212 : vector<1x1024xf32>
    %233 = arith.addf %184, %222 : vector<1x1024xf32>
    %234 = arith.subf %230, %16 : vector<1x1xf32>
    %235 = arith.subf %234, %28 : vector<1x1xf32>
    %236 = tpu.iota {dimensions = array<i32: 1>} : vector<1x4xi32>
    %c0_i32 = arith.constant 0 : i32
    %237 = vector.broadcast %c0_i32 : i32 to vector<1x4xi32>
    %238 = arith.cmpi eq, %236, %237 : vector<1x4xi32>
    %cst_68 = arith.constant 0.000000e+00 : f32
    %239 = vector.shape_cast %235 : vector<1x1xf32> to vector<1x1xf32>
    %240 = vector.broadcast %239 : vector<1x1xf32> to vector<1x4xf32>
    %241 = vector.broadcast %cst_68 : f32 to vector<1x4xf32>
    %242 = arith.select %238, %240, %241 : vector<1x4xi1>, vector<1x4xf32>
    %c1_i32 = arith.constant 1 : i32
    %243 = vector.broadcast %c1_i32 : i32 to vector<1x4xi32>
    %244 = arith.cmpi eq, %236, %243 : vector<1x4xi32>
    %cst_69 = arith.constant 0.000000e+00 : f32
    %245 = vector.shape_cast %230 : vector<1x1xf32> to vector<1x1xf32>
    %246 = vector.broadcast %245 : vector<1x1xf32> to vector<1x4xf32>
    %247 = vector.broadcast %cst_69 : f32 to vector<1x4xf32>
    %248 = arith.select %244, %246, %247 : vector<1x4xi1>, vector<1x4xf32>
    %249 = arith.addf %242, %248 : vector<1x4xf32>
    %c2_i32 = arith.constant 2 : i32
    %250 = vector.broadcast %c2_i32 : i32 to vector<1x4xi32>
    %251 = arith.cmpi eq, %236, %250 : vector<1x4xi32>
    %cst_70 = arith.constant 0.000000e+00 : f32
    %252 = vector.shape_cast %16 : vector<1x1xf32> to vector<1x1xf32>
    %253 = vector.broadcast %252 : vector<1x1xf32> to vector<1x4xf32>
    %254 = vector.broadcast %cst_70 : f32 to vector<1x4xf32>
    %255 = arith.select %251, %253, %254 : vector<1x4xi1>, vector<1x4xf32>
    %256 = arith.addf %249, %255 : vector<1x4xf32>
    %c3_i32 = arith.constant 3 : i32
    %257 = vector.broadcast %c3_i32 : i32 to vector<1x4xi32>
    %258 = arith.cmpi eq, %236, %257 : vector<1x4xi32>
    %cst_71 = arith.constant 0.000000e+00 : f32
    %259 = vector.shape_cast %28 : vector<1x1xf32> to vector<1x1xf32>
    %260 = vector.broadcast %259 : vector<1x1xf32> to vector<1x4xf32>
    %261 = vector.broadcast %cst_71 : f32 to vector<1x4xf32>
    %262 = arith.select %258, %260, %261 : vector<1x4xi1>, vector<1x4xf32>
    %263 = arith.addf %256, %262 : vector<1x4xf32>
    %264 = vector.shape_cast %263 : vector<1x4xf32> to vector<1x1x4xf32>
    %c0_72 = arith.constant 0 : index
    %c0_73 = arith.constant 0 : index
    %c0_74 = arith.constant 0 : index
    %265 = vector.load %arg4[%c0_72, %c0_73, %c0_74] : memref<1x1x4xf32, #tpu.memory_space<vmem>>, vector<1x1x4xf32>
    tpu.vector_store %arg4[%c0_72, %c0_73, %c0_74], %264 {strides = array<i32>} : memref<1x1x4xf32, #tpu.memory_space<vmem>>, vector<1x1x4xf32>,
    %cst_75 = arith.constant dense<0xFF800000> : vector<1xf32>
    %266 = vector.multi_reduction <maximumf>, %6, %cst_75 [1] : vector<1x4xf32> to vector<1xf32>
    %267 = vector.shape_cast %266 : vector<1xf32> to vector<1x1xf32>
    %268 = vector.broadcast %267 : vector<1x1xf32> to vector<1x4xf32>
    %269 = arith.subf %6, %268 : vector<1x4xf32>
    %270 = math.exp %269 : vector<1x4xf32>
    %cst_76 = arith.constant dense<0.000000e+00> : vector<1xf32>
    %271 = vector.multi_reduction <add>, %270, %cst_76 [1] : vector<1x4xf32> to vector<1xf32>
    %272 = vector.shape_cast %271 : vector<1xf32> to vector<1x1xf32>
    %273 = vector.broadcast %272 : vector<1x1xf32> to vector<1x4xf32>
    %274 = arith.divf %270, %273 : vector<1x4xf32>
    %275 = vector.shape_cast %274 : vector<1x4xf32> to vector<1x1x4xf32>
    %c0_77 = arith.constant 0 : index
    %c0_78 = arith.constant 0 : index
    %c0_79 = arith.constant 0 : index
    %276 = vector.load %arg5[%c0_77, %c0_78, %c0_79] : memref<1x1x4xf32, #tpu.memory_space<vmem>>, vector<1x1x4xf32>
    tpu.vector_store %arg5[%c0_77, %c0_78, %c0_79], %275 {strides = array<i32>} : memref<1x1x4xf32, #tpu.memory_space<vmem>>, vector<1x1x4xf32>,
    %277 = arith.mulf %231, %33 : vector<1x1024xf32>
    %278 = vector.shape_cast %277 : vector<1x1024xf32> to vector<1x1x1024xf32>
    %c0_80 = arith.constant 0 : index
    %c0_81 = arith.constant 0 : index
    %c0_82 = arith.constant 0 : index
    %279 = vector.load %arg6[%c0_80, %c0_81, %c0_82] : memref<1x1x1024xf32, #tpu.memory_space<vmem>>, vector<1x1x1024xf32>
    tpu.vector_store %arg6[%c0_80, %c0_81, %c0_82], %278 {strides = array<i32>} : memref<1x1x1024xf32, #tpu.memory_space<vmem>>, vector<1x1x1024xf32>,
    %280 = arith.mulf %232, %33 : vector<1x1024xf32>
    %281 = vector.shape_cast %280 : vector<1x1024xf32> to vector<1x1x1024xf32>
    %c0_83 = arith.constant 0 : index
    %c0_84 = arith.constant 0 : index
    %c0_85 = arith.constant 0 : index
    %282 = vector.load %arg7[%c0_83, %c0_84, %c0_85] : memref<1x1x1024xf32, #tpu.memory_space<vmem>>, vector<1x1x1024xf32>
    tpu.vector_store %arg7[%c0_83, %c0_84, %c0_85], %281 {strides = array<i32>} : memref<1x1x1024xf32, #tpu.memory_space<vmem>>, vector<1x1x1024xf32>,
    %283 = arith.mulf %233, %33 : vector<1x1024xf32>
    %284 = vector.shape_cast %283 : vector<1x1024xf32> to vector<1x1x1024xf32>
    %c0_86 = arith.constant 0 : index
    %c0_87 = arith.constant 0 : index
    %c0_88 = arith.constant 0 : index
    %285 = vector.load %arg8[%c0_86, %c0_87, %c0_88] : memref<1x1x1024xf32, #tpu.memory_space<vmem>>, vector<1x1x1024xf32>
    tpu.vector_store %arg8[%c0_86, %c0_87, %c0_88], %284 {strides = array<i32>} : memref<1x1x1024xf32, #tpu.memory_space<vmem>>, vector<1x1x1024xf32>,
    return
  }
  func.func @transform_0(%arg0: i32) -> (i32, i32, i32) {
    %c0_i32 = arith.constant 0 : i32
    %c0_i32_0 = arith.constant 0 : i32
    %c0_i32_1 = arith.constant 0 : i32
    return %arg0, %c0_i32, %c0_i32_0 : i32, i32, i32
  }
  func.func @transform_1(%arg0: i32) -> (i32, i32, i32, i32) {
    %c0_i32 = arith.constant 0 : i32
    %c0_i32_0 = arith.constant 0 : i32
    %c0_i32_1 = arith.constant 0 : i32
    %c0_i32_2 = arith.constant 0 : i32
    return %arg0, %c0_i32, %c0_i32_0, %c0_i32_1 : i32, i32, i32, i32
  }
  func.func @transform_2(%arg0: i32) -> (i32, i32, i32) {
    %c0_i32 = arith.constant 0 : i32
    %c0_i32_0 = arith.constant 0 : i32
    %c0_i32_1 = arith.constant 0 : i32
    return %arg0, %c0_i32, %c0_i32_0 : i32, i32, i32
  }
  func.func @transform_3(%arg0: i32) -> (i32, i32, i32) {
    %c0_i32 = arith.constant 0 : i32
    %c0_i32_0 = arith.constant 0 : i32
    %c0_i32_1 = arith.constant 0 : i32
    return %arg0, %c0_i32, %c0_i32_0 : i32, i32, i32
  }
  func.func @transform_4(%arg0: i32) -> (i32, i32, i32) {
    %c0_i32 = arith.constant 0 : i32
    %c0_i32_0 = arith.constant 0 : i32
    %c0_i32_1 = arith.constant 0 : i32
    return %arg0, %c0_i32, %c0_i32_0 : i32, i32, i32
  }
  func.func @transform_5(%arg0: i32) -> (i32, i32, i32) {
    %c0_i32 = arith.constant 0 : i32
    %c0_i32_0 = arith.constant 0 : i32
    %c0_i32_1 = arith.constant 0 : i32
    return %arg0, %c0_i32, %c0_i32_0 : i32, i32, i32
  }
  func.func @transform_6(%arg0: i32) -> (i32, i32, i32) {
    %c0_i32 = arith.constant 0 : i32
    %c0_i32_0 = arith.constant 0 : i32
    %c0_i32_1 = arith.constant 0 : i32
    return %arg0, %c0_i32, %c0_i32_0 : i32, i32, i32
  }
  func.func @transform_7(%arg0: i32) -> (i32, i32, i32) {
    %c0_i32 = arith.constant 0 : i32
    %c0_i32_0 = arith.constant 0 : i32
    %c0_i32_1 = arith.constant 0 : i32
    return %arg0, %c0_i32, %c0_i32_0 : i32, i32, i32
  }
}

</mosaic_0001>

<bundles_post_ra>
// kernel: tpu_custom_call.1
= control target key start
LH: loop header
LB: loop body
LE: loop exit
PB: predicated region body
PF: predicated region fallthrough
CT: control target
= control target key end

     0   :  { %s8408_s0 = inlined_call_operand.vmem [shape: f32[2,16,1024], index: 0, kind: input, shape index: {}]   ;;  %s8409_s1 = inlined_call_operand.vmem [shape: f32[2,4,56,16], index: 1, kind: input, shape index: {}]   ;;  %s8410_s2 = inlined_call_operand.vmem [shape: f32[2,1,32], index: 2, kind: input, shape index: {}]   ;;  %s8411_s3 = inlined_call_operand.hbm [shape: f32[2,1,4], index: 3, kind: output, shape index: {0}]   ;;  %s8412_s4 = inlined_call_operand.hbm [shape: f32[2,1,4], index: 4, kind: output, shape index: {1}]   ;;  %s8413_s5 = inlined_call_operand.hbm [shape: f32[2,1,1024], index: 5, kind: output, shape index: {2}]   ;;  %s8414_s6 = inlined_call_operand.hbm [shape: f32[2,1,1024], index: 6, kind: output, shape index: {3}]   ;;  %s8415_s7 = inlined_call_operand.hbm [shape: f32[2,1,1024], index: 7, kind: output, shape index: {4}]  }
   0x1   :  { %8495 = sst [smem:[#allocation80_spill]] %s8408_s0 }
   0x2   :  { %8496 = sst [smem:[#allocation81_spill]] %s8409_s1 }
   0x3   :  { %8497 = sst [smem:[#allocation82_spill]] %s8410_s2 }
   0x4   :  { %13 = vsyncpa [#allocation3], 0 }
   0x5   :  { %15 = vsyncpa [#allocation3 + $0x1], 0 }
   0x6   :  { %16 = vsyncpa [#allocation5], 0 }
   0x7   :  { %18 = vsyncpa [#allocation5 + $0x1], 0 }
   0x8   :  { %19 = vsyncpa [#allocation8], 0 }
   0x9   :  { %21 = vsyncpa [#allocation8 + $0x1], 0  ;;  %s5693_s24 = smov 0   ;;  %s5695_s25 = smov 0  }
   0xa   :  { %s5697_s26 = smov 0   ;;  %s5699_s27 = smov 0  }
   0xb LB: > { %s5714_s28 = sadd.s32 4294967295, %s5643_s27   ;;  %s8489_s29 = sadd.s32 4294967294, %s5643_s27   ;;  %s5643_s27 = sphi %s5699_s27, %s8720_s27   ;;  %s5639_s26 = sphi %s5697_s26, %s8719_s26   ;;  %s5635_s25 = sphi %s5695_s25, %s8718_s25   ;;  %s5631_s24 = sphi %s5693_s24, %s8717_s24  }
   0xc   : > { %s5718_s30 = sadd.s32 1, %s5643_s27   ;;  %s112_s8 = sadd.s32 1, %s5639_s26 }
   0xd   : > { %s109_s9 = ssub.s32 %s5643_s27, %s5718_s30  ;;  %p122_p0 = scmp.ne.s32.totalorder %s5639_s26, %s5635_s25 }
   0xe   : > { %p110_p1 = scmp.eq.s32.totalorder %s109_s9, 0  ;;  %p123_p2 = scmp.eq.s32.totalorder %s5714_s28, 1 }
   0xf   : > { %p128_p3 = scmp.ne.s32.totalorder %s5635_s25, %s5631_s24  ;;  %p129_p4 = scmp.eq.s32.totalorder %s8489_s29, 1 }
  0x10   : > { %s5731_s10 = scalar_select %p110_p1, %s5639_s26, %s112_s8  }
  0x11   : > { %p5733_p5 = por %p123_p2, %p122_p0  ;;  %p5737_p6 = por %p129_p4, %p128_p3 }
  0x12   : > { %p4651_p7 = scmp.ge.s32.totalorder %s5643_s27, 1  ;;  %p273_p8 = scmp.lt.s32.totalorder %s5643_s27, 3 }
  0x14   : > { %p274_p9 = pnand %p4651_p7, %p273_p8 }
  0x16   : > { %277 = sbr.rel (%p274_p9) target bundleno = 1166 (0x48e), region = 32 }
  0x1b   : > { %p331_p10 = scmp.lt.s32.totalorder %s5714_s28, 1  ;;  %s8500_s0 = sld [smem:[#allocation80_spill]]  ;;  %vm458_vm0 = vcmask 130048   ;;  %vm4234_vm1 = vcmask 155776   ;;  %vm1344_vm2 = vcmask 1040384   ;;  %vm386_vm3 = vcmask 24576  }
  0x1c   : > { %s8501_s1 = sld [smem:[#allocation81_spill]]  ;;  %s5645_s9 = smov 8   ;;  %vm376_vm4 = vcmask 57344   ;;  %vm4294_vm10 = vcmask 1042434   ;;  %vm4296_vm11 = vcmask 1041408   ;;  %vm4298_vm12 = vcmask 1044484  }
  0x1d   : > { %s332_s13 = scalar_select %p331_p10, %s5714_s28, 1  ;;  %vm4300_vm13 = vcmask 1046534   ;;  %vm4302_vm14 = vcmask 1045508   ;;  %vm4304_vm15 = vcmask 1043456  }
  0x1e   : > { %s8502_s2 = sld [smem:[#allocation82_spill]]  ;;  %s8190_s16 = sand.u32 1, %s5635_s25  }
  0x1f   : > { %s4913_s14 = sshll.u32 %s332_s13, 7  ;;  %s4914_s15 = smul.u32 224, %s332_s13 }
  0x20   : > { %s8197_s17 = sshll.u32 %s8190_s16, 3  ;;  %s5650_s20 = smov 126  }
  0x21   : > { %s5748_s18 = scalar_lea.vmem %s8500_s0, %s4913_s14  ;;  %s5647_s14 = smov 120  }
  0x22   : > { %s5753_s21 = scalar_lea.vmem %s8501_s1, %s4914_s15  ;;  %v5756_v0 = vld [vmem:[%s5748_s18 + $0x40] sm:$0xff]  ;;  %v5759_v1 = vld [vmem:[%s5748_s18 + $0x48] sm:$0xff]  ;;  %v5762_v2 = vld [vmem:[%s5748_s18 + $0x50] sm:$0xff]  ;;  %s5649_s15 = smov 127  }
  0x23   : > { %494 = vmatpush.msra.mxu0 %v5756_v0  ;;  %532 = vmatpush.msra.mxu1 %v5759_v1  ;;  %v5767_v3 = vld [vmem:[%s5748_s18 + $0x58] sm:$0xff]  ;;  %v5770_v4 = vld [vmem:[%s5748_s18] sm:$0xff]  ;;  %v5773_v5 = vld [vmem:[%s5748_s18 + $0x8] sm:$0xff]  ;;  %s323_s19 = scalar_lea.vmem [#allocation7], %s8197_s17  ;;  %s5651_s22 = smov 125  }
  0x24   : > { %570 = vmatpush.msra.mxu2 %v5762_v2  ;;  %608 = vmatpush.msra.mxu3 %v5767_v3  ;;  %v5778_v6 = vld [vmem:[%s5748_s18 + $0x10] sm:$0xff]  ;;  %v5781_v7 = vld [vmem:[%s5748_s18 + $0x18] sm:$0xff]  ;;  %v5784_v8 = vld [vmem:[%s5753_s21] sm:$0xff]  ;;  %s5799_s8 = scalar_lea.vmem %s8502_s2, %s332_s13  ;;  %s8492_s13 = smov 112  }
  0x25   : > { %495 = vmatpush.msra.mxu0 %v5770_v4  ;;  %533 = vmatpush.msra.mxu1 %v5773_v5  ;;  %v5791_v9 = vld [vmem:[%s5748_s18 + $0x70] sm:$0xff]  ;;  %v5794_v10 = vld [vmem:[%s5748_s18 + $0x78] sm:$0xff]  ;;  %v5806_v11 = vld [vmem:[%s5748_s18 + $0x60] sm:$0xff]  ;;  %s8493_s23 = sand.u32 1, %s5714_s28  }
  0x26   : > { %571 = vmatpush.msra.mxu2 %v5778_v6  ;;  %609 = vmatpush.msra.mxu3 %v5781_v7  ;;  %v5809_v12 = vld [vmem:[%s5748_s18 + $0x68] sm:$0xff]  ;;  %v5816_v13 = vld [vmem:[%s5748_s18 + $0x30] sm:$0xff]  ;;  %v5819_v14 = vld [vmem:[%s5748_s18 + $0x38] sm:$0xff]  ;;  %s8261_s29 = scalar_lea.sflag [#allocation8], %s8493_s23 }
  0x27   : > { %4660 = vmatmul.msk.f32.vlgmr.msra.gmra.mxu0 %vm458_vm0, %v5784_v8  ;;  %4667 = vmatmul.msk.f32.vlgmr.msra.gmra.mxu1 %vm458_vm0, %v5784_v8  ;;  %v5824_v15 = vld [vmem:[%s5748_s18 + $0x20] sm:$0xff]  ;;  %v5827_v16 = vld [vmem:[%s5748_s18 + $0x28] sm:$0xff]  ;;  %v453_v20 = vld [vmem:[%s5753_s21 + $0x10] sm:$0xff] }
  0x28   : > { %4674 = vmatmul.msk.f32.vlgmr.msra.gmra.mxu2 %vm458_vm0, %v5784_v8  ;;  %4681 = vmatmul.msk.f32.vlgmr.msra.gmra.mxu3 %vm458_vm0, %v5784_v8  ;;  %v5830_v17 = vld [vmem:[%s5799_s8] sm:$0x1]  ;;  %v452_v19 = vld [vmem:[%s5753_s21 + $0x8] sm:$0xff]  ;;  %v454_v21 = vld [vmem:[%s5753_s21 + $0x18] sm:$0xff] }
  0x29   : > { %722 = vmatpush.msrb.mxu2 %v5791_v9  ;;  %760 = vmatpush.msrb.mxu3 %v5794_v10  ;;  %v4235_v18 = vsel %vm4234_vm1, %v5830_v17, -inf  ;;  %v363_v22 = vmul.f32 %v5830_v17, %v5830_v17  ;;  %v455_v23 = vld [vmem:[%s5753_s21 + $0x20] sm:$0xff]  ;;  %v456_v24 = vld [vmem:[%s5753_s21 + $0x28] sm:$0xff]  ;;  %v457_v25 = vld [vmem:[%s5753_s21 + $0x30] sm:$0xff]  ;;  %v361_v38 = vmul.f32 1.442695, %v5830_v17 }
  0x2a   : > { %646 = vmatpush.msrb.mxu0 %v5806_v11  ;;  %684 = vmatpush.msrb.mxu1 %v5809_v12  ;;  %v4984_v26 = vld [vmem:[%s5799_s8] ss:$0 sm:$0xff]  ;;  %v5922_v27 = vld [vmem:[%s5753_s21 + $0x38] sm:$0xff]  ;;  %v5952_v31 = vld [vmem:[%s5753_s21 + $0x48] sm:$0xff] }
  0x2b   : > { %723 = vmatpush.msrb.mxu2 %v5816_v13  ;;  %761 = vmatpush.msrb.mxu3 %v5819_v14  ;;  %v5939_v28 = vld [vmem:[%s5753_s21 + $0x40] sm:$0xff]  ;;  %v5963_v36 = vld [vmem:[%s5753_s21 + $0x50] sm:$0xff]  ;;  %v5981_v48 = vld [vmem:[%s5753_s21 + $0x58] sm:$0xff]  ;;  %4985 = vpow2.f32 %v361_v38 }
  0x2c   : > { %647 = vmatpush.msrb.mxu0 %v5824_v15  ;;  %685 = vmatpush.msrb.mxu1 %v5827_v16 }
  0x2d   : > { %4236 = vmax.xlane.f32.xlu1 %v4235_v18  ;;  %1507 = vmatpush.msra.mxu2 %v5762_v2 }
  0x2e   : > { %1545 = vmatpush.msra.mxu3 %v5767_v3  ;;  %1431 = vmatpush.msra.mxu0 %v5756_v0 }
  0x2f   : > { %4661 = vmatmul.msk.f32.gmra.mxu0 %vm458_vm0, %v452_v19  ;;  %4668 = vmatmul.msk.f32.gmra.mxu1 %vm458_vm0, %v452_v19 }
  0x30   : > { %4675 = vmatmul.msk.f32.gmra.mxu2 %vm458_vm0, %v452_v19  ;;  %4682 = vmatmul.msk.f32.gmra.mxu3 %vm458_vm0, %v452_v19 }
  0x31   : > { %1469 = vmatpush.msra.mxu1 %v5759_v1  ;;  %1508 = vmatpush.msra.mxu2 %v5778_v6 }
  0x32   : > { %1546 = vmatpush.msra.mxu3 %v5781_v7  ;;  %1432 = vmatpush.msra.mxu0 %v5770_v4 }
  0x33   : > { %1470 = vmatpush.msra.mxu1 %v5773_v5  ;;  %383 = vrot.lane.b32.xlu0 %v4984_v26, %s8492_s13 }
  0x37   : > { %4662 = vmatmul.msk.f32.gmra.mxu0 %vm458_vm0, %v453_v20  ;;  %4669 = vmatmul.msk.f32.gmra.mxu1 %vm458_vm0, %v453_v20 }
  0x38   : > { %4676 = vmatmul.msk.f32.gmra.mxu2 %vm458_vm0, %v453_v20  ;;  %4683 = vmatmul.msk.f32.gmra.mxu3 %vm458_vm0, %v453_v20 }
  0x3f   : > { %4663 = vmatmul.msk.f32.gmra.mxu0 %vm458_vm0, %v454_v21  ;;  %4670 = vmatmul.msk.f32.gmra.mxu1 %vm458_vm0, %v454_v21 }
  0x40   : > { %4677 = vmatmul.msk.f32.gmra.mxu2 %vm458_vm0, %v454_v21  ;;  %4684 = vmatmul.msk.f32.gmra.mxu3 %vm458_vm0, %v454_v21 }
  0x46   : > { %365 = vrot.lane.b32.xlu1 %v363_v22, %s5645_s9  ;;  %s4435_s9 = sshll.u32 %s323_s19, 4  ;;  %s4436_s9 = int_to_ptr.vmem [resolvable:$true] %s4435_s9 }
  0x47   : > { %4664 = vmatmul.msk.f32.gmra.mxu0 %vm458_vm0, %v455_v23  ;;  %4671 = vmatmul.msk.f32.gmra.mxu1 %vm458_vm0, %v455_v23 }
  0x48   : > { %4678 = vmatmul.msk.f32.gmra.mxu2 %vm458_vm0, %v455_v23  ;;  %4685 = vmatmul.msk.f32.gmra.mxu3 %vm458_vm0, %v455_v23 }
  0x4f   : > { %4665 = vmatmul.msk.f32.gmra.mxu0 %vm458_vm0, %v456_v24  ;;  %4672 = vmatmul.msk.f32.gmra.mxu1 %vm458_vm0, %v456_v24 }
  0x50   : > { %4679 = vmatmul.msk.f32.gmra.mxu2 %vm458_vm0, %v456_v24  ;;  %4686 = vmatmul.msk.f32.gmra.mxu3 %vm458_vm0, %v456_v24 }
  0x57   : > { %4666 = vmatmul.msk.f32.gmra.mxu0 %vm458_vm0, %v457_v25  ;;  %4673 = vmatmul.msk.f32.gmra.mxu1 %vm458_vm0, %v457_v25 }
  0x58   : > { %4680 = vmatmul.msk.f32.gmra.mxu2 %vm458_vm0, %v457_v25  ;;  %4687 = vmatmul.msk.f32.gmra.mxu3 %vm458_vm0, %v457_v25 }
  0x5f   : > { %4688 = vmatmul.msk.f32.vlgmr.msrb.gmra.mxu0 %vm458_vm0, %v5784_v8  ;;  %4695 = vmatmul.msk.f32.vlgmr.msrb.gmra.mxu1 %vm458_vm0, %v5784_v8 }
  0x60   : > { %4702 = vmatmul.msk.f32.vlgmr.msrb.gmra.mxu2 %vm458_vm0, %v5784_v8  ;;  %4709 = vmatmul.msk.f32.vlgmr.msrb.gmra.mxu3 %vm458_vm0, %v5784_v8 }
  0x61   : > { %1659 = vmatpush.msrb.mxu2 %v5791_v9  ;;  %1697 = vmatpush.msrb.mxu3 %v5794_v10 }
  0x62   : > { %1583 = vmatpush.msrb.mxu0 %v5806_v11  ;;  %1621 = vmatpush.msrb.mxu1 %v5809_v12 }
  0x63   : > { %1660 = vmatpush.msrb.mxu2 %v5816_v13  ;;  %1698 = vmatpush.msrb.mxu3 %v5819_v14 }
  0x64   : > { %1584 = vmatpush.msrb.mxu0 %v5824_v15  ;;  %1622 = vmatpush.msrb.mxu1 %v5827_v16 }
  0x67   : > { %4689 = vmatmul.msk.f32.gmra.mxu0 %vm458_vm0, %v452_v19  ;;  %4696 = vmatmul.msk.f32.gmra.mxu1 %vm458_vm0, %v452_v19 }
  0x68   : > { %4703 = vmatmul.msk.f32.gmra.mxu2 %vm458_vm0, %v452_v19  ;;  %4710 = vmatmul.msk.f32.gmra.mxu3 %vm458_vm0, %v452_v19 }
  0x6f   : > { %4690 = vmatmul.msk.f32.gmra.mxu0 %vm458_vm0, %v453_v20  ;;  %4697 = vmatmul.msk.f32.gmra.mxu1 %vm458_vm0, %v453_v20 }
  0x70   : > { %4704 = vmatmul.msk.f32.gmra.mxu2 %vm458_vm0, %v453_v20  ;;  %4711 = vmatmul.msk.f32.gmra.mxu3 %vm458_vm0, %v453_v20 }
  0x77   : > { %4691 = vmatmul.msk.f32.gmra.mxu0 %vm458_vm0, %v454_v21  ;;  %4698 = vmatmul.msk.f32.gmra.mxu1 %vm458_vm0, %v454_v21 }
  0x78   : > { %4705 = vmatmul.msk.f32.gmra.mxu2 %vm458_vm0, %v454_v21  ;;  %4712 = vmatmul.msk.f32.gmra.mxu3 %vm458_vm0, %v454_v21 }
  0x7f   : > { %4692 = vmatmul.msk.f32.gmra.mxu0 %vm458_vm0, %v455_v23  ;;  %4699 = vmatmul.msk.f32.gmra.mxu1 %vm458_vm0, %v455_v23 }
  0x80   : > { %4706 = vmatmul.msk.f32.gmra.mxu2 %vm458_vm0, %v455_v23  ;;  %4713 = vmatmul.msk.f32.gmra.mxu3 %vm458_vm0, %v455_v23 }
  0x87   : > { %4693 = vmatmul.msk.f32.gmra.mxu0 %vm458_vm0, %v456_v24  ;;  %4700 = vmatmul.msk.f32.gmra.mxu1 %vm458_vm0, %v456_v24 }
  0x88   : > { %4707 = vmatmul.msk.f32.gmra.mxu2 %vm458_vm0, %v456_v24  ;;  %4714 = vmatmul.msk.f32.gmra.mxu3 %vm458_vm0, %v456_v24 }
  0x8f   : > { %4694 = vmatmul.msk.f32.gmra.mxu0 %vm458_vm0, %v457_v25  ;;  %4701 = vmatmul.msk.f32.gmra.mxu1 %vm458_vm0, %v457_v25 }
  0x90   : > { %4708 = vmatmul.msk.f32.gmra.mxu2 %vm458_vm0, %v457_v25  ;;  %4715 = vmatmul.msk.f32.gmra.mxu3 %vm458_vm0, %v457_v25 }
  0x97   : > { %4723 = vmatmul.msk.f32.vlgmr.msra.gmra.mxu0 %vm458_vm0, %v5922_v27  ;;  %4730 = vmatmul.msk.f32.vlgmr.msra.gmra.mxu1 %vm458_vm0, %v5922_v27 }
  0x98   : > { %4737 = vmatmul.msk.f32.vlgmr.msra.gmra.mxu2 %vm458_vm0, %v5922_v27  ;;  %4744 = vmatmul.msk.f32.vlgmr.msra.gmra.mxu3 %vm458_vm0, %v5922_v27 }
  0x99   : > { %2447 = vmatpush.msra.mxu2 %v5762_v2  ;;  %2485 = vmatpush.msra.mxu3 %v5767_v3 }
  0x9a   : > { %2371 = vmatpush.msra.mxu0 %v5756_v0  ;;  %2409 = vmatpush.msra.mxu1 %v5759_v1  ;;  %v4986_v1 = vpop.eup %4985 }
  0x9b   : > { %2448 = vmatpush.msra.mxu2 %v5778_v6  ;;  %2486 = vmatpush.msra.mxu3 %v5781_v7 }
  0x9c   : > { %2372 = vmatpush.msra.mxu0 %v5770_v4  ;;  %2410 = vmatpush.msra.mxu1 %v5773_v5  ;;  %v6006_v5 = vld [vmem:[%s5753_s21 + $0x60] sm:$0xff] }
  0x9f   : > { %4724 = vmatmul.msk.f32.gmra.mxu0 %vm458_vm0, %v5939_v28  ;;  %4731 = vmatmul.msk.f32.gmra.mxu1 %vm458_vm0, %v5939_v28 }
  0xa0   : > { %4738 = vmatmul.msk.f32.gmra.mxu2 %vm458_vm0, %v5939_v28  ;;  %4745 = vmatmul.msk.f32.gmra.mxu3 %vm458_vm0, %v5939_v28  ;;  %v5973_v37 = vpop.xlane.xlu1 %4236 }
  0xa4   : > { %v497_v29 = vpop.f32.mrf.mxu0  ;;  %v535_v30 = vpop.f32.mrf.mxu1 }
  0xa5   : > { %v784_v49 = vmul.f32 %v497_v29, %v497_v29  ;;  %v785_v55 = vmul.f32 %v535_v30, %v535_v30 }
  0xa7   : > { %4725 = vmatmul.msk.f32.gmra.mxu0 %vm458_vm0, %v5952_v31  ;;  %4732 = vmatmul.msk.f32.gmra.mxu1 %vm458_vm0, %v5952_v31 }
  0xa8   : > { %4739 = vmatmul.msk.f32.gmra.mxu2 %vm458_vm0, %v5952_v31  ;;  %4746 = vmatmul.msk.f32.gmra.mxu3 %vm458_vm0, %v5952_v31 }
  0xab   : > { %v573_v32 = vpop.f32.mrf.mxu2  ;;  %v611_v33 = vpop.f32.mrf.mxu3 }
  0xac   : > { %v500_v34 = vpop.f32.mrf.mxu0  ;;  %v538_v35 = vpop.f32.mrf.mxu1  ;;  %v786_v39 = vmul.f32 %v573_v32, %v573_v32  ;;  %v787_v42 = vmul.f32 %v611_v33, %v611_v33  ;;  %v4238_v32 = vsub.f32 %v5830_v17, %v5973_v37 }
  0xad   : > { %v792_v43 = vmul.f32 %v500_v34, %v500_v34  ;;  %v793_v50 = vmul.f32 %v538_v35, %v538_v35 }
  0xaf   : > { %4726 = vmatmul.msk.f32.gmra.mxu0 %vm458_vm0, %v5963_v36  ;;  %4733 = vmatmul.msk.f32.gmra.mxu1 %vm458_vm0, %v5963_v36  ;;  %v800_v57 = vadd.f32 %v792_v43, %v784_v49  ;;  %v807_v59 = vadd.f32 %v793_v50, %v785_v55  ;;  %v6032_v50 = vld [vmem:[%s5753_s21 + $0x68] sm:$0xff]  ;;  %v4239_v55 = vmul.f32 1.442695, %v4238_v32 }
  0xb0   : > { %4740 = vmatmul.msk.f32.gmra.mxu2 %vm458_vm0, %v5963_v36  ;;  %4747 = vmatmul.msk.f32.gmra.mxu3 %vm458_vm0, %v5963_v36 }
  0xb1   : > { %v801_v2 = vrot.slane %v800_v57, 4  ;;  %v808_v6 = vrot.slane %v807_v59, 4 }
  0xb3   : > { %v576_v40 = vpop.f32.mrf.mxu2  ;;  %v614_v41 = vpop.f32.mrf.mxu3  ;;  %v802_v23 = vadd.f32 %v801_v2, %v800_v57  ;;  %v809_v26 = vadd.f32 %v808_v6, %v807_v59 }
  0xb4   : > { %v794_v44 = vmul.f32 %v576_v40, %v576_v40  ;;  %v795_v45 = vmul.f32 %v614_v41, %v614_v41  ;;  %v5976_v46 = vpop.f32.mrf.mxu0  ;;  %v5978_v47 = vpop.f32.mrf.mxu1 }
  0xb5   : > { %v888_v51 = vand.u32 2147483647, %v5976_v46  ;;  %v889_v54 = vand.u32 2147483647, %v5978_v47  ;;  %v803_v43 = vrot.slane %v802_v23, 2 }
  0xb6   : > { %v5984_v52 = vadd.f32 %v794_v44, %v786_v39  ;;  %v5986_v53 = vadd.f32 %v795_v45, %v787_v42 }
  0xb7   : > { %v904_v56 = vsub.f32 0.0, %v888_v51  ;;  %4727 = vmatmul.msk.f32.gmra.mxu0 %vm458_vm0, %v5981_v48  ;;  %4734 = vmatmul.msk.f32.gmra.mxu1 %vm458_vm0, %v5981_v48  ;;  %v905_v58 = vsub.f32 0.0, %v889_v54  ;;  %v810_v51 = vrot.slane %v809_v26, 2 }
  0xb8   : > { %4741 = vmatmul.msk.f32.gmra.mxu2 %vm458_vm0, %v5981_v48  ;;  %4748 = vmatmul.msk.f32.gmra.mxu3 %vm458_vm0, %v5981_v48  ;;  %v366_v62 = vpop.permute.xlu1 %365 }
  0xb9   : > { %v920_v60 = vmul.f32 1.442695, %v904_v56  ;;  %v922_v61 = vmul.f32 1.442695, %v905_v58  ;;  %v368_v22 = vadd.f32 %v4986_v1, %v366_v62  ;;  %v815_v56 = vrot.slane %v5984_v52, 4 }
  0xba   : > { %v6047_v1 = vadd.f32 %v810_v51, %v809_v26 }
  0xbb   : > { %4987 = vpow2.f32 %v920_v60  ;;  %v5997_v63 = vpop.f32.mrf.mxu2  ;;  %v5999_v0 = vpop.f32.mrf.mxu3  ;;  %v4658_v42 = vadd.f32 -1.0, %v368_v22  ;;  %v6041_v60 = vadd.f32 %v803_v43, %v802_v23  ;;  %v872_v23 = vmax.f32 %v5976_v46, 0.0 }
  0xbc   : > { %4989 = vpow2.f32 %v922_v61  ;;  %v6001_v3 = vpop.f32.mrf.mxu0  ;;  %v6003_v4 = vpop.f32.mrf.mxu1  ;;  %v890_v7 = vand.u32 2147483647, %v5997_v63  ;;  %v891_v8 = vand.u32 2147483647, %v5999_v0 }
  0xbd   : > { %v896_v18 = vand.u32 2147483647, %v6001_v3  ;;  %v897_v21 = vand.u32 2147483647, %v6003_v4  ;;  %v370_v59 = vsub.f32 %v4658_v42, %v5830_v17  ;;  %v822_v17 = vrot.slane %v5986_v53, 4 }
  0xbe   : > { %v906_v19 = vsub.f32 0.0, %v890_v7  ;;  %v907_v20 = vsub.f32 0.0, %v891_v8  ;;  %v6050_v8 = vadd.f32 %v815_v56, %v5984_v52  ;;  %v812_v42 = vrot.slane %v6047_v1, 1 }
  0xbf   : > { %4728 = vmatmul.msk.f32.gmra.mxu0 %vm458_vm0, %v6006_v5  ;;  %4735 = vmatmul.msk.f32.gmra.mxu1 %vm458_vm0, %v6006_v5  ;;  %v912_v24 = vsub.f32 0.0, %v896_v18  ;;  %v913_v30 = vsub.f32 0.0, %v897_v21  ;;  %v372_v6 = vperm.slane %v370_v59, 0  ;;  %v880_v56 = vmax.f32 %v6001_v3, 0.0 }
  0xc0   : > { %4742 = vmatmul.msk.f32.gmra.mxu2 %vm458_vm0, %v6006_v5  ;;  %4749 = vmatmul.msk.f32.gmra.mxu3 %vm458_vm0, %v6006_v5  ;;  %v924_v29 = vmul.f32 1.442695, %v906_v19  ;;  %v926_v35 = vmul.f32 1.442695, %v907_v20  ;;  %v881_v3 = vmax.f32 %v6003_v4, 0.0 }
  0xc1   : > { %v4988_v25 = vpop.eup %4987  ;;  %v936_v39 = vmul.f32 1.442695, %v912_v24  ;;  %v938_v44 = vmul.f32 1.442695, %v913_v30  ;;  %373 = vrot.lane.b32.xlu2 %v372_v6, %s5647_s14  ;;  %v873_v24 = vmax.f32 %v5978_v47, 0.0  ;;  %s5481_s14 = scalar_lea.hbm %s8414_s6, 16 }
  0xc2   : > { %v4990_v33 = vpop.eup %4989  ;;  %v952_v34 = vadd.f32 1.0, %v4988_v25  ;;  %4991 = vpow2.f32 %v924_v29 }
  0xc3   : > { %v953_v38 = vadd.f32 1.0, %v4990_v33  ;;  %v6022_v40 = vpop.f32.mrf.mxu2  ;;  %v6024_v41 = vpop.f32.mrf.mxu3  ;;  %v805_v33 = vrot.slane %v6041_v60, 1 }
  0xc4   : > { %4993 = vlog2.f32 %v952_v34  ;;  %v898_v45 = vand.u32 2147483647, %v6022_v40  ;;  %v6027_v49 = vpop.f32.mrf.mxu0  ;;  %v6029_v37 = vpop.f32.mrf.mxu1  ;;  %v899_v54 = vand.u32 2147483647, %v6024_v41 }
  0xc5   : > { %4995 = vlog2.f32 %v953_v38  ;;  %v6070_v38 = vadd.f32 %v822_v17, %v5986_v53  ;;  %v875_v53 = vmax.f32 %v5999_v0, 0.0 }
  0xc6   : > { %4997 = vpow2.f32 %v926_v35  ;;  %v914_v57 = vsub.f32 0.0, %v898_v45  ;;  %v915_v58 = vsub.f32 0.0, %v899_v54  ;;  %v817_v35 = vrot.slane %v6050_v8, 2 }
  0xc7   : > { %4999 = vpow2.f32 %v936_v39  ;;  %4729 = vmatmul.msk.f32.gmra.mxu0 %vm458_vm0, %v6032_v50  ;;  %4736 = vmatmul.msk.f32.gmra.mxu1 %vm458_vm0, %v6032_v50 }
  0xc8   : > { %5001 = vpow2.f32 %v938_v44  ;;  %v940_v61 = vmul.f32 1.442695, %v914_v57  ;;  %4743 = vmatmul.msk.f32.gmra.mxu2 %vm458_vm0, %v6032_v50  ;;  %4750 = vmatmul.msk.f32.gmra.mxu3 %vm458_vm0, %v6032_v50  ;;  %v4992_v62 = vpop.eup %4991  ;;  %v942_v2 = vmul.f32 1.442695, %v915_v58 }
  0xc9   : > { %5003 = vpow2.f32 %v4239_v55  ;;  %v954_v18 = vadd.f32 1.0, %v4992_v62  ;;  %v874_v55 = vmax.f32 %v5997_v63, 0.0 }
  0xca   : > { %v4994_v7 = vpop.eup %4993  ;;  %5005 = vpow2.f32 %v940_v61 }
  0xcb   : > { %v4996_v19 = vpop.eup %4995  ;;  %5007 = vpow2.f32 %v942_v2  ;;  %v6053_v20 = vpop.f32.mrf.mxu2  ;;  %v969_v0 = vmul.f32 0.6931472, %v4994_v7 }
  0xcc   : > { %v6055_v21 = vpop.f32.mrf.mxu3  ;;  %v4998_v22 = vpop.eup %4997  ;;  %5009 = vlog2.f32 %v954_v18 }
  0xcd   : > { %v6059_v52 = vpop.f32.mrf.mxu0  ;;  %v6061_v25 = vpop.f32.mrf.mxu1  ;;  %v955_v29 = vadd.f32 1.0, %v4998_v22 }
  0xce   : > { %v5000_v26 = vpop.eup %4999  ;;  %v1080_v30 = vmax.f32 %v6027_v49, %v6059_v52  ;;  %v1087_v32 = vmax.f32 %v6029_v37, %v6061_v25 }
  0xcf   : > { %v5002_v34 = vpop.eup %5001  ;;  %v960_v39 = vadd.f32 1.0, %v5000_v26  ;;  %5011 = vlog2.f32 %v955_v29  ;;  %4751 = vmatmul.msk.f32.vlgmr.msrb.gmra.mxu0 %vm458_vm0, %v5922_v27  ;;  %4758 = vmatmul.msk.f32.vlgmr.msrb.gmra.mxu1 %vm458_vm0, %v5922_v27 }
  0xd0   : > { %v6073_v43 = vpop.eup %5003  ;;  %v961_v44 = vadd.f32 1.0, %v5002_v34  ;;  %v1081_v45 = vrot.slane %v1080_v30, 4  ;;  %v1088_v51 = vrot.slane %v1087_v32, 4  ;;  %4765 = vmatmul.msk.f32.vlgmr.msrb.gmra.mxu2 %vm458_vm0, %v5922_v27  ;;  %4772 = vmatmul.msk.f32.vlgmr.msrb.gmra.mxu3 %vm458_vm0, %v5922_v27  ;;  %v971_v27 = vmul.f32 0.6931472, %v4996_v19 }
  0xd1   : > { %8503 = vst [vmem:[#allocation13_spill] sm:$0xff] %v6073_v43  ;;  %v5006_v54 = vpop.eup %5005  ;;  %5013 = vlog2.f32 %v960_v39  ;;  %2599 = vmatpush.msrb.mxu2 %v5791_v9  ;;  %2637 = vmatpush.msrb.mxu3 %v5794_v10  ;;  %v4242_v2 = vperm.slane %v6073_v43, 0 }
  0xd2   : > { %v5008_v57 = vpop.eup %5007  ;;  %5015 = vlog2.f32 %v961_v44  ;;  %v962_v58 = vadd.f32 1.0, %v5006_v54  ;;  %v1082_v59 = vmax.f32 %v1080_v30, %v1081_v45  ;;  %v1089_v61 = vmax.f32 %v1087_v32, %v1088_v51  ;;  %2523 = vmatpush.msrb.mxu0 %v5806_v11  ;;  %2561 = vmatpush.msrb.mxu1 %v5809_v12 }
  0xd3   : > { %v5010_v63 = vpop.eup %5009  ;;  %v963_v62 = vadd.f32 1.0, %v5008_v57  ;;  %v6092_v18 = vpop.f32.mrf.mxu2  ;;  %2600 = vmatpush.msrb.mxu2 %v5816_v13  ;;  %2638 = vmatpush.msrb.mxu3 %v5819_v14  ;;  %v882_v13 = vmax.f32 %v6022_v40, 0.0  ;;  %v883_v14 = vmax.f32 %v6024_v41, 0.0  ;;  %v1000_v30 = vadd.f32 %v969_v0, %v872_v23 }
  0xd4   : > { %5017 = vlog2.f32 %v962_v58  ;;  %v1083_v6 = vrot.slane %v1082_v59, 2  ;;  %v1090_v17 = vrot.slane %v1089_v61, 2  ;;  %v6094_v9 = vpop.f32.mrf.mxu3  ;;  %v973_v10 = vmul.f32 0.6931472, %v5010_v63  ;;  %4243 = vrot.lane.b32.xlu2 %v4242_v2, %s8492_s13  ;;  %2524 = vmatpush.msrb.mxu0 %v5824_v15 }
  0xd5   : > { %5019 = vlog2.f32 %v963_v62  ;;  %v1094_v4 = vmax.f32 %v6053_v20, %v6092_v18  ;;  %v1101_v11 = vmax.f32 %v6055_v21, %v6094_v9  ;;  %v6102_v12 = vpop.f32.mrf.mxu0  ;;  %v6104_v7 = vpop.f32.mrf.mxu1  ;;  %2562 = vmatpush.msrb.mxu1 %v5827_v16  ;;  %v1001_v15 = vadd.f32 %v971_v27, %v873_v24 }
  0xd6   : > { %v5012_v19 = vpop.eup %5011  ;;  %v1084_v22 = vmax.f32 %v1082_v59, %v1083_v6  ;;  %v1091_v26 = vmax.f32 %v1089_v61, %v1090_v17  ;;  %v1002_v16 = vadd.f32 %v973_v10, %v874_v55 }
  0xd7   : > { %v5014_v29 = vpop.eup %5013  ;;  %v975_v32 = vmul.f32 0.6931472, %v5012_v19  ;;  %v1095_v34 = vrot.slane %v1094_v4, 4  ;;  %v1102_v39 = vrot.slane %v1101_v11, 4  ;;  %4752 = vmatmul.msk.f32.gmra.mxu0 %vm458_vm0, %v5939_v28  ;;  %4759 = vmatmul.msk.f32.gmra.mxu1 %vm458_vm0, %v5939_v28 }
  0xd8   : > { %v5016_v44 = vpop.eup %5015  ;;  %v985_v45 = vmul.f32 0.6931472, %v5014_v29  ;;  %v1085_v51 = vrot.slane %v1084_v22, 1  ;;  %v1092_v40 = vrot.slane %v1091_v26, 1  ;;  %4766 = vmatmul.msk.f32.gmra.mxu2 %vm458_vm0, %v5939_v28  ;;  %4773 = vmatmul.msk.f32.gmra.mxu3 %vm458_vm0, %v5939_v28 }
  0xd9   : > { %v987_v41 = vmul.f32 0.6931472, %v5016_v44  ;;  %v1096_v46 = vmax.f32 %v1094_v4, %v1095_v34  ;;  %v1103_v23 = vmax.f32 %v1101_v11, %v1102_v39  ;;  %v1003_v24 = vadd.f32 %v975_v32, %v875_v53 }
  0xda   : > { %v5018_v47 = vpop.eup %5017  ;;  %v1008_v54 = vadd.f32 %v985_v45, %v880_v56  ;;  %v6123_v57 = vmax.f32 %v1084_v22, %v1085_v51  ;;  %v6125_v58 = vmax.f32 %v1091_v26, %v1092_v40  ;;  %v824_v51 = vrot.slane %v6070_v38, 2 }
  0xdb   : > { %v5020_v59 = vpop.eup %5019  ;;  %v1009_v61 = vadd.f32 %v987_v41, %v881_v3  ;;  %v989_v63 = vmul.f32 0.6931472, %v5018_v47  ;;  %v1097_v55 = vrot.slane %v1096_v46, 2  ;;  %v1104_v0 = vrot.slane %v1103_v23, 2  ;;  %v6131_v6 = vpop.f32.mrf.mxu2 }
  0xdc   : > { %v1016_v62 = vadd.f32 %v1008_v54, %v1000_v30  ;;  %v991_v2 = vmul.f32 0.6931472, %v5020_v59  ;;  %v1136_v27 = vsub.f32 %v6027_v49, %v6123_v57  ;;  %v1144_v28 = vsub.f32 %v6059_v52, %v6123_v57  ;;  %v6133_v53 = vpop.f32.mrf.mxu3 }
  0xdd   : > { %v1023_v56 = vadd.f32 %v1009_v61, %v1001_v15  ;;  %v1010_v17 = vadd.f32 %v989_v63, %v882_v13  ;;  %v1137_v3 = vsub.f32 %v6029_v37, %v6125_v58  ;;  %v1145_v10 = vsub.f32 %v6061_v25, %v6125_v58  ;;  %v6139_v4 = vpop.f32.mrf.mxu0  ;;  %v6141_v11 = vpop.f32.mrf.mxu1 }
  0xde   : > { %v1017_v49 = vrot.slane %v1016_v62, 4  ;;  %v1011_v19 = vadd.f32 %v991_v2, %v883_v14  ;;  %v1152_v22 = vmul.f32 1.442695, %v1136_v27  ;;  %v1168_v52 = vmul.f32 1.442695, %v1144_v28 }
  0xdf   : > { %v1024_v26 = vrot.slane %v1023_v56, 4  ;;  %v1030_v29 = vadd.f32 %v1010_v17, %v1002_v16  ;;  %v1154_v30 = vmul.f32 1.442695, %v1137_v3  ;;  %v1170_v32 = vmul.f32 1.442695, %v1145_v10  ;;  %4753 = vmatmul.msk.f32.gmra.mxu0 %vm458_vm0, %v5952_v31  ;;  %4760 = vmatmul.msk.f32.gmra.mxu1 %vm458_vm0, %v5952_v31 }
  0xe0   : > { %v1018_v34 = vadd.f32 %v1017_v49, %v1016_v62  ;;  %v1037_v13 = vadd.f32 %v1011_v19, %v1003_v24  ;;  %5021 = vpow2.f32 %v1152_v22  ;;  %v1098_v39 = vmax.f32 %v1096_v46, %v1097_v55  ;;  %4767 = vmatmul.msk.f32.gmra.mxu2 %vm458_vm0, %v5952_v31  ;;  %4774 = vmatmul.msk.f32.gmra.mxu3 %vm458_vm0, %v5952_v31 }
  0xe1   : > { %v1025_v37 = vadd.f32 %v1024_v26, %v1023_v56  ;;  %v1031_v25 = vrot.slane %v1030_v29, 4  ;;  %5023 = vpow2.f32 %v1168_v52  ;;  %v1105_v14 = vmax.f32 %v1103_v23, %v1104_v0 }
  0xe2   : > { %v1019_v44 = vrot.slane %v1018_v34, 2  ;;  %v1038_v15 = vrot.slane %v1037_v13, 4  ;;  %5025 = vpow2.f32 %v1154_v30  ;;  %v1099_v45 = vrot.slane %v1098_v39, 1 }
  0xe3   : > { %v1032_v40 = vadd.f32 %v1031_v25, %v1030_v29  ;;  %5027 = vpow2.f32 %v1170_v32  ;;  %v1106_v16 = vrot.slane %v1105_v14, 1  ;;  %v818_v41 = vadd.f32 %v817_v35, %v6050_v8  ;;  %v6157_v23 = vpop.f32.mrf.mxu2 }
  0xe4   : > { %v6155_v46 = vmax.f32 %v1098_v39, %v1099_v45  ;;  %v6159_v47 = vpop.f32.mrf.mxu3  ;;  %v1026_v31 = vrot.slane %v1025_v37, 2  ;;  %v1039_v24 = vadd.f32 %v1038_v15, %v1037_v13  ;;  %v806_v59 = vadd.f32 %v805_v33, %v6041_v60 }
  0xe5   : > { %v6161_v54 = vmax.f32 %v1105_v14, %v1106_v16  ;;  %v652_v61 = vpop.f32.mrf.mxu0  ;;  %v690_v63 = vpop.f32.mrf.mxu1  ;;  %v1020_v0 = vadd.f32 %v1019_v44, %v1018_v34  ;;  %v813_v62 = vadd.f32 %v812_v42, %v6047_v1  ;;  %v825_v27 = vadd.f32 %v824_v51, %v6070_v38 }
  0xe6   : > { %v5022_v55 = vpop.eup %5021  ;;  %v1138_v8 = vsub.f32 %v6053_v20, %v6155_v46  ;;  %v1146_v35 = vsub.f32 %v6092_v18, %v6155_v46  ;;  %v1033_v28 = vrot.slane %v1032_v40, 2  ;;  %v819_v18 = vrot.slane %v818_v41, 1 }
  0xe7   : > { %v5024_v2 = vpop.eup %5023  ;;  %v1139_v60 = vsub.f32 %v6055_v21, %v6161_v54  ;;  %v1147_v33 = vsub.f32 %v6094_v9, %v6161_v54  ;;  %4754 = vmatmul.msk.f32.gmra.mxu0 %vm458_vm0, %v5963_v36  ;;  %4761 = vmatmul.msk.f32.gmra.mxu1 %vm458_vm0, %v5963_v36  ;;  %v1040_v38 = vrot.slane %v1039_v24, 2  ;;  %v1027_v49 = vadd.f32 %v1026_v31, %v1025_v37 }
  0xe8   : > { %v5026_v56 = vpop.eup %5025  ;;  %v1184_v20 = vadd.f32 %v5024_v2, %v5022_v55  ;;  %v1156_v17 = vmul.f32 1.442695, %v1138_v8  ;;  %v1172_v3 = vmul.f32 1.442695, %v1146_v35  ;;  %4768 = vmatmul.msk.f32.gmra.mxu2 %vm458_vm0, %v5963_v36  ;;  %4775 = vmatmul.msk.f32.gmra.mxu3 %vm458_vm0, %v5963_v36  ;;  %v1021_v19 = vrot.slane %v1020_v0, 1 }
  0xe9   : > { %v5028_v1 = vpop.eup %5027  ;;  %v1158_v42 = vmul.f32 1.442695, %v1139_v60  ;;  %v1174_v10 = vmul.f32 1.442695, %v1147_v33  ;;  %v856_v22 = vadd.f32 %v806_v59, %v6102_v12  ;;  %v1034_v52 = vadd.f32 %v1033_v28, %v1032_v40 }
  0xea   : > { %v1185_v21 = vrot.slane %v1184_v20, 4  ;;  %v1191_v9 = vadd.f32 %v5028_v1, %v5026_v56  ;;  %5029 = vpow2.f32 %v1156_v17  ;;  %v826_v26 = vrot.slane %v825_v27, 1 }
  0xeb   : > { %5031 = vpow2.f32 %v1172_v3  ;;  %v728_v32 = vpop.f32.mrf.mxu2  ;;  %v857_v13 = vadd.f32 %v813_v62, %v6104_v7  ;;  %v1028_v39 = vrot.slane %v1027_v49, 1  ;;  %v820_v36 = vadd.f32 %v819_v18, %v818_v41 }
  0xec   : > { %v1186_v29 = vadd.f32 %v1185_v21, %v1184_v20  ;;  %v1192_v30 = vrot.slane %v1191_v9, 4  ;;  %5033 = vpow2.f32 %v1158_v42  ;;  %v6187_v34 = vpop.f32.mrf.mxu3  ;;  %v1022_v15 = vadd.f32 %v1021_v19, %v1020_v0 }
  0xed   : > { %5035 = vpow2.f32 %v1174_v10  ;;  %v6190_v37 = vpop.f32.mrf.mxu0  ;;  %v6192_v25 = vpop.f32.mrf.mxu1  ;;  %v1041_v45 = vadd.f32 %v1040_v38, %v1039_v24  ;;  %v6194_v51 = vmul.f32 -0.5, %v856_v22  ;;  %v1035_v40 = vrot.slane %v1034_v52, 1 }
  0xee   : > { %v1187_v14 = vrot.slane %v1186_v29, 2  ;;  %v1193_v44 = vadd.f32 %v1192_v30, %v1191_v9  ;;  %v827_v16 = vadd.f32 %v826_v26, %v825_v27  ;;  %v858_v8 = vadd.f32 %v820_v36, %v6131_v6 }
  0xef   : > { %v1042_v35 = vrot.slane %v1041_v45, 1  ;;  %4755 = vmatmul.msk.f32.gmra.mxu0 %vm458_vm0, %v5981_v48  ;;  %4762 = vmatmul.msk.f32.gmra.mxu1 %vm458_vm0, %v5981_v48  ;;  %v6201_v62 = vmul.f32 -0.5, %v857_v13  ;;  %v1029_v24 = vadd.f32 %v1028_v39, %v1027_v49  ;;  %v796_v0 = vmul.f32 %v652_v61, %v652_v61 }
  0xf0   : > { %v5030_v31 = vpop.eup %5029  ;;  %v1194_v59 = vrot.slane %v1193_v44, 2  ;;  %v1188_v55 = vadd.f32 %v1187_v14, %v1186_v29  ;;  %v797_v2 = vmul.f32 %v690_v63, %v690_v63  ;;  %4769 = vmatmul.msk.f32.gmra.mxu2 %vm458_vm0, %v5981_v48  ;;  %4776 = vmatmul.msk.f32.gmra.mxu3 %vm458_vm0, %v5981_v48  ;;  %v6208_v60 = vsub.f32 %v6102_v12, %v1022_v15 }
  0xf1   : > { %v5032_v41 = vpop.eup %5031  ;;  %8504 = vst [vmem:[#allocation14_spill] sm:$0xff] %v6201_v62  ;;  %v1036_v17 = vadd.f32 %v1035_v40, %v1034_v52  ;;  %v1043_v3 = vadd.f32 %v1042_v35, %v1041_v45  ;;  %v788_v61 = vmul.f32 %v6139_v4, %v6139_v4  ;;  %v789_v63 = vmul.f32 %v6141_v11, %v6141_v11 }
  0xf2   : > { %v5034_v27 = vpop.eup %5033  ;;  %v1198_v28 = vadd.f32 %v5032_v41, %v5030_v31  ;;  %8505 = vst [vmem:[#allocation15_spill] sm:$0xff] %v6208_v60  ;;  %v1189_v33 = vrot.slane %v1188_v55, 1  ;;  %v1195_v56 = vadd.f32 %v1194_v59, %v1193_v44  ;;  %v6219_v49 = vsub.f32 %v6104_v7, %v1029_v24 }
  0xf3   : > { %v5036_v20 = vpop.eup %5035  ;;  %v6214_v42 = vpop.f32.mrf.mxu2  ;;  %v828_v21 = vadd.f32 %v796_v0, %v788_v61  ;;  %v835_v9 = vadd.f32 %v797_v2, %v789_v63  ;;  %v798_v19 = vmul.f32 %v728_v32, %v728_v32  ;;  %v1280_v26 = vrot.slane %v6208_v60, 1 }
  0xf4   : > { %v1199_v18 = vrot.slane %v1198_v28, 4  ;;  %v1205_v1 = vadd.f32 %v5036_v20, %v5034_v27  ;;  %v1190_v38 = vadd.f32 %v1189_v33, %v1188_v55  ;;  %v1196_v48 = vrot.slane %v1195_v56, 1  ;;  %v6216_v10 = vpop.f32.mrf.mxu3  ;;  %8506 = vst [vmem:[#allocation16_spill] sm:$0xff] %v6219_v49 }
  0xf5   : > { %v6221_v22 = vpop.f32.mrf.mxu0  ;;  %v6225_v29 = vsub.f32 %v6131_v6, %v1036_v17  ;;  %v859_v30 = vadd.f32 %v827_v16, %v6133_v53  ;;  %v790_v13 = vmul.f32 %v6157_v23, %v6157_v23  ;;  %v6230_v39 = vpop.f32.mrf.mxu1  ;;  %v6233_v14 = vsub.f32 %v6133_v53, %v1043_v3 }
  0xf6   : > { %v1200_v4 = vadd.f32 %v1199_v18, %v1198_v28  ;;  %v1206_v52 = vrot.slane %v1205_v1, 4  ;;  %5037 = vlog2.f32 %v1190_v38  ;;  %v1197_v11 = vadd.f32 %v1196_v48, %v1195_v56 }
  0xf7   : > { %8507 = vst [vmem:[#allocation17_spill] sm:$0xff] %v6225_v29  ;;  %4756 = vmatmul.msk.f32.gmra.mxu0 %vm458_vm0, %v6006_v5  ;;  %4763 = vmatmul.msk.f32.gmra.mxu1 %vm458_vm0, %v6006_v5  ;;  %v1281_v44 = vrot.slane %v6219_v49, 1  ;;  %v6240_v15 = vmul.f32 -0.5, %v858_v8  ;;  %v829_v45 = vrot.slane %v828_v21, 4  ;;  %v836_v23 = vrot.slane %v835_v9, 4 }
  0xf8   : > { %v1201_v36 = vrot.slane %v1200_v4, 2  ;;  %v1207_v32 = vadd.f32 %v1206_v52, %v1205_v1  ;;  %5039 = vlog2.f32 %v1197_v11  ;;  %8508 = vst [vmem:[#allocation18_spill] sm:$0xff] %v6233_v14  ;;  %4770 = vmatmul.msk.f32.gmra.mxu2 %vm458_vm0, %v6006_v5  ;;  %4777 = vmatmul.msk.f32.gmra.mxu3 %vm458_vm0, %v6006_v5  ;;  %v842_v31 = vadd.f32 %v798_v19, %v790_v13 }
  0xf9   : > { %8509 = vst [vmem:[#allocation19_spill] sm:$0xff] %v6240_v15  ;;  %v799_v59 = vmul.f32 %v6187_v34, %v6187_v34  ;;  %v6249_v55 = vadd.f32 %v1280_v26, %v6194_v51  ;;  %v1282_v8 = vrot.slane %v6225_v29, 1  ;;  %v6252_v35 = vmul.f32 -0.5, %v859_v30 }
  0xfa   : > { %v1208_v40 = vrot.slane %v1207_v32, 2  ;;  %v1202_v16 = vadd.f32 %v1201_v36, %v1200_v4  ;;  %v892_v41 = vand.u32 2147483647, %v6190_v37  ;;  %v1283_v5 = vrot.slane %v6233_v14, 1 }
  0xfb   : > { %8510 = vst [vmem:[#allocation20_spill] sm:$0xff] %v6252_v35  ;;  %v791_v27 = vmul.f32 %v6159_v47, %v6159_v47  ;;  %v6258_v28 = vpop.f32.mrf.mxu2  ;;  %v6261_v33 = vadd.f32 %v1281_v44, %v6201_v62  ;;  %v893_v20 = vand.u32 2147483647, %v6192_v25  ;;  %v830_v3 = vadd.f32 %v829_v45, %v828_v21 }
  0xfc   : > { %v5038_v24 = vpop.eup %5037  ;;  %v1203_v0 = vrot.slane %v1202_v16, 1  ;;  %v1209_v2 = vadd.f32 %v1208_v40, %v1207_v32  ;;  %v908_v56 = vsub.f32 0.0, %v892_v41  ;;  %v837_v61 = vadd.f32 %v836_v23, %v835_v9  ;;  %v6264_v1 = vpop.f32.mrf.mxu3 }
  0xfd   : > { %v1241_v34 = vmul.f32 0.6931472, %v5038_v24  ;;  %v843_v63 = vrot.slane %v842_v31, 4  ;;  %v849_v18 = vadd.f32 %v799_v59, %v791_v27  ;;  %v909_v47 = vsub.f32 0.0, %v893_v20  ;;  %v6266_v4 = vpop.f32.mrf.mxu0  ;;  %v6281_v36 = vpop.f32.mrf.mxu1 }
  0xfe   : > { %v5040_v17 = vpop.eup %5039  ;;  %v1210_v48 = vrot.slane %v1209_v2, 1  ;;  %v928_v19 = vmul.f32 1.442695, %v908_v56  ;;  %v1204_v52 = vadd.f32 %v1203_v0, %v1202_v16  ;;  %v6269_v11 = vadd.f32 %v1282_v8, %v6240_v15 }
  0xff   : > { %v1243_v38 = vmul.f32 0.6931472, %v5040_v17  ;;  %v6272_v26 = vadd.f32 %v1283_v5, %v6252_v35  ;;  %v894_v21 = vand.u32 2147483647, %v6214_v42  ;;  %4757 = vmatmul.msk.f32.gmra.mxu0 %vm458_vm0, %v6032_v50  ;;  %4764 = vmatmul.msk.f32.gmra.mxu1 %vm458_vm0, %v6032_v50  ;;  %v1256_v9 = vadd.f32 %v1241_v34, %v6123_v57  ;;  %v6300_v5 = vld [vmem:[%s5753_s21 + $0x70] sm:$0xff] }
 0x100   : > { %5041 = vpow2.f32 %v928_v19  ;;  %v930_v13 = vmul.f32 1.442695, %v909_v47  ;;  %4771 = vmatmul.msk.f32.gmra.mxu2 %vm458_vm0, %v6032_v50  ;;  %4778 = vmatmul.msk.f32.gmra.mxu3 %vm458_vm0, %v6032_v50  ;;  %v831_v32 = vrot.slane %v830_v3, 2  ;;  %v838_v44 = vrot.slane %v837_v61, 2 }
 0x101   : > { %v1257_v30 = vadd.f32 %v1243_v38, %v6125_v58  ;;  %v844_v45 = vadd.f32 %v843_v63, %v842_v31  ;;  %v910_v23 = vsub.f32 0.0, %v894_v21  ;;  %v1211_v40 = vadd.f32 %v1210_v48, %v1209_v2  ;;  %v384_v2 = vpop.permute.xlu0 %383 }
 0x102   : > { %v850_v16 = vrot.slane %v849_v18, 4  ;;  %5043 = vpow2.f32 %v930_v13  ;;  %v895_v57 = vand.u32 2147483647, %v6216_v10  ;;  %v900_v8 = vand.u32 2147483647, %v6221_v22 }
 0x103   : > { %5045 = vlog2.f32 %v1204_v52  ;;  %v932_v59 = vmul.f32 1.442695, %v910_v23  ;;  %v6290_v41 = vpop.f32.mrf.mxu2  ;;  %v6293_v50 = vsub.f32 %v6102_v12, %v1256_v9  ;;  %v6296_v31 = vsub.f32 %v6104_v7, %v1257_v30 }
 0x104   : > { %v911_v24 = vsub.f32 0.0, %v895_v57  ;;  %v901_v0 = vand.u32 2147483647, %v6230_v39  ;;  %v6302_v27 = vadd.f32 %v831_v32, %v830_v3  ;;  %v916_v34 = vsub.f32 0.0, %v900_v8  ;;  %v6305_v19 = vpop.f32.mrf.mxu3  ;;  %v5444_v57 = vld [vmem:[%s5748_s18 + $0x58] sm:$0xff] }
 0x105   : > { %8511 = vst [vmem:[#allocation21_spill] sm:$0xff] %v6293_v50  ;;  %5047 = vpow2.f32 %v932_v59  ;;  %v845_v20 = vrot.slane %v844_v45, 2  ;;  %v851_v12 = vadd.f32 %v850_v16, %v849_v18  ;;  %v387_v48 = vsel %vm386_vm3, %v384_v2, 0.0  ;;  %v6315_v21 = vpop.f32.mrf.mxu0  ;;  %v6326_v16 = vpop.f32.mrf.mxu1  ;;  %v5445_v59 = vld [vmem:[%s5748_s18 + $0x40] sm:$0xff] }
 0x106   : > { %8512 = vst [vmem:[#allocation22_spill] sm:$0xff] %v6296_v31  ;;  %v5042_v56 = vpop.eup %5041  ;;  %5049 = vlog2.f32 %v1211_v40  ;;  %v934_v17 = vmul.f32 1.442695, %v911_v24  ;;  %v944_v7 = vmul.f32 1.442695, %v916_v34  ;;  %v917_v38 = vsub.f32 0.0, %v901_v0  ;;  %388 = vadd.xlane.f32.xlu0 %v387_v48 }
 0x107   : > { %v956_v63 = vadd.f32 1.0, %v5042_v56  ;;  %4786 = vmatmul.msk.f32.vlgmr.msra.gmra.mxu0 %vm458_vm0, %v6300_v5  ;;  %4793 = vmatmul.msk.f32.vlgmr.msra.gmra.mxu1 %vm458_vm0, %v6300_v5  ;;  %v1312_v47 = vrot.slane %v6293_v50, 2  ;;  %v1313_v18 = vrot.slane %v6296_v31, 2  ;;  %v6313_v52 = vadd.f32 %v838_v44, %v837_v61  ;;  %v5443_v61 = vld [vmem:[%s5748_s18 + $0x50] sm:$0xff]  ;;  %v5446_v34 = vld [vmem:[%s5748_s18 + $0x48] sm:$0xff]  ;;  %v5449_v48 = vld [vmem:[%s5748_s18] sm:$0xff] }
 0x108   : > { %v5044_v3 = vpop.eup %5043  ;;  %5051 = vpow2.f32 %v934_v17  ;;  %4800 = vmatmul.msk.f32.vlgmr.msra.gmra.mxu2 %vm458_vm0, %v6300_v5  ;;  %v946_v32 = vmul.f32 1.442695, %v917_v38  ;;  %4807 = vmatmul.msk.f32.vlgmr.msra.gmra.mxu3 %vm458_vm0, %v6300_v5  ;;  %v6323_v44 = vadd.f32 %v845_v20, %v844_v45  ;;  %v852_v23 = vrot.slane %v851_v12, 2  ;;  %v5447_v56 = vld [vmem:[%s5748_s18 + $0x10] sm:$0xff]  ;;  %v5448_v38 = vld [vmem:[%s5748_s18 + $0x18] sm:$0xff] }
 0x109   : > { %v5046_v9 = vpop.eup %5045  ;;  %5053 = vlog2.f32 %v956_v63  ;;  %v957_v13 = vadd.f32 1.0, %v5044_v3  ;;  %3387 = vmatpush.msra.mxu2 %v5443_v61  ;;  %v902_v40 = vand.u32 2147483647, %v6258_v28  ;;  %3425 = vmatpush.msra.mxu3 %v5444_v57  ;;  %v903_v45 = vand.u32 2147483647, %v6264_v1 }
 0x10a   : > { %5055 = vpow2.f32 %v944_v7  ;;  %3311 = vmatpush.msra.mxu0 %v5445_v59  ;;  %v1108_v0 = vmax.f32 %v6266_v4, %v6315_v21  ;;  %3349 = vmatpush.msra.mxu1 %v5446_v34  ;;  %v1328_v17 = vadd.f32 %v1312_v47, %v6249_v55  ;;  %v1329_v63 = vadd.f32 %v1313_v18, %v6261_v33  ;;  %v5450_v59 = vld [vmem:[%s5748_s18 + $0x8] sm:$0xff] }
 0x10b   : > { %v5048_v8 = vpop.eup %5047  ;;  %5057 = vlog2.f32 %v957_v13  ;;  %v6334_v2 = vpop.f32.mrf.mxu2  ;;  %3388 = vmatpush.msra.mxu2 %v5447_v56  ;;  %3426 = vmatpush.msra.mxu3 %v5448_v38  ;;  %v918_v3 = vsub.f32 0.0, %v902_v40  ;;  %v919_v13 = vsub.f32 0.0, %v903_v45  ;;  %v1115_v57 = vmax.f32 %v6281_v36, %v6326_v16 }
 0x10c   : > { %v5050_v20 = vpop.eup %5049  ;;  %v958_v7 = vadd.f32 1.0, %v5048_v8  ;;  %5059 = vpow2.f32 %v946_v32  ;;  %3312 = vmatpush.msra.mxu0 %v5449_v48  ;;  %v1109_v61 = vrot.slane %v1108_v0, 4  ;;  %3350 = vmatpush.msra.mxu1 %v5450_v59  ;;  %v1245_v56 = vmul.f32 0.6931472, %v5046_v9  ;;  %v6354_v58 = vpop.f32.mrf.mxu3 }
 0x10d   : > { %v6345_v24 = vadd.f32 %v852_v23, %v851_v12  ;;  %v1122_v33 = vmax.f32 %v6290_v41, %v6334_v2  ;;  %v884_v18 = vmax.f32 %v6221_v22, 0.0  ;;  %v948_v40 = vmul.f32 1.442695, %v918_v3 }
 0x10e   : > { %v5052_v34 = vpop.eup %5051  ;;  %v1110_v8 = vmax.f32 %v1108_v0, %v1109_v61  ;;  %v1345_v38 = vsel %vm1344_vm2, %v1328_v17, 0.0  ;;  %v1346_v48 = vsel %vm1344_vm2, %v1329_v63, 0.0  ;;  %v950_v9 = vmul.f32 1.442695, %v919_v13 }
 0x10f   : > { %v5054_v47 = vpop.eup %5053  ;;  %v1116_v12 = vrot.slane %v1115_v57, 4  ;;  %5061 = vlog2.f32 %v958_v7  ;;  %v1123_v30 = vrot.slane %v1122_v33, 4  ;;  %v1258_v22 = vadd.f32 %v1245_v56, %v6155_v46 }
 0x110   : > { %v5056_v45 = vpop.eup %5055  ;;  %v1111_v55 = vrot.slane %v1110_v8, 2  ;;  %v959_v32 = vadd.f32 1.0, %v5052_v34  ;;  %5063 = vpow2.f32 %v948_v40  ;;  %v977_v63 = vmul.f32 0.6931472, %v5054_v47 }
 0x111   : > { %v5058_v23 = vpop.eup %5057  ;;  %v964_v59 = vadd.f32 1.0, %v5056_v45  ;;  %v1117_v0 = vmax.f32 %v1115_v57, %v1116_v12  ;;  %v1124_v61 = vmax.f32 %v1122_v33, %v1123_v30  ;;  %v1129_v7 = vmax.f32 %v6305_v19, %v6354_v58 }
 0x112   : > { %v5060_v43 = vpop.eup %5059  ;;  %v1112_v17 = vmax.f32 %v1110_v8, %v1111_v55  ;;  %v886_v45 = vmax.f32 %v6258_v28, 0.0  ;;  %v6360_v29 = vmul.f32 0.6931472, %v5050_v20  ;;  %v979_v46 = vmul.f32 0.6931472, %v5058_v23 }
 0x113   : > { %5065 = vlog2.f32 %v964_v59  ;;  %v965_v3 = vadd.f32 1.0, %v5060_v43  ;;  %v1118_v13 = vrot.slane %v1117_v0, 2  ;;  %v1125_v35 = vrot.slane %v1124_v61, 2 }
 0x114   : > { %5067 = vpow2.f32 %v950_v9  ;;  %v1113_v14 = vrot.slane %v1112_v17, 1  ;;  %v1130_v57 = vrot.slane %v1129_v7, 4  ;;  %v6362_v43 = vadd.f32 %v1346_v48, %v1345_v38 }
 0x115   : > { %5069 = vlog2.f32 %v965_v3  ;;  %v1119_v34 = vmax.f32 %v1117_v0, %v1118_v13  ;;  %v5062_v56 = vpop.eup %5061  ;;  %v6365_v30 = vsub.f32 %v6131_v6, %v1258_v22  ;;  %v1126_v33 = vmax.f32 %v1124_v61, %v1125_v35 }
 0x116   : > { %v6367_v55 = vmax.f32 %v1112_v17, %v1113_v14  ;;  %v5064_v47 = vpop.eup %5063  ;;  %v8514_v40 = vmax.f32 %v6190_v37, 0.0  ;;  %5071 = vlog2.f32 %v959_v32  ;;  %v1131_v20 = vmax.f32 %v1129_v7, %v1130_v57 }
 0x117   : > { %8513 = vst [vmem:[#allocation23_spill] sm:$0xff] %v6365_v30  ;;  %v1120_v9 = vrot.slane %v1119_v34, 1  ;;  %v966_v23 = vadd.f32 1.0, %v5064_v47  ;;  %v1127_v6 = vrot.slane %v1126_v33, 1  ;;  %v8515_v14 = vmax.f32 %v6192_v25, 0.0 }
 0x118   : > { %v1004_v8 = vadd.f32 %v977_v63, %v8514_v40  ;;  %v1140_v59 = vsub.f32 %v6266_v4, %v6367_v55  ;;  %v1148_v38 = vsub.f32 %v6315_v21, %v6367_v55  ;;  %v1132_v37 = vrot.slane %v1131_v20, 2 }
 0x119   : > { %v5066_v12 = vpop.eup %5065  ;;  %v1005_v35 = vadd.f32 %v979_v46, %v8515_v14  ;;  %v6377_v0 = vmax.f32 %v1119_v34, %v1120_v9  ;;  %5073 = vlog2.f32 %v966_v23  ;;  %v981_v25 = vmul.f32 0.6931472, %v5062_v56 }
 0x11a   : > { %v5068_v48 = vpop.eup %5067  ;;  %v993_v22 = vmul.f32 0.6931472, %v5066_v12  ;;  %v1160_v17 = vmul.f32 1.442695, %v1140_v59  ;;  %v1176_v61 = vmul.f32 1.442695, %v1148_v38  ;;  %v6383_v7 = vmax.f32 %v1126_v33, %v1127_v6  ;;  %v6389_v12 = vpop.f32.mrf.mxu1 }
 0x11b   : > { %v5070_v32 = vpop.eup %5069  ;;  %v967_v3 = vadd.f32 1.0, %v5068_v48  ;;  %v1141_v21 = vsub.f32 %v6281_v36, %v6377_v0  ;;  %v1149_v13 = vsub.f32 %v6326_v16, %v6377_v0  ;;  %v1133_v46 = vmax.f32 %v1131_v20, %v1132_v37  ;;  %v6392_v36 = vld [vmem:[%s5753_s21 + $0x78] sm:$0xff] }
 0x11c   : > { %v1012_v63 = vadd.f32 %v993_v22, %v884_v18  ;;  %v995_v4 = vmul.f32 0.6931472, %v5070_v32  ;;  %v5072_v34 = vpop.eup %5071  ;;  %v8516_v47 = vmax.f32 %v6230_v39, 0.0  ;;  %v6387_v18 = vpop.f32.mrf.mxu0  ;;  %v1142_v56 = vsub.f32 %v6290_v41, %v6383_v7  ;;  %4787 = vmatmul.msk.f32.gmra.mxu0 %vm458_vm0, %v6392_v36  ;;  %4794 = vmatmul.msk.f32.gmra.mxu1 %vm458_vm0, %v6392_v36 }
 0x11d   : > { %5075 = vlog2.f32 %v967_v3  ;;  %v1162_v9 = vmul.f32 1.442695, %v1141_v21  ;;  %v1178_v16 = vmul.f32 1.442695, %v1149_v13  ;;  %v1150_v33 = vsub.f32 %v6334_v2, %v6383_v7  ;;  %4801 = vmatmul.msk.f32.gmra.mxu2 %vm458_vm0, %v6392_v36  ;;  %4808 = vmatmul.msk.f32.gmra.mxu3 %vm458_vm0, %v6392_v36 }
 0x11e   : > { %v1044_v57 = vadd.f32 %v1012_v63, %v1004_v8  ;;  %v1013_v40 = vadd.f32 %v995_v4, %v8516_v47  ;;  %5077 = vpow2.f32 %v1160_v17  ;;  %v1134_v20 = vrot.slane %v1133_v46, 1  ;;  %v6416_v63 = vpop.f32.mrf.mxu3 }
 0x11f   : > { %5079 = vpow2.f32 %v1176_v61  ;;  %v5074_v41 = vpop.eup %5073  ;;  %v983_v23 = vmul.f32 0.6931472, %v5072_v34  ;;  %v1164_v2 = vmul.f32 1.442695, %v1142_v56  ;;  %v1180_v59 = vmul.f32 1.442695, %v1150_v33  ;;  %v6414_v61 = vpop.f32.mrf.mxu2 }
 0x120   : > { %v1045_v39 = vrot.slane %v1044_v57, 4  ;;  %v1051_v8 = vadd.f32 %v1013_v40, %v1005_v35  ;;  %5081 = vpow2.f32 %v1162_v9  ;;  %v997_v48 = vmul.f32 0.6931472, %v5074_v41 }
 0x121   : > { %5083 = vpow2.f32 %v1178_v16  ;;  %v6406_v14 = vmax.f32 %v1133_v46, %v1134_v20  ;;  %v1314_v35 = vrot.slane %v6365_v30, 2  ;;  %v1259_v37 = vadd.f32 %v6360_v29, %v6161_v54 }
 0x122   : > { %v1046_v38 = vadd.f32 %v1045_v39, %v1044_v57  ;;  %v1052_v6 = vrot.slane %v1051_v8, 4  ;;  %v8517_v32 = vmax.f32 %v6214_v42, 0.0  ;;  %v887_v17 = vmax.f32 %v6264_v1, 0.0  ;;  %v6431_v41 = vpop.f32.mrf.mxu1 }
 0x123   : > { %v5076_v22 = vpop.eup %5075  ;;  %v1014_v13 = vadd.f32 %v997_v48, %v886_v45  ;;  %5085 = vpow2.f32 %v1164_v2  ;;  %v1143_v54 = vsub.f32 %v6305_v19, %v6406_v14  ;;  %v1151_v42 = vsub.f32 %v6354_v58, %v6406_v14 }
 0x124   : > { %v1006_v3 = vadd.f32 %v981_v25, %v8517_v32  ;;  %v5078_v4 = vpop.eup %5077  ;;  %v1047_v21 = vrot.slane %v1046_v38, 2  ;;  %v999_v46 = vmul.f32 0.6931472, %v5076_v22  ;;  %v1053_v57 = vadd.f32 %v1052_v6, %v1051_v8  ;;  %v6429_v58 = vpop.f32.mrf.mxu0  ;;  %v6436_v22 = vld [vmem:[%s5753_s21 + $0x80] sm:$0xff] }
 0x125   : > { %v5080_v34 = vpop.eup %5079  ;;  %5087 = vpow2.f32 %v1180_v59  ;;  %v8518_v1 = vmax.f32 %v6216_v10, 0.0  ;;  %v6427_v45 = vsub.f32 %v6133_v53, %v1259_v37  ;;  %v1166_v16 = vmul.f32 1.442695, %v1143_v54  ;;  %4788 = vmatmul.msk.f32.gmra.mxu0 %vm458_vm0, %v6436_v22  ;;  %4795 = vmatmul.msk.f32.gmra.mxu1 %vm458_vm0, %v6436_v22 }
 0x126   : > { %v5082_v29 = vpop.eup %5081  ;;  %v1058_v47 = vadd.f32 %v1014_v13, %v1006_v3  ;;  %v1015_v40 = vadd.f32 %v999_v46, %v887_v17  ;;  %v1212_v9 = vadd.f32 %v5080_v34, %v5078_v4  ;;  %v1182_v56 = vmul.f32 1.442695, %v1151_v42  ;;  %4802 = vmatmul.msk.f32.gmra.mxu2 %vm458_vm0, %v6436_v22  ;;  %4809 = vmatmul.msk.f32.gmra.mxu3 %vm458_vm0, %v6436_v22 }
 0x127   : > { %v1007_v25 = vadd.f32 %v983_v23, %v8518_v1  ;;  %v5084_v28 = vpop.eup %5083  ;;  %8519 = vst [vmem:[#allocation24_spill] sm:$0xff] %v6427_v45  ;;  %v1048_v33 = vadd.f32 %v1047_v21, %v1046_v38  ;;  %v1330_v10 = vadd.f32 %v1314_v35, %v6269_v11  ;;  %v1054_v23 = vrot.slane %v1053_v57, 2  ;;  %v1510_v42 = vpop.f32.mrf.mxu2 }
 0x128   : > { %v1059_v39 = vrot.slane %v1058_v47, 4  ;;  %v1213_v8 = vrot.slane %v1212_v9, 4  ;;  %v1219_v20 = vadd.f32 %v5084_v28, %v5082_v29  ;;  %5089 = vpow2.f32 %v1166_v16  ;;  %v1548_v29 = vpop.f32.mrf.mxu3 }
 0x129   : > { %v1065_v19 = vadd.f32 %v1015_v40, %v1007_v25  ;;  %v833_v2 = vrot.slane %v6302_v27, 1  ;;  %v5086_v53 = vpop.eup %5085  ;;  %v1315_v32 = vrot.slane %v6427_v45, 2  ;;  %5091 = vpow2.f32 %v1182_v56 }
 0x12a   : > { %v1060_v59 = vadd.f32 %v1059_v39, %v1058_v47  ;;  %v1214_v48 = vadd.f32 %v1213_v8, %v1212_v9  ;;  %v1220_v38 = vrot.slane %v1219_v20, 4  ;;  %v1049_v3 = vrot.slane %v1048_v33, 1 }
 0x12b   : > { %v1066_v6 = vrot.slane %v1065_v19, 4  ;;  %v5088_v37 = vpop.eup %5087  ;;  %v840_v17 = vrot.slane %v6313_v52, 1  ;;  %v834_v46 = vadd.f32 %v833_v2, %v6302_v27  ;;  %v1055_v34 = vadd.f32 %v1054_v23, %v1053_v57  ;;  %v1475_v23 = vpop.f32.mrf.mxu1  ;;  %v6458_v2 = vld [vmem:[%s5753_s21 + $0x88] sm:$0xff] }
 0x12c   : > { %v1061_v11 = vrot.slane %v1060_v59, 2  ;;  %v1215_v4 = vrot.slane %v1214_v48, 2  ;;  %v1221_v21 = vadd.f32 %v1220_v38, %v1219_v20  ;;  %v1226_v13 = vadd.f32 %v5088_v37, %v5086_v53  ;;  %v1437_v20 = vpop.f32.mrf.mxu0 }
 0x12d   : > { %v1067_v35 = vadd.f32 %v1066_v6, %v1065_v19  ;;  %v847_v54 = vrot.slane %v6323_v44, 1  ;;  %v6451_v28 = vsel %vm1344_vm2, %v1330_v10, 0.0  ;;  %v6454_v16 = vadd.f32 %v1315_v32, %v6272_v26  ;;  %4789 = vmatmul.msk.f32.gmra.mxu0 %vm458_vm0, %v6458_v2  ;;  %4796 = vmatmul.msk.f32.gmra.mxu1 %vm458_vm0, %v6458_v2 }
 0x12e   : > { %v1222_v25 = vrot.slane %v1221_v21, 2  ;;  %v1216_v47 = vadd.f32 %v1215_v4, %v1214_v48  ;;  %v1062_v40 = vadd.f32 %v1061_v11, %v1060_v59  ;;  %v5090_v9 = vpop.eup %5089  ;;  %v1227_v56 = vrot.slane %v1226_v13, 4  ;;  %4803 = vmatmul.msk.f32.gmra.mxu2 %vm458_vm0, %v6458_v2  ;;  %4810 = vmatmul.msk.f32.gmra.mxu3 %vm458_vm0, %v6458_v2 }
 0x12f   : > { %v1068_v1 = vrot.slane %v1067_v35, 2  ;;  %v860_v27 = vadd.f32 %v834_v46, %v6387_v18  ;;  %v1050_v57 = vadd.f32 %v1049_v3, %v1048_v33  ;;  %v5092_v53 = vpop.eup %5091  ;;  %v841_v6 = vadd.f32 %v840_v17, %v6313_v52 }
 0x130   : > { %v1217_v39 = vrot.slane %v1216_v47, 1  ;;  %v1223_v19 = vadd.f32 %v1222_v25, %v1221_v21  ;;  %v1228_v59 = vadd.f32 %v1227_v56, %v1226_v13  ;;  %v1056_v10 = vrot.slane %v1055_v34, 1 }
 0x131   : > { %v1069_v8 = vadd.f32 %v1068_v1, %v1067_v35  ;;  %v1063_v48 = vrot.slane %v1062_v40, 1  ;;  %v1233_v38 = vadd.f32 %v5092_v53, %v5090_v9  ;;  %v848_v32 = vadd.f32 %v847_v54, %v6323_v44  ;;  %v1513_v54 = vpop.f32.mrf.mxu2  ;;  %v1551_v1 = vpop.f32.mrf.mxu3 }
 0x132   : > { %v1218_v26 = vadd.f32 %v1217_v39, %v1216_v47  ;;  %v1224_v37 = vrot.slane %v1223_v19, 1  ;;  %v1229_v11 = vrot.slane %v1228_v59, 2  ;;  %v861_v33 = vadd.f32 %v841_v6, %v6389_v12 }
 0x133   : > { %v854_v3 = vrot.slane %v6345_v24, 1  ;;  %v1070_v35 = vrot.slane %v1069_v8, 1  ;;  %v1234_v52 = vrot.slane %v1233_v38, 4  ;;  %v6469_v17 = vsub.f32 %v6387_v18, %v1050_v57 }
 0x134   : > { %5093 = vlog2.f32 %v1218_v26  ;;  %v1225_v4 = vadd.f32 %v1224_v37, %v1223_v19  ;;  %v1057_v44 = vadd.f32 %v1056_v10, %v1055_v34  ;;  %v1064_v21 = vadd.f32 %v1063_v48, %v1062_v40  ;;  %v6479_v6 = vpop.f32.mrf.mxu0 }
 0x135   : > { %8520 = vst [vmem:[#allocation25_spill] sm:$0xff] %v6469_v17  ;;  %v1230_v13 = vadd.f32 %v1229_v11, %v1228_v59  ;;  %v1721_v46 = vmul.f32 %v6429_v58, %v6429_v58  ;;  %v1235_v25 = vadd.f32 %v1234_v52, %v1233_v38  ;;  %v1071_v47 = vadd.f32 %v1070_v35, %v1069_v8  ;;  %v6481_v58 = vpop.f32.mrf.mxu1 }
 0x136   : > { %v1722_v9 = vmul.f32 %v6431_v41, %v6431_v41  ;;  %v1723_v56 = vmul.f32 %v1510_v42, %v1510_v42  ;;  %5095 = vlog2.f32 %v1225_v4  ;;  %v1729_v39 = vmul.f32 %v1437_v20, %v1437_v20 }
 0x137   : > { %v1231_v57 = vrot.slane %v1230_v13, 1  ;;  %v1730_v19 = vmul.f32 %v1475_v23, %v1475_v23  ;;  %v1236_v53 = vrot.slane %v1235_v25, 2  ;;  %v1724_v34 = vmul.f32 %v1548_v29, %v1548_v29  ;;  %v6490_v29 = vld [vmem:[%s5753_s21 + $0x90] sm:$0xff] }
 0x138   : > { %v1731_v40 = vmul.f32 %v1513_v54, %v1513_v54  ;;  %v1732_v59 = vmul.f32 %v1551_v1, %v1551_v1  ;;  %v6484_v10 = vsub.f32 %v6389_v12, %v1057_v44  ;;  %v1737_v48 = vadd.f32 %v1729_v39, %v1721_v46  ;;  %4790 = vmatmul.msk.f32.gmra.mxu0 %vm458_vm0, %v6490_v29 }
 0x139   : > { %v1232_v8 = vadd.f32 %v1231_v57, %v1230_v13  ;;  %v1744_v41 = vadd.f32 %v1730_v19, %v1722_v9  ;;  %v6487_v38 = vsub.f32 %v6414_v61, %v1064_v21  ;;  %v1237_v20 = vadd.f32 %v1236_v53, %v1235_v25  ;;  %4797 = vmatmul.msk.f32.gmra.mxu1 %vm458_vm0, %v6490_v29  ;;  %v6511_v54 = vpop.f32.mrf.mxu2  ;;  %v6513_v1 = vpop.f32.mrf.mxu3 }
 0x13a   : > { %8521 = vst [vmem:[#allocation26_spill] sm:$0xff] %v6484_v10  ;;  %v5094_v42 = vpop.eup %5093  ;;  %v1751_v23 = vadd.f32 %v1731_v40, %v1723_v56  ;;  %v1758_v26 = vadd.f32 %v1732_v59, %v1724_v34  ;;  %v6492_v37 = vmul.f32 -0.5, %v860_v27  ;;  %v855_v35 = vadd.f32 %v854_v3, %v6345_v24  ;;  %4804 = vmatmul.msk.f32.gmra.mxu2 %vm458_vm0, %v6490_v29 }
 0x13b   : > { %8522 = vst [vmem:[#allocation27_spill] sm:$0xff] %v6487_v38  ;;  %v1249_v11 = vmul.f32 0.6931472, %v5094_v42  ;;  %v6496_v52 = vsub.f32 %v6416_v63, %v1071_v47  ;;  %v1284_v4 = vrot.slane %v6469_v17, 1  ;;  %v862_v44 = vadd.f32 %v848_v32, %v6414_v61  ;;  %4811 = vmatmul.msk.f32.gmra.mxu3 %vm458_vm0, %v6490_v29 }
 0x13c   : > { %8523 = vst [vmem:[#allocation28_spill] sm:$0xff] %v6492_v37  ;;  %5097 = vlog2.f32 %v1232_v8  ;;  %v1738_v21 = vrot.slane %v1737_v48, 4  ;;  %v5096_v24 = vpop.eup %5095  ;;  %v1285_v27 = vrot.slane %v6484_v10, 1  ;;  %v863_v3 = vadd.f32 %v855_v35, %v6416_v63 }
 0x13d   : > { %8524 = vst [vmem:[#allocation29_spill] sm:$0xff] %v6496_v52  ;;  %v1238_v13 = vrot.slane %v1237_v20, 1  ;;  %v1825_v46 = vand.u32 2147483647, %v6479_v6  ;;  %v6515_v32 = vmul.f32 -0.5, %v861_v33  ;;  %v1286_v25 = vrot.slane %v6487_v38, 1  ;;  %v6525_v33 = vpop.f32.mrf.mxu0  ;;  %v6527_v8 = vpop.f32.mrf.mxu1 }
 0x13e   : > { %v1745_v47 = vrot.slane %v1744_v41, 4  ;;  %v1752_v9 = vrot.slane %v1751_v23, 4  ;;  %v1260_v56 = vadd.f32 %v1249_v11, %v6367_v55  ;;  %v1287_v57 = vrot.slane %v6496_v52, 1 }
 0x13f   : > { %8525 = vst [vmem:[#allocation30_spill] sm:$0xff] %v6515_v32  ;;  %v1759_v39 = vrot.slane %v1758_v26, 4  ;;  %v1841_v19 = vsub.f32 0.0, %v1825_v46  ;;  %v6521_v53 = vadd.f32 %v1284_v4, %v6492_v37  ;;  %v1251_v34 = vmul.f32 0.6931472, %v5096_v24 }
 0x140   : > { %v6523_v40 = vmul.f32 -0.5, %v862_v44  ;;  %v1739_v59 = vadd.f32 %v1738_v21, %v1737_v48  ;;  %v6530_v42 = vadd.f32 %v1285_v27, %v6515_v32  ;;  %v6532_v55 = vmul.f32 -0.5, %v863_v3  ;;  %v6541_v21 = vld [vmem:[%s5753_s21 + $0x98] sm:$0xff] }
 0x141   : > { %v1239_v11 = vadd.f32 %v1238_v13, %v1237_v20  ;;  %v1857_v35 = vmul.f32 1.442695, %v1841_v19  ;;  %v6537_v4 = vadd.f32 %v1745_v47, %v1744_v41  ;;  %v1753_v44 = vadd.f32 %v1752_v9, %v1751_v23  ;;  %4791 = vmatmul.msk.f32.gmra.mxu0 %vm458_vm0, %v6541_v21  ;;  %4798 = vmatmul.msk.f32.gmra.mxu1 %vm458_vm0, %v6541_v21 }
 0x142   : > { %8526 = vst [vmem:[#allocation31_spill] sm:$0xff] %v6523_v40  ;;  %v5098_v46 = vpop.eup %5097  ;;  %v6535_v52 = vadd.f32 %v1286_v25, %v6523_v40  ;;  %v6544_v24 = vsub.f32 %v6387_v18, %v1260_v56  ;;  %v6547_v27 = vadd.f32 %v1287_v57, %v6532_v55  ;;  %v1760_v3 = vadd.f32 %v1759_v39, %v1758_v26  ;;  %v6563_v57 = vpop.f32.mrf.mxu2 }
 0x143   : > { %8527 = vst [vmem:[#allocation32_spill] sm:$0xff] %v6532_v55  ;;  %5099 = vpow2.f32 %v1857_v35  ;;  %v1261_v41 = vadd.f32 %v1251_v34, %v6377_v0  ;;  %v1740_v20 = vrot.slane %v1739_v59, 2  ;;  %v1826_v23 = vand.u32 2147483647, %v6481_v58  ;;  %4805 = vmatmul.msk.f32.gmra.mxu2 %vm458_vm0, %v6541_v21  ;;  %4812 = vmatmul.msk.f32.gmra.mxu3 %vm458_vm0, %v6541_v21  ;;  %v6565_v39 = vpop.f32.mrf.mxu3 }
 0x144   : > { %8528 = vst [vmem:[#allocation33_spill] sm:$0xff] %v6544_v24  ;;  %v1827_v13 = vand.u32 2147483647, %v6511_v54  ;;  %v1253_v18 = vmul.f32 0.6931472, %v5098_v46  ;;  %5101 = vlog2.f32 %v1239_v11  ;;  %v1754_v0 = vrot.slane %v1753_v44, 2 }
 0x145   : > { %v1828_v26 = vand.u32 2147483647, %v6513_v1  ;;  %v1833_v25 = vand.u32 2147483647, %v6525_v33  ;;  %v1842_v9 = vsub.f32 0.0, %v1826_v23  ;;  %v1761_v19 = vrot.slane %v1760_v3, 2  ;;  %v6572_v38 = vpop.f32.mrf.mxu0  ;;  %v6574_v23 = vpop.f32.mrf.mxu1 }
 0x146   : > { %v1843_v56 = vsub.f32 0.0, %v1827_v13  ;;  %v1834_v48 = vand.u32 2147483647, %v6527_v8  ;;  %v1316_v11 = vrot.slane %v6544_v24, 2  ;;  %v6570_v46 = vsub.f32 %v6389_v12, %v1261_v41  ;;  %v374_v12 = vpop.permute.xlu2 %373  ;;  %v6581_v41 = vld [vmem:[%s5753_s21 + $0xa0] sm:$0xff] }
 0x147   : > { %v1844_v34 = vsub.f32 0.0, %v1828_v26  ;;  %v1849_v35 = vsub.f32 0.0, %v1833_v25  ;;  %v1859_v55 = vmul.f32 1.442695, %v1842_v9  ;;  %v1262_v40 = vadd.f32 %v1253_v18, %v6383_v7 }
 0x148   : > { %8529 = vst [vmem:[#allocation34_spill] sm:$0xff] %v6570_v46  ;;  %v1861_v47 = vmul.f32 1.442695, %v1843_v56  ;;  %v6577_v10 = vadd.f32 %v1740_v20, %v1739_v59  ;;  %v1850_v25 = vsub.f32 0.0, %v1834_v48  ;;  %v1835_v17 = vand.u32 2147483647, %v6563_v57 }
 0x149   : > { %v5100_v13 = vpop.eup %5099  ;;  %v1863_v26 = vmul.f32 1.442695, %v1844_v34  ;;  %5103 = vpow2.f32 %v1859_v55  ;;  %v1873_v24 = vmul.f32 1.442695, %v1849_v35  ;;  %v6583_v56 = vadd.f32 %v1754_v0, %v1753_v44  ;;  %4792 = vmatmul.msk.f32.gmra.mxu0 %vm458_vm0, %v6581_v41  ;;  %4799 = vmatmul.msk.f32.gmra.mxu1 %vm458_vm0, %v6581_v41 }
 0x14a   : > { %v1889_v32 = vadd.f32 1.0, %v5100_v13  ;;  %v5102_v9 = vpop.eup %5101  ;;  %5105 = vpow2.f32 %v1861_v47  ;;  %v1875_v37 = vmul.f32 1.442695, %v1850_v25  ;;  %v1836_v45 = vand.u32 2147483647, %v6565_v39  ;;  %v5451_v47 = vld [vmem:[%s5748_s18 + $0x70] sm:$0xff] }
 0x14b   : > { %v6590_v7 = vadd.f32 %v1761_v19, %v1760_v3  ;;  %v1851_v59 = vsub.f32 0.0, %v1835_v17  ;;  %4806 = vmatmul.msk.f32.gmra.mxu2 %vm458_vm0, %v6581_v41  ;;  %4813 = vmatmul.msk.f32.gmra.mxu3 %vm458_vm0, %v6581_v41  ;;  %v6597_v55 = vadd.f32 %v1316_v11, %v6521_v53  ;;  %v377_v48 = vsel %vm376_vm4, %v374_v12, 0.0  ;;  %v6605_v18 = vpop.f32.mrf.mxu3 }
 0x14c   : > { %5107 = vlog2.f32 %v1889_v32  ;;  %v1852_v44 = vsub.f32 0.0, %v1836_v45  ;;  %v6601_v3 = vsub.f32 %v6414_v61, %v1262_v40  ;;  %378 = vadd.xlane.f32.xlu0 %v377_v48  ;;  %v6603_v32 = vpop.f32.mrf.mxu2  ;;  %v1255_v19 = vmul.f32 0.6931472, %v5102_v9 }
 0x14d   : > { %5109 = vpow2.f32 %v1863_v26  ;;  %v1877_v17 = vmul.f32 1.442695, %v1851_v59  ;;  %v6611_v40 = vpop.f32.mrf.mxu0 }
 0x14e   : > { %8530 = vst [vmem:[#allocation35_spill] sm:$0xff] %v6601_v3  ;;  %5111 = vpow2.f32 %v1873_v24  ;;  %v1879_v0 = vmul.f32 1.442695, %v1852_v44  ;;  %v6613_v24 = vpop.f32.mrf.mxu1  ;;  %v2017_v13 = vmax.f32 %v6572_v38, %v6611_v40  ;;  %v4244_v59 = vpop.permute.xlu2 %4243  ;;  %v418_v44 = vlaneseq }
 0x14f   : > { %5113 = vpow2.f32 %v1875_v37  ;;  %v5104_v45 = vpop.eup %5103  ;;  %v2024_v37 = vmax.f32 %v6574_v23, %v6613_v24 }
 0x150   : > { %5115 = vpow2.f32 %v1877_v17  ;;  %v5106_v35 = vpop.eup %5105  ;;  %v1890_v11 = vadd.f32 1.0, %v5104_v45  ;;  %v2018_v45 = vrot.slane %v2017_v13, 4 }
 0x151   : > { %5117 = vpow2.f32 %v1879_v0  ;;  %v1891_v12 = vadd.f32 1.0, %v5106_v35  ;;  %v2025_v0 = vrot.slane %v2024_v37, 4  ;;  %4814 = vmatmul.msk.f32.vlgmr.msrb.gmra.mxu0 %vm458_vm0, %v6300_v5  ;;  %4821 = vmatmul.msk.f32.vlgmr.msrb.gmra.mxu1 %vm458_vm0, %v6300_v5  ;;  %v1263_v35 = vadd.f32 %v1255_v19, %v6406_v14  ;;  %v5452_v14 = vld [vmem:[%s5748_s18 + $0x78] sm:$0xff] }
 0x152   : > { %v5108_v26 = vpop.eup %5107  ;;  %5119 = vlog2.f32 %v1890_v11  ;;  %v4246_v11 = vsel %vm386_vm3, %v4244_v59, 0.0  ;;  %v2019_v34 = vmax.f32 %v2017_v13, %v2018_v45  ;;  %v5453_v13 = vld [vmem:[%s5748_s18 + $0x60] sm:$0xff] }
 0x153   : > { %v5110_v48 = vpop.eup %5109  ;;  %5121 = vlog2.f32 %v1891_v12  ;;  %4828 = vmatmul.msk.f32.vlgmr.msrb.gmra.mxu2 %vm458_vm0, %v6300_v5  ;;  %4835 = vmatmul.msk.f32.vlgmr.msrb.gmra.mxu3 %vm458_vm0, %v6300_v5  ;;  %v2026_v53 = vmax.f32 %v2024_v37, %v2025_v0  ;;  %v1906_v12 = vmul.f32 0.6931472, %v5108_v26  ;;  %v6637_v59 = vpop.f32.mrf.mxu3  ;;  %v5454_v26 = vld [vmem:[%s5748_s18 + $0x68] sm:$0xff] }
 0x154   : > { %v5112_v25 = vpop.eup %5111  ;;  %v1892_v20 = vadd.f32 1.0, %v5110_v48  ;;  %3539 = vmatpush.msrb.mxu2 %v5451_v47  ;;  %3577 = vmatpush.msrb.mxu3 %v5452_v14  ;;  %v6635_v5 = vpop.f32.mrf.mxu2  ;;  %v2020_v45 = vrot.slane %v2019_v34, 2  ;;  %v5456_v14 = vld [vmem:[%s5748_s18 + $0x38] sm:$0xff] }
 0x155   : > { %v5114_v17 = vpop.eup %5113  ;;  %v1897_v9 = vadd.f32 1.0, %v5112_v25  ;;  %4247 = vadd.xlane.f32.xlu0 %v4246_v11  ;;  %v6639_v25 = vand.u32 127, %v418_v44  ;;  %3463 = vmatpush.msrb.mxu0 %v5453_v13  ;;  %v2027_v0 = vrot.slane %v2026_v53, 2  ;;  %v2031_v44 = vmax.f32 %v6603_v32, %v6635_v5  ;;  %v5457_v13 = vld [vmem:[%s5748_s18 + $0x20] sm:$0xff] }
 0x156   : > { %v5116_v19 = vpop.eup %5115  ;;  %5123 = vlog2.f32 %v1892_v20  ;;  %v1898_v48 = vadd.f32 1.0, %v5114_v17  ;;  %3501 = vmatpush.msrb.mxu1 %v5454_v26  ;;  %v5455_v20 = vld [vmem:[%s5748_s18 + $0x30] sm:$0xff]  ;;  %v2038_v11 = vmax.f32 %v6605_v18, %v6637_v59  ;;  %3578 = vmatpush.msrb.mxu3 %v5456_v14  ;;  %v2021_v26 = vmax.f32 %v2019_v34, %v2020_v45 }
 0x157   : > { %8531 = vst [vmem:[#allocation36_spill] sm:$0xff] %v6639_v25  ;;  %v5118_v47 = vpop.eup %5117  ;;  %5125 = vlog2.f32 %v1897_v9  ;;  %v1899_v37 = vadd.f32 1.0, %v5116_v19  ;;  %3540 = vmatpush.msrb.mxu2 %v5455_v20  ;;  %3464 = vmatpush.msrb.mxu0 %v5457_v13  ;;  %v6651_v19 = vsub.f32 %v6416_v63, %v1263_v35  ;;  %v2028_v61 = vmax.f32 %v2026_v53, %v2027_v0  ;;  %v5458_v20 = vld [vmem:[%s5748_s18 + $0x28] sm:$0xff]  ;;  %s8490_s18 = scalar_lea.vmem [#allocation6], %s8197_s17 }
 0x158   : > { %5127 = vlog2.f32 %v1898_v48  ;;  %v1900_v17 = vadd.f32 1.0, %v5118_v47  ;;  %v5120_v9 = vpop.eup %5119  ;;  %3502 = vmatpush.msrb.mxu1 %v5458_v20  ;;  %v2032_v30 = vrot.slane %v2031_v44, 4  ;;  %v2039_v15 = vrot.slane %v2038_v11, 4 }
 0x159   : > { %8532 = vst [vmem:[#allocation37_spill] sm:$0xff] %v6651_v19  ;;  %5129 = vlog2.f32 %v1899_v37  ;;  %v5122_v48 = vpop.eup %5121  ;;  %v1908_v47 = vmul.f32 0.6931472, %v5120_v9  ;;  %v2022_v49 = vrot.slane %v2021_v26, 1  ;;  %v2029_v62 = vrot.slane %v2028_v61, 1  ;;  %4815 = vmatmul.msk.f32.gmra.mxu0 %vm458_vm0, %v6392_v36  ;;  %4822 = vmatmul.msk.f32.gmra.mxu1 %vm458_vm0, %v6392_v36 }
 0x15a   : > { %5131 = vlog2.f32 %v1900_v17  ;;  %v1910_v31 = vmul.f32 0.6931472, %v5122_v48  ;;  %v6660_v63 = vadd.f32 %v6451_v28, %v6362_v43  ;;  %v8533_v34 = vmax.f32 %v6479_v6, 0.0 }
 0x15b   : > { %v2033_v37 = vmax.f32 %v2031_v44, %v2032_v30  ;;  %v2040_v45 = vmax.f32 %v2038_v11, %v2039_v15  ;;  %4829 = vmatmul.msk.f32.gmra.mxu2 %vm458_vm0, %v6392_v36  ;;  %v6667_v0 = vadd.s32 896, %v6639_v25  ;;  %v8534_v14 = vmax.f32 %v6481_v58, 0.0  ;;  %4836 = vmatmul.msk.f32.gmra.mxu3 %vm458_vm0, %v6392_v36 }
 0x15c   : > { %v5124_v53 = vpop.eup %5123  ;;  %v1937_v35 = vadd.f32 %v1906_v12, %v8533_v34  ;;  %v6671_v20 = vmax.f32 %v2021_v26, %v2022_v49  ;;  %v6673_v43 = vmax.f32 %v2028_v61, %v2029_v62  ;;  %v8535_v15 = vmax.f32 %v6511_v54, 0.0 }
 0x15d   : > { %v5126_v17 = vpop.eup %5125  ;;  %v1938_v13 = vadd.f32 %v1908_v47, %v8534_v14  ;;  %v1912_v9 = vmul.f32 0.6931472, %v5124_v53  ;;  %v2034_v12 = vrot.slane %v2033_v37, 2  ;;  %v2041_v44 = vrot.slane %v2040_v45, 2 }
 0x15e   : > { %v5128_v30 = vpop.eup %5127  ;;  %v1939_v28 = vadd.f32 %v1910_v31, %v8535_v15  ;;  %v1922_v6 = vmul.f32 0.6931472, %v5126_v17  ;;  %v8536_v48 = vmax.f32 %v6513_v1, 0.0  ;;  %v2073_v49 = vsub.f32 %v6572_v38, %v6671_v20 }
 0x15f   : > { %v5130_v11 = vpop.eup %5129  ;;  %v1924_v47 = vmul.f32 0.6931472, %v5128_v30  ;;  %v2081_v62 = vsub.f32 %v6611_v40, %v6671_v20  ;;  %v8537_v36 = vmax.f32 %v6525_v33, 0.0  ;;  %v2074_v31 = vsub.f32 %v6574_v23, %v6673_v43 }
 0x160   : > { %v1940_v58 = vadd.f32 %v1912_v9, %v8536_v48  ;;  %v5132_v61 = vpop.eup %5131  ;;  %v1926_v54 = vmul.f32 0.6931472, %v5130_v11  ;;  %v2082_v53 = vsub.f32 %v6613_v24, %v6673_v43  ;;  %v8538_v1 = vmax.f32 %v6527_v8, 0.0 }
 0x161   : > { %v1945_v26 = vadd.f32 %v1922_v6, %v8537_v36  ;;  %v1928_v17 = vmul.f32 0.6931472, %v5132_v61  ;;  %v2089_v14 = vmul.f32 1.442695, %v2073_v49  ;;  %v2105_v38 = vmul.f32 1.442695, %v2081_v62  ;;  %4816 = vmatmul.msk.f32.gmra.mxu0 %vm458_vm0, %v6436_v22  ;;  %4823 = vmatmul.msk.f32.gmra.mxu1 %vm458_vm0, %v6436_v22 }
 0x162   : > { %v1946_v34 = vadd.f32 %v1924_v47, %v8538_v1  ;;  %v8539_v40 = vmax.f32 %v6563_v57, 0.0  ;;  %v2091_v15 = vmul.f32 1.442695, %v2074_v31  ;;  %v2107_v33 = vmul.f32 1.442695, %v2082_v53 }
 0x163   : > { %v1953_v9 = vadd.f32 %v1945_v26, %v1937_v35  ;;  %v8540_v11 = vmax.f32 %v6565_v39, 0.0  ;;  %5133 = vpow2.f32 %v2089_v14  ;;  %v2035_v23 = vmax.f32 %v2033_v37, %v2034_v12  ;;  %4830 = vmatmul.msk.f32.gmra.mxu2 %vm458_vm0, %v6436_v22  ;;  %4837 = vmatmul.msk.f32.gmra.mxu3 %vm458_vm0, %v6436_v22 }
 0x164   : > { %v1947_v30 = vadd.f32 %v1926_v54, %v8539_v40  ;;  %v1960_v6 = vadd.f32 %v1946_v34, %v1938_v13  ;;  %5135 = vpow2.f32 %v2105_v38  ;;  %v2042_v35 = vmax.f32 %v2040_v45, %v2041_v44  ;;  %v6710_v45 = vpop.f32.mrf.mxu1 }
 0x165   : > { %v1948_v48 = vadd.f32 %v1928_v17, %v8540_v11  ;;  %v1954_v8 = vrot.slane %v1953_v9, 4  ;;  %5137 = vpow2.f32 %v2091_v15  ;;  %v2036_v39 = vrot.slane %v2035_v23, 1 }
 0x166   : > { %v1967_v24 = vadd.f32 %v1947_v30, %v1939_v28  ;;  %v1961_v57 = vrot.slane %v1960_v6, 4  ;;  %v1319_v37 = vrot.slane %v6651_v19, 2  ;;  %5139 = vpow2.f32 %v2107_v33  ;;  %v6708_v28 = vpop.f32.mrf.mxu0 }
 0x167   : > { %v1974_v13 = vadd.f32 %v1948_v48, %v1940_v58  ;;  %v2043_v47 = vrot.slane %v2042_v35, 1  ;;  %v1955_v49 = vadd.f32 %v1954_v8, %v1953_v9  ;;  %v6706_v62 = vmax.f32 %v2035_v23, %v2036_v39  ;;  %v6741_v23 = vpop.f32.mrf.mxu2 }
 0x168   : > { %v1968_v12 = vrot.slane %v1967_v24, 4  ;;  %vm434_vm5 = vcmp.lt.s32.totalorder %v6667_v0, 1000  ;;  %v1962_v44 = vadd.f32 %v1961_v57, %v1960_v6  ;;  %v8541_v22 = vrot.slane %v6570_v46, 2 }
 0x169   : > { %v6713_v58 = vmax.f32 %v2042_v35, %v2043_v47  ;;  %v1350_v36 = vsel %vm1344_vm2, %v6454_v16, 0.0  ;;  %v5134_v26 = vpop.eup %5133  ;;  %v1975_v54 = vrot.slane %v1974_v13, 4  ;;  %v2075_v31 = vsub.f32 %v6603_v32, %v6706_v62  ;;  %4817 = vmatmul.msk.f32.gmra.mxu0 %vm458_vm0, %v6458_v2  ;;  %4824 = vmatmul.msk.f32.gmra.mxu1 %vm458_vm0, %v6458_v2 }
 0x16a   : > { %v1333_v61 = vadd.f32 %v8541_v22, %v6530_v42  ;;  %v2083_v53 = vsub.f32 %v6635_v5, %v6706_v62  ;;  %v1351_v0 = vadd.f32 %v1350_v36, %v6660_v63  ;;  %v5136_v1 = vpop.eup %5135  ;;  %v1969_v34 = vadd.f32 %v1968_v12, %v1967_v24  ;;  %v6748_v12 = vpop.f32.mrf.mxu3 }
 0x16b   : > { %v2076_v17 = vsub.f32 %v6605_v18, %v6713_v58  ;;  %v2084_v42 = vsub.f32 %v6637_v59, %v6713_v58  ;;  %v5648_v14 = vmov 0.0   ;;  %v5138_v38 = vpop.eup %5137  ;;  %v1956_v9 = vrot.slane %v1955_v49, 2  ;;  %4831 = vmatmul.msk.f32.gmra.mxu2 %vm458_vm0, %v6458_v2  ;;  %4838 = vmatmul.msk.f32.gmra.mxu3 %vm458_vm0, %v6458_v2 }
 0x16c   : > { %v6729_v16 = vsel %vm434_vm5, 1.0, %v5648_v14  ;;  %v2121_v40 = vadd.f32 %v5136_v1, %v5134_v26  ;;  %v2093_v32 = vmul.f32 1.442695, %v2075_v31  ;;  %v2109_v30 = vmul.f32 1.442695, %v2083_v53  ;;  %v5140_v5 = vpop.eup %5139 }
 0x16d   : > { %8542 = vst [vmem:[#allocation38_spill] sm:$0xff] %v6729_v16  ;;  %v1963_v63 = vrot.slane %v1962_v44, 2  ;;  %v2095_v18 = vmul.f32 1.442695, %v2076_v17  ;;  %v2111_v15 = vmul.f32 1.442695, %v2084_v42  ;;  %v2128_v11 = vadd.f32 %v5140_v5, %v5138_v38 }
 0x16e   : > { %v8543_v59 = vrot.slane %v6601_v3, 2  ;;  %v2122_v6 = vrot.slane %v2121_v40, 4  ;;  %5141 = vpow2.f32 %v2093_v32  ;;  %v1335_v48 = vadd.f32 %v1319_v37, %v6547_v27  ;;  %v1586_v26 = vpop.f32.mrf.mxu0  ;;  %v6955_v3 = vld [vmem:[%s5753_s21 + $0xb0] sm:$0xff] }
 0x16f   : > { %v1970_v8 = vrot.slane %v1969_v34, 2  ;;  %v1976_v24 = vadd.f32 %v1975_v54, %v1974_v13  ;;  %5143 = vpow2.f32 %v2109_v30  ;;  %v1352_v35 = vsel %vm1344_vm2, %v6597_v55, 0.0  ;;  %v1624_v54 = vpop.f32.mrf.mxu1 }
 0x170   : > { %v1334_v33 = vadd.f32 %v8543_v59, %v6535_v52  ;;  %v2123_v52 = vadd.f32 %v2122_v6, %v2121_v40  ;;  %v2129_v57 = vrot.slane %v2128_v11, 4  ;;  %5145 = vpow2.f32 %v2095_v18  ;;  %v1662_v18 = vpop.f32.mrf.mxu2 }
 0x171   : > { %v1343_v39 = vmul.f32 %v6729_v16, %v1335_v48  ;;  %5147 = vpow2.f32 %v2111_v15  ;;  %v1957_v27 = vadd.f32 %v1956_v9, %v1955_v49  ;;  %v1964_v37 = vadd.f32 %v1963_v63, %v1962_v44  ;;  %4818 = vmatmul.msk.f32.gmra.mxu0 %vm458_vm0, %v6490_v29  ;;  %4825 = vmatmul.msk.f32.gmra.mxu1 %vm458_vm0, %v6490_v29 }
 0x172   : > { %v1353_v47 = vadd.f32 %v1352_v35, %v1351_v0  ;;  %v2124_v22 = vrot.slane %v2123_v52, 2  ;;  %v2130_v36 = vadd.f32 %v2129_v57, %v2128_v11  ;;  %v1354_v2 = vsel %vm1344_vm2, %v1333_v61, 0.0  ;;  %v1700_v57 = vpop.f32.mrf.mxu3 }
 0x173   : > { %v1356_v13 = vsel %vm1344_vm2, %v1334_v33, 0.0  ;;  %v8544_v55 = vrot.slane %v6537_v4, 2  ;;  %v1742_v53 = vrot.slane %v6577_v10, 1  ;;  %v1358_v49 = vsel %vm1344_vm2, %v1343_v39, 0.0  ;;  %4832 = vmatmul.msk.f32.gmra.mxu2 %vm458_vm0, %v6490_v29  ;;  %4839 = vmatmul.msk.f32.gmra.mxu3 %vm458_vm0, %v6490_v29 }
 0x174   : > { %v1355_v1 = vadd.f32 %v1354_v2, %v1353_v47  ;;  %v5142_v44 = vpop.eup %5141  ;;  %v2131_v0 = vrot.slane %v2130_v36, 2  ;;  %v2125_v17 = vadd.f32 %v2124_v22, %v2123_v52  ;;  %v1756_v42 = vrot.slane %v6583_v56, 1 }
 0x175   : > { %v6755_v31 = vadd.f32 %v8544_v55, %v6537_v4  ;;  %v1971_v61 = vadd.f32 %v1970_v8, %v1969_v34  ;;  %v5144_v14 = vpop.eup %5143  ;;  %v1977_v4 = vrot.slane %v1976_v24, 2  ;;  %v1958_v38 = vrot.slane %v1957_v27, 1 }
 0x176   : > { %v1357_v9 = vadd.f32 %v1356_v13, %v1355_v1  ;;  %v1763_v40 = vrot.slane %v6590_v7, 1  ;;  %v5146_v32 = vpop.eup %5145  ;;  %v2135_v30 = vadd.f32 %v5144_v14, %v5142_v44  ;;  %v2126_v5 = vrot.slane %v2125_v17, 1  ;;  %v1589_v13 = vpop.f32.mrf.mxu0 }
 0x177   : > { %v1965_v63 = vrot.slane %v1964_v37, 1  ;;  %v2132_v34 = vadd.f32 %v2131_v0, %v2130_v36  ;;  %v5148_v15 = vpop.eup %5147  ;;  %v1757_v33 = vadd.f32 %v1756_v42, %v6583_v56  ;;  %v1972_v6 = vrot.slane %v1971_v61, 1  ;;  %v1627_v55 = vpop.f32.mrf.mxu1 }
 0x178   : > { %v1359_v59 = vadd.f32 %v1358_v49, %v1357_v9  ;;  %v1764_v11 = vadd.f32 %v1763_v40, %v6590_v7  ;;  %v2136_v48 = vrot.slane %v2135_v30, 4  ;;  %v2142_v8 = vadd.f32 %v5148_v15, %v5146_v32  ;;  %v1665_v40 = vpop.f32.mrf.mxu2 }
 0x179   : > { %v2127_v35 = vadd.f32 %v2126_v5, %v2125_v17  ;;  %v2133_v52 = vrot.slane %v2132_v34, 1  ;;  %v6772_v39 = vadd.f32 %v1757_v33, %v6741_v23  ;;  %v1973_v47 = vadd.f32 %v1972_v6, %v1971_v61  ;;  %4819 = vmatmul.msk.f32.gmra.mxu0 %vm458_vm0, %v6541_v21  ;;  %4826 = vmatmul.msk.f32.gmra.mxu1 %vm458_vm0, %v6541_v21 }
 0x17a   : > { %1360 = vadd.xlane.f32.xlu0 %v1359_v59  ;;  %v6775_v22 = vadd.f32 %v1764_v11, %v6748_v12  ;;  %v1978_v29 = vadd.f32 %v1977_v4, %v1976_v24  ;;  %v2137_v36 = vadd.f32 %v2136_v48, %v2135_v30  ;;  %v2143_v2 = vrot.slane %v2142_v8, 4 }
 0x17b   : > { %v2134_v56 = vadd.f32 %v2133_v52, %v2132_v34  ;;  %v1743_v7 = vadd.f32 %v1742_v53, %v6577_v10  ;;  %v1749_v1 = vrot.slane %v6755_v31, 1  ;;  %v6780_v49 = vsub.f32 %v6741_v23, %v1973_v47  ;;  %4833 = vmatmul.msk.f32.gmra.mxu2 %vm458_vm0, %v6541_v21  ;;  %4840 = vmatmul.msk.f32.gmra.mxu3 %vm458_vm0, %v6541_v21  ;;  %v1703_v34 = vpop.f32.mrf.mxu3 }
 0x17c   : > { %v1979_v44 = vrot.slane %v1978_v29, 1  ;;  %v2138_v0 = vrot.slane %v2137_v36, 2  ;;  %v2144_v17 = vadd.f32 %v2143_v2, %v2142_v8  ;;  %v1959_v42 = vadd.f32 %v1958_v38, %v1957_v27 }
 0x17d   : > { %8545 = vst [vmem:[#allocation39_spill] sm:$0xff] %v6780_v49  ;;  %5149 = vlog2.f32 %v2127_v35  ;;  %v1966_v24 = vadd.f32 %v1965_v63, %v1964_v37  ;;  %v1725_v10 = vmul.f32 %v1586_v26, %v1586_v26  ;;  %v1726_v4 = vmul.f32 %v1624_v54, %v1624_v54 }
 0x17e   : > { %5151 = vlog2.f32 %v2134_v56  ;;  %v1980_v61 = vadd.f32 %v1979_v44, %v1978_v29  ;;  %v2145_v53 = vrot.slane %v2144_v17, 2  ;;  %v2139_v14 = vadd.f32 %v2138_v0, %v2137_v36  ;;  %v6803_v8 = vpop.f32.mrf.mxu0 }
 0x17f   : > { %v1733_v9 = vmul.f32 %v1589_v13, %v1589_v13  ;;  %v1727_v38 = vmul.f32 %v1662_v18, %v1662_v18  ;;  %v1734_v32 = vmul.f32 %v1627_v55, %v1627_v55  ;;  %v1735_v37 = vmul.f32 %v1665_v40, %v1665_v40  ;;  %v6805_v35 = vpop.f32.mrf.mxu1 }
 0x180   : > { %v6791_v27 = vsub.f32 %v6748_v12, %v1980_v61  ;;  %v6794_v30 = vsub.f32 %v6708_v28, %v1959_v42  ;;  %v2140_v26 = vrot.slane %v2139_v14, 1  ;;  %v2146_v5 = vadd.f32 %v2145_v53, %v2144_v17 }
 0x181   : > { %v1765_v63 = vadd.f32 %v1733_v9, %v1725_v10  ;;  %v1750_v54 = vadd.f32 %v1749_v1, %v6755_v31  ;;  %v6798_v15 = vsub.f32 %v6710_v45, %v1966_v24  ;;  %v1772_v59 = vadd.f32 %v1734_v32, %v1726_v4  ;;  %4820 = vmatmul.msk.f32.gmra.mxu0 %vm458_vm0, %v6581_v41 }
 0x182   : > { %8546 = vst [vmem:[#allocation40_spill] sm:$0xff] %v6791_v27  ;;  %v6800_v21 = vadd.f32 %v1735_v37, %v1727_v38  ;;  %v1793_v18 = vadd.f32 %v1743_v7, %v6708_v28  ;;  %v2141_v6 = vadd.f32 %v2140_v26, %v2139_v14  ;;  %v2147_v11 = vrot.slane %v2146_v5, 1  ;;  %4827 = vmatmul.msk.f32.gmra.mxu1 %vm458_vm0, %v6581_v41  ;;  %v6818_v7 = vpop.f32.mrf.mxu2 }
 0x183   : > { %8547 = vst [vmem:[#allocation41_spill] sm:$0xff] %v6794_v30  ;;  %v5150_v33 = vpop.eup %5149  ;;  %v1736_v48 = vmul.f32 %v1703_v34, %v1703_v34  ;;  %v1794_v47 = vadd.f32 %v1750_v54, %v6710_v45  ;;  %v1728_v31 = vmul.f32 %v1700_v57, %v1700_v57  ;;  %v2217_v29 = vrot.slane %v6794_v30, 1  ;;  %4834 = vmatmul.msk.f32.gmra.mxu2 %vm458_vm0, %v6581_v41  ;;  %v6828_v24 = vpop.f32.mrf.mxu3 }
 0x184   : > { %8548 = vst [vmem:[#allocation42_spill] sm:$0xff] %v6798_v15  ;;  %v5152_v52 = vpop.eup %5151  ;;  %5153 = vlog2.f32 %v2141_v6  ;;  %v2148_v36 = vadd.f32 %v2147_v11, %v2146_v5  ;;  %v2178_v2 = vmul.f32 0.6931472, %v5150_v33  ;;  %v2218_v56 = vrot.slane %v6798_v15, 1  ;;  %4841 = vmatmul.msk.f32.gmra.mxu3 %vm458_vm0, %v6581_v41 }
 0x185   : > { %v6814_v13 = vadd.f32 %v1736_v48, %v1728_v31  ;;  %v1801_v55 = vmul.f32 -0.5, %v1793_v18  ;;  %v2180_v57 = vmul.f32 0.6931472, %v5152_v52  ;;  %v6822_v1 = vmul.f32 -0.5, %v1794_v47 }
 0x186   : > { %5155 = vlog2.f32 %v2148_v36  ;;  %v2219_v44 = vrot.slane %v6780_v49, 1  ;;  %v1766_v0 = vrot.slane %v1765_v63, 4  ;;  %v1829_v42 = vand.u32 2147483647, %v6803_v8  ;;  %v6840_v32 = vpop.f32.mrf.mxu0 }
 0x187   : > { %8549 = vst [vmem:[#allocation43_spill] sm:$0xff] %v6822_v1  ;;  %v6825_v17 = vadd.f32 %v2217_v29, %v1801_v55  ;;  %v2193_v61 = vadd.f32 %v2178_v2, %v6671_v20  ;;  %v2234_v10 = vadd.f32 %v2218_v56, %v6822_v1  ;;  %v6833_v53 = vmul.f32 -0.5, %v6772_v39  ;;  %v6842_v37 = vpop.f32.mrf.mxu1 }
 0x188   : > { %v1773_v14 = vrot.slane %v1772_v59, 4  ;;  %v2194_v4 = vadd.f32 %v2180_v57, %v6673_v43  ;;  %v6837_v9 = vmul.f32 -0.5, %v6775_v22  ;;  %v1845_v40 = vsub.f32 0.0, %v1829_v42 }
 0x189   : > { %8550 = vst [vmem:[#allocation44_spill] sm:$0xff] %v6833_v53  ;;  %v1830_v38 = vand.u32 2147483647, %v6805_v35  ;;  %v6845_v26 = vadd.f32 %v2219_v44, %v6833_v53  ;;  %v2220_v39 = vrot.slane %v6791_v27, 1  ;;  %v1767_v5 = vadd.f32 %v1766_v0, %v1765_v63 }
 0x18a   : > { %v5154_v41 = vpop.eup %5153  ;;  %8551 = vst [vmem:[#allocation45_spill] sm:$0xff] %v6837_v9  ;;  %v1780_v43 = vrot.slane %v6800_v21, 4  ;;  %v1865_v54 = vmul.f32 1.442695, %v1845_v40  ;;  %v1831_v33 = vand.u32 2147483647, %v6818_v7  ;;  %v6851_v18 = vsub.f32 %v6708_v28, %v2193_v61  ;;  %v6864_v56 = vpop.f32.mrf.mxu2 }
 0x18b   : > { %v2182_v20 = vmul.f32 0.6931472, %v5154_v41  ;;  %v1846_v22 = vsub.f32 0.0, %v1830_v38  ;;  %v1774_v48 = vadd.f32 %v1773_v14, %v1772_v59  ;;  %v6855_v52 = vsub.f32 %v6710_v45, %v2194_v4 }
 0x18c   : > { %v5156_v34 = vpop.eup %5155  ;;  %8552 = vst [vmem:[#allocation46_spill] sm:$0xff] %v6851_v18  ;;  %5157 = vpow2.f32 %v1865_v54  ;;  %v1847_v63 = vsub.f32 0.0, %v1831_v33  ;;  %v1768_v36 = vrot.slane %v1767_v5, 2  ;;  %v1832_v2 = vand.u32 2147483647, %v6828_v24 }
 0x18d   : > { %v2195_v6 = vadd.f32 %v2182_v20, %v6706_v62  ;;  %v2184_v11 = vmul.f32 0.6931472, %v5156_v34  ;;  %8553 = vst [vmem:[#allocation47_spill] sm:$0xff] %v6855_v52  ;;  %v1867_v47 = vmul.f32 1.442695, %v1846_v22  ;;  %v1781_v28 = vadd.f32 %v1780_v43, %v6800_v21 }
 0x18e   : > { %v1869_v62 = vmul.f32 1.442695, %v1847_v63  ;;  %v1837_v59 = vand.u32 2147483647, %v6840_v32  ;;  %v1787_v57 = vrot.slane %v6814_v13, 4  ;;  %v2249_v0 = vrot.slane %v6851_v18, 2  ;;  %v6875_v61 = vpop.f32.mrf.mxu0 }
 0x18f   : > { %v6858_v31 = vsub.f32 %v6741_v23, %v2195_v6  ;;  %v2196_v29 = vadd.f32 %v2184_v11, %v6713_v58  ;;  %5159 = vpow2.f32 %v1867_v47  ;;  %v1848_v23 = vsub.f32 0.0, %v1832_v2  ;;  %v6871_v58 = vpop.f32.mrf.mxu3  ;;  %v6877_v14 = vpop.f32.mrf.mxu1 }
 0x190   : > { %v1838_v44 = vand.u32 2147483647, %v6842_v37  ;;  %v2250_v21 = vrot.slane %v6855_v52, 2  ;;  %5161 = vpow2.f32 %v1869_v62  ;;  %v1853_v42 = vsub.f32 0.0, %v1837_v59 }
 0x191   : > { %8554 = vst [vmem:[#allocation48_spill] sm:$0xff] %v6858_v31  ;;  %v6867_v45 = vsub.f32 %v6748_v12, %v2196_v29  ;;  %v6880_v12 = vadd.f32 %v2220_v39, %v6837_v9  ;;  %v1871_v41 = vmul.f32 1.442695, %v1848_v23  ;;  %v6883_v40 = vadd.f32 %v1801_v55, %v6194_v51 }
 0x192   : > { %v1854_v4 = vsub.f32 0.0, %v1838_v44  ;;  %v5158_v38 = vpop.eup %5157  ;;  %v1775_v20 = vrot.slane %v1774_v48, 2  ;;  %v1782_v34 = vrot.slane %v1781_v28, 2  ;;  %v1813_v43 = vmax.f32 %v6803_v8, 0.0 }
 0x193   : > { %8555 = vst [vmem:[#allocation49_spill] sm:$0xff] %v6867_v45  ;;  %v1881_v54 = vmul.f32 1.442695, %v1853_v42  ;;  %v6886_v22 = vadd.f32 %v1768_v36, %v1767_v5  ;;  %v1788_v33 = vadd.f32 %v1787_v57, %v6814_v13  ;;  %v1893_v6 = vadd.f32 1.0, %v5158_v38  ;;  %v6897_v36 = vpop.f32.mrf.mxu2 }
 0x194   : > { %5163 = vpow2.f32 %v1871_v41  ;;  %v2265_v39 = vadd.f32 %v2249_v0, %v6825_v17  ;;  %v2266_v47 = vadd.f32 %v2250_v21, %v2234_v10  ;;  %v1883_v63 = vmul.f32 1.442695, %v1854_v4 }
 0x195   : > { %v5160_v11 = vpop.eup %5159  ;;  %5165 = vpow2.f32 %v1881_v54  ;;  %v1839_v29 = vand.u32 2147483647, %v6864_v56  ;;  %v6892_v62 = vadd.f32 %v1775_v20, %v1774_v48  ;;  %v6894_v5 = vadd.f32 %v1782_v34, %v1781_v28 }
 0x196   : > { %5167 = vlog2.f32 %v1893_v6  ;;  %v1894_v55 = vadd.f32 1.0, %v5160_v11  ;;  %v5162_v2 = vpop.eup %5161  ;;  %v1840_v13 = vand.u32 2147483647, %v6871_v58  ;;  %v1789_v17 = vrot.slane %v1788_v33, 2  ;;  %v6904_v0 = vpop.f32.mrf.mxu0 }
 0x197   : > { %5169 = vpow2.f32 %v1883_v63  ;;  %v1895_v10 = vadd.f32 1.0, %v5162_v2  ;;  %v1855_v59 = vsub.f32 0.0, %v1839_v29  ;;  %v6899_v57 = vpop.f32.mrf.mxu3  ;;  %v2281_v23 = vsel %vm1344_vm2, %v2265_v39, 0.0  ;;  %v6906_v21 = vpop.f32.mrf.mxu1  ;;  %v6915_v39 = vld [vmem:[%s5753_s21 + $0xa8] sm:$0xff] }
 0x198   : > { %5171 = vlog2.f32 %v1894_v55  ;;  %v2282_v44 = vsel %vm1344_vm2, %v2266_v47, 0.0  ;;  %v1856_v28 = vsub.f32 0.0, %v1840_v13  ;;  %v2251_v41 = vrot.slane %v6858_v31, 2  ;;  %4849 = vmatmul.msk.f32.vlgmr.msra.gmra.mxu0 %vm458_vm0, %v6915_v39  ;;  %4856 = vmatmul.msk.f32.vlgmr.msra.gmra.mxu1 %vm458_vm0, %v6915_v39 }
 0x199   : > { %5173 = vlog2.f32 %v1895_v10  ;;  %v1885_v38 = vmul.f32 1.442695, %v1855_v59  ;;  %v2045_v6 = vmax.f32 %v6875_v61, %v6904_v0  ;;  %v2052_v11 = vmax.f32 %v6877_v14, %v6906_v21  ;;  %v6926_v10 = vpop.xlane.xlu0 %388  ;;  %4863 = vmatmul.msk.f32.vlgmr.msra.gmra.mxu2 %vm458_vm0, %v6915_v39  ;;  %4870 = vmatmul.msk.f32.vlgmr.msra.gmra.mxu3 %vm458_vm0, %v6915_v39 }
 0x19a   : > { %v5164_v42 = vpop.eup %5163  ;;  %v1887_v54 = vmul.f32 1.442695, %v1856_v28  ;;  %v6917_v63 = vadd.f32 %v2282_v44, %v2281_v23  ;;  %v6919_v55 = vadd.f32 %v1789_v17, %v1788_v33  ;;  %v1821_v13 = vmax.f32 %v6840_v32, 0.0 }
 0x19b   : > { %v5166_v20 = vpop.eup %5165  ;;  %v1896_v34 = vadd.f32 1.0, %v5164_v42  ;;  %5175 = vpow2.f32 %v1885_v38  ;;  %v2046_v59 = vrot.slane %v2045_v6, 4  ;;  %v2053_v28 = vrot.slane %v2052_v11, 4 }
 0x19c   : > { %v5168_v47 = vpop.eup %5167  ;;  %8556 = vst [vmem:[#allocation50_spill] sm:$0xff] %v6917_v63  ;;  %v1901_v29 = vadd.f32 1.0, %v5166_v20  ;;  %v1822_v17 = vmax.f32 %v6842_v37, 0.0  ;;  %v6935_v42 = vadd.f32 %v2251_v41, %v6845_v26  ;;  %v6937_v20 = vpop.f32.mrf.mxu2  ;;  %v8557_v19 = vmax.f32 %v6805_v35, 0.0 }
 0x19d   : > { %v5170_v2 = vpop.eup %5169  ;;  %5177 = vlog2.f32 %v1896_v34  ;;  %v1914_v32 = vmul.f32 0.6931472, %v5168_v47  ;;  %v2047_v38 = vmax.f32 %v2045_v6, %v2046_v59  ;;  %v2054_v48 = vmax.f32 %v2052_v11, %v2053_v28 }
 0x19e   : > { %v5172_v33 = vpop.eup %5171  ;;  %5179 = vlog2.f32 %v1901_v29  ;;  %v1902_v23 = vadd.f32 1.0, %v5170_v2  ;;  %v2059_v29 = vmax.f32 %v6897_v36, %v6937_v20  ;;  %v1823_v9 = vmax.f32 %v6864_v56, 0.0 }
 0x19f   : > { %5181 = vpow2.f32 %v1887_v54  ;;  %v5174_v34 = vpop.eup %5173  ;;  %v1916_v4 = vmul.f32 0.6931472, %v5172_v33  ;;  %v6941_v51 = vpop.f32.mrf.mxu3  ;;  %v2048_v26 = vrot.slane %v2047_v38, 2  ;;  %v2055_v59 = vrot.slane %v2054_v48, 2 }
 0x1a0   : > { %5183 = vlog2.f32 %v1902_v23  ;;  %v2066_v41 = vmax.f32 %v6899_v57, %v6941_v51  ;;  %v6947_v54 = vpop.f32.mrf.mxu0  ;;  %v6949_v6 = vpop.f32.mrf.mxu1  ;;  %v1918_v11 = vmul.f32 0.6931472, %v5174_v34  ;;  %v2060_v28 = vrot.slane %v2059_v29, 4  ;;  %4850 = vmatmul.msk.f32.gmra.mxu0 %vm458_vm0, %v6955_v3  ;;  %4857 = vmatmul.msk.f32.gmra.mxu1 %vm458_vm0, %v6955_v3 }
 0x1a1   : > { %5185 = vrcp.f32 %v6926_v10  ;;  %v5176_v47 = vpop.eup %5175  ;;  %v1941_v23 = vadd.f32 %v1914_v32, %v1813_v43  ;;  %v2049_v37 = vmax.f32 %v2047_v38, %v2048_v26  ;;  %v1942_v27 = vadd.f32 %v1916_v4, %v8557_v19  ;;  %4864 = vmatmul.msk.f32.gmra.mxu2 %vm458_vm0, %v6955_v3  ;;  %4871 = vmatmul.msk.f32.gmra.mxu3 %vm458_vm0, %v6955_v3 }
 0x1a2   : > { %v1903_v44 = vadd.f32 1.0, %v5176_v47  ;;  %v2067_v25 = vrot.slane %v2066_v41, 4  ;;  %v2056_v34 = vmax.f32 %v2054_v48, %v2055_v59  ;;  %v2061_v31 = vmax.f32 %v2059_v29, %v2060_v28 }
 0x1a3   : > { %v5178_v33 = vpop.eup %5177  ;;  %v2050_v32 = vrot.slane %v2049_v37, 1  ;;  %v8558_v35 = vmax.f32 %v6818_v7, 0.0  ;;  %vm395_vm6 = vweird.f32 %v6926_v10 }
 0x1a4   : > { %v5180_v46 = vpop.eup %5179  ;;  %5187 = vlog2.f32 %v1903_v44  ;;  %v2068_v38 = vmax.f32 %v2066_v41, %v2067_v25  ;;  %v2057_v4 = vrot.slane %v2056_v34, 1  ;;  %v2062_v29 = vrot.slane %v2061_v31, 2  ;;  %v6974_v41 = vpop.f32.mrf.mxu2 }
 0x1a5   : > { %v5182_v8 = vpop.eup %5181  ;;  %v1930_v43 = vmul.f32 0.6931472, %v5180_v46  ;;  %v1943_v56 = vadd.f32 %v1918_v11, %v8558_v35  ;;  %v6972_v44 = vmax.f32 %v2049_v37, %v2050_v32  ;;  %v1920_v59 = vmul.f32 0.6931472, %v5178_v33 }
 0x1a6   : > { %v5184_v19 = vpop.eup %5183  ;;  %v1904_v48 = vadd.f32 1.0, %v5182_v8  ;;  %v2069_v25 = vrot.slane %v2068_v38, 2  ;;  %v6976_v28 = vmax.f32 %v2056_v34, %v2057_v4  ;;  %v2063_v2 = vmax.f32 %v2061_v31, %v2062_v29 }
 0x1a7   : > { %v6970_v26 = vpop.eup %5185  ;;  %v1949_v47 = vadd.f32 %v1930_v43, %v1821_v13  ;;  %v1932_v46 = vmul.f32 0.6931472, %v5184_v19  ;;  %v6978_v49 = vpop.f32.mrf.mxu3  ;;  %v2077_v8 = vsub.f32 %v6875_v61, %v6972_v44  ;;  %v2085_v13 = vsub.f32 %v6904_v0, %v6972_v44 }
 0x1a8   : > { %5189 = vlog2.f32 %v1904_v48  ;;  %v6984_v37 = vpop.f32.mrf.mxu0  ;;  %v2078_v33 = vsub.f32 %v6877_v14, %v6976_v28  ;;  %v2086_v34 = vsub.f32 %v6906_v21, %v6976_v28  ;;  %v2064_v31 = vrot.slane %v2063_v2, 1  ;;  %v6990_v32 = vpop.f32.mrf.mxu1  ;;  %v6993_v48 = vld [vmem:[%s5753_s21 + $0xb8] sm:$0xff] }
 0x1a9   : > { %v1981_v7 = vadd.f32 %v1949_v47, %v1941_v23  ;;  %v1950_v11 = vadd.f32 %v1932_v46, %v1822_v17  ;;  %v2070_v43 = vmax.f32 %v2068_v38, %v2069_v25  ;;  %v2097_v35 = vmul.f32 1.442695, %v2077_v8  ;;  %4851 = vmatmul.msk.f32.gmra.mxu0 %vm458_vm0, %v6993_v48  ;;  %4858 = vmatmul.msk.f32.gmra.mxu1 %vm458_vm0, %v6993_v48 }
 0x1aa   : > { %v5188_v23 = vpop.eup %5187  ;;  %v2113_v61 = vmul.f32 1.442695, %v2085_v13  ;;  %v2099_v4 = vmul.f32 1.442695, %v2078_v33  ;;  %v2115_v29 = vmul.f32 1.442695, %v2086_v34  ;;  %v6995_v47 = vmax.f32 %v2063_v2, %v2064_v31  ;;  %4865 = vmatmul.msk.f32.gmra.mxu2 %vm458_vm0, %v6993_v48  ;;  %4872 = vmatmul.msk.f32.gmra.mxu3 %vm458_vm0, %v6993_v48 }
 0x1ab   : > { %v1982_v17 = vrot.slane %v1981_v7, 4  ;;  %v1988_v19 = vadd.f32 %v1950_v11, %v1942_v27  ;;  %v1934_v0 = vmul.f32 0.6931472, %v5188_v23  ;;  %5191 = vpow2.f32 %v2097_v35 }
 0x1ac   : > { %v2071_v38 = vrot.slane %v2070_v43, 1  ;;  %5193 = vpow2.f32 %v2113_v61  ;;  %v2079_v2 = vsub.f32 %v6897_v36, %v6995_v47  ;;  %v2087_v25 = vsub.f32 %v6937_v20, %v6995_v47  ;;  %v7010_v31 = vpop.f32.mrf.mxu2 }
 0x1ad   : > { %v1983_v14 = vadd.f32 %v1982_v17, %v1981_v7  ;;  %v1989_v21 = vrot.slane %v1988_v19, 4  ;;  %v1951_v46 = vadd.f32 %v1934_v0, %v1823_v9  ;;  %v1824_v7 = vmax.f32 %v6871_v58, 0.0 }
 0x1ae   : > { %v5190_v27 = vpop.eup %5189  ;;  %5195 = vpow2.f32 %v2099_v4  ;;  %v2101_v33 = vmul.f32 1.442695, %v2079_v2  ;;  %v2117_v34 = vmul.f32 1.442695, %v2087_v25  ;;  %v7016_v9 = vsel %vm1344_vm2, %v6935_v42, 0.0 }
 0x1af   : > { %v1990_v11 = vadd.f32 %v1989_v21, %v1988_v19  ;;  %v1936_v8 = vmul.f32 0.6931472, %v5190_v27  ;;  %v1995_v13 = vadd.f32 %v1951_v46, %v1943_v56  ;;  %5197 = vpow2.f32 %v2115_v29  ;;  %v7012_v23 = vpop.f32.mrf.mxu3  ;;  %8559 = vst [vmem:[#allocation51_spill] sm:$0xff] %v7016_v9 }
 0x1b0   : > { %v8560_v36 = vmax.f32 %v6828_v24, 0.0  ;;  %v7020_v19 = vmax.f32 %v2070_v43, %v2071_v38  ;;  %v1984_v58 = vrot.slane %v1983_v14, 2  ;;  %v391_v56 = vmul.f32 %v6970_v26, %v6926_v10  ;;  %v7024_v61 = vpop.f32.mrf.mxu0  ;;  %v7032_v27 = vpop.f32.mrf.mxu1 }
 0x1b1   : > { %v1952_v17 = vadd.f32 %v1936_v8, %v1824_v7  ;;  %v1996_v35 = vrot.slane %v1995_v13, 4  ;;  %5199 = vpow2.f32 %v2101_v33  ;;  %v5192_v0 = vpop.eup %5191  ;;  %v1991_v43 = vrot.slane %v1990_v11, 2 }
 0x1b2   : > { %v1944_v20 = vadd.f32 %v1920_v59, %v8560_v36  ;;  %5201 = vpow2.f32 %v2117_v34  ;;  %v2080_v42 = vsub.f32 %v6899_v57, %v7020_v19  ;;  %v2088_v24 = vsub.f32 %v6941_v51, %v7020_v19  ;;  %v5194_v59 = vpop.eup %5193 }
 0x1b3   : > { %v1997_v29 = vadd.f32 %v1996_v35, %v1995_v13  ;;  %v1770_v21 = vrot.slane %v6886_v22, 1  ;;  %v1777_v38 = vrot.slane %v6892_v62, 1  ;;  %v2149_v25 = vadd.f32 %v5194_v59, %v5192_v0 }
 0x1b4   : > { %v2002_v4 = vadd.f32 %v1952_v17, %v1944_v20  ;;  %v5196_v46 = vpop.eup %5195  ;;  %v2103_v7 = vmul.f32 1.442695, %v2080_v42  ;;  %v2119_v8 = vmul.f32 1.442695, %v2088_v24  ;;  %v8561_v57 = vrot.slane %v6867_v45, 2 }
 0x1b5   : > { %v5198_v33 = vpop.eup %5197  ;;  %v392_v34 = vsub.f32 1.0, %v391_v56  ;;  %v1998_v13 = vrot.slane %v1997_v29, 2  ;;  %v1985_v36 = vadd.f32 %v1984_v58, %v1983_v14  ;;  %v2150_v17 = vrot.slane %v2149_v25, 4 }
 0x1b6   : > { %v2003_v2 = vrot.slane %v2002_v4, 4  ;;  %v7037_v51 = vadd.f32 %v8561_v57, %v6880_v12  ;;  %v2156_v35 = vadd.f32 %v5198_v33, %v5196_v46  ;;  %5203 = vpow2.f32 %v2103_v7  ;;  %v7046_v12 = vld [vmem:[%s5753_s21 + $0xc0] sm:$0xff] }
 0x1b7   : > { %v5200_v53 = vpop.eup %5199  ;;  %v8563_v0 = vand.u32 2147483648, %v6926_v10  ;;  %5205 = vpow2.f32 %v2119_v8  ;;  %v1992_v24 = vadd.f32 %v1991_v43, %v1990_v11  ;;  %v1784_v59 = vrot.slane %v6894_v5, 1  ;;  %4852 = vmatmul.msk.f32.gmra.mxu0 %vm458_vm0, %v7046_v12  ;;  %4859 = vmatmul.msk.f32.gmra.mxu1 %vm458_vm0, %v7046_v12 }
 0x1b8   : > { %8562 = vst [vmem:[#allocation52_spill] sm:$0xff] %v7037_v51  ;;  %v2004_v20 = vadd.f32 %v2003_v2, %v2002_v4  ;;  %v5202_v56 = vpop.eup %5201  ;;  %v2151_v57 = vadd.f32 %v2150_v17, %v2149_v25  ;;  %v2157_v45 = vrot.slane %v2156_v35, 4  ;;  %v1771_v14 = vadd.f32 %v1770_v21, %v6886_v22  ;;  %4866 = vmatmul.msk.f32.gmra.mxu2 %vm458_vm0, %v7046_v12  ;;  %v7068_v21 = vpop.f32.mrf.mxu3 }
 0x1b9   : > { %v7042_v42 = vor.u32 1.1754944e-38, %v8563_v0  ;;  %v1778_v58 = vadd.f32 %v1777_v38, %v6892_v62  ;;  %v393_v4 = vmul.f32 %v6970_v26, %v392_v34  ;;  %v8564_v11 = vand.u32 2147483647, %v6926_v10  ;;  %4873 = vmatmul.msk.f32.gmra.mxu3 %vm458_vm0, %v7046_v12  ;;  %v7066_v62 = vpop.f32.mrf.mxu2  ;;  %v7072_v34 = vpop.f32.mrf.mxu0 }
 0x1ba   : > { %v2163_v46 = vadd.f32 %v5202_v56, %v5200_v53  ;;  %v1999_v2 = vadd.f32 %v1998_v13, %v1997_v29  ;;  %v1791_v22 = vrot.slane %v6919_v55, 1  ;;  %v2005_v38 = vrot.slane %v2004_v20, 2  ;;  %v7078_v18 = vpop.f32.mrf.mxu1 }
 0x1bb   : > { %vm7057_vm7 = vcmp.eq.f32.partialorder %v8564_v11, 8.507059e+37  ;;  %v2152_v25 = vrot.slane %v2151_v57, 2  ;;  %v2158_v7 = vadd.f32 %v2157_v45, %v2156_v35  ;;  %v1986_v8 = vrot.slane %v1985_v36, 1 }
 0x1bc   : > { %vm396_vm8 = vweird.f32 %v6970_v26  ;;  %v2164_v53 = vrot.slane %v2163_v46, 4  ;;  %v1993_v29 = vrot.slane %v1992_v24, 1  ;;  %v1785_v33 = vadd.f32 %v1784_v59, %v6894_v5  ;;  %v5204_v13 = vpop.eup %5203 }
 0x1bd   : > { %v2159_v17 = vrot.slane %v2158_v7, 2  ;;  %v1797_v0 = vadd.f32 %v1771_v14, %v6947_v54  ;;  %v2153_v56 = vadd.f32 %v2152_v25, %v2151_v57  ;;  %v1798_v11 = vadd.f32 %v1778_v58, %v6949_v6  ;;  %v5206_v52 = vpop.eup %5205  ;;  %v7085_v58 = vld [vmem:[%s5753_s21 + $0xc8] sm:$0xff]  ;;  %vm7091_vm9 = vmor %vm395_vm6, %vm396_vm8 }
 0x1be   : > { %v394_v45 = vadd.f32 %v6970_v26, %v393_v4  ;;  %v2165_v35 = vadd.f32 %v2164_v53, %v2163_v46  ;;  %v2000_v15 = vrot.slane %v1999_v2, 1  ;;  %v1792_v1 = vadd.f32 %v1791_v22, %v6919_v55 }
 0x1bf   : > { %v2170_v5 = vadd.f32 %v5206_v52, %v5204_v13  ;;  %v1987_v59 = vadd.f32 %v1986_v8, %v1985_v36  ;;  %v2154_v50 = vrot.slane %v2153_v56, 1  ;;  %v2006_v30 = vadd.f32 %v2005_v38, %v2004_v20  ;;  %4853 = vmatmul.msk.f32.gmra.mxu0 %vm458_vm0, %v7085_v58  ;;  %4860 = vmatmul.msk.f32.gmra.mxu1 %vm458_vm0, %v7085_v58 }
 0x1c0   : > { %v1994_v60 = vadd.f32 %v1993_v29, %v1992_v24  ;;  %v2160_v16 = vadd.f32 %v2159_v17, %v2158_v7  ;;  %v2661_v57 = vmul.f32 %v6984_v37, %v6984_v37  ;;  %v2669_v14 = vmul.f32 %v7024_v61, %v7024_v61  ;;  %4867 = vmatmul.msk.f32.gmra.mxu2 %vm458_vm0, %v7085_v58  ;;  %v7122_v53 = vpop.f32.mrf.mxu3  ;;  %v5459_v17 = vld [vmem:[%s5799_s8] sm:$0x1] }
 0x1c1   : > { %v2166_v52 = vrot.slane %v2165_v35, 2  ;;  %v2171_v36 = vrot.slane %v2170_v5, 4  ;;  %v7095_v20 = vmul.f32 -0.5, %v1797_v0  ;;  %v7097_v24 = vmul.f32 -0.5, %v1798_v11  ;;  %v7107_v46 = vpop.f32.mrf.mxu2  ;;  %4874 = vmatmul.msk.f32.gmra.mxu3 %vm458_vm0, %v7085_v58 }
 0x1c2   : > { %v1799_v37 = vadd.f32 %v1785_v33, %v6974_v41  ;;  %v2001_v61 = vadd.f32 %v2000_v15, %v1999_v2  ;;  %v1800_v10 = vadd.f32 %v1792_v1, %v6978_v49  ;;  %v2677_v4 = vadd.f32 %v2669_v14, %v2661_v57 }
 0x1c3   : > { %8569 = vst [vmem:[#allocation53_spill] sm:$0xff] %v7095_v20  ;;  %v2172_v22 = vadd.f32 %v2171_v36, %v2170_v5  ;;  %v7110_v38 = vsub.f32 %v6947_v54, %v1987_v59  ;;  %v2155_v25 = vadd.f32 %v2154_v50, %v2153_v56  ;;  %v2007_v7 = vrot.slane %v2006_v30, 1  ;;  %v7139_v56 = vpop.f32.mrf.mxu0  ;;  %v7150_v5 = vld [vmem:[%s5753_s21 + $0xd0] sm:$0xff] }
 0x1c4   : > { %8570 = vst [vmem:[#allocation54_spill] sm:$0xff] %v7097_v24  ;;  %v7115_v15 = vsub.f32 %v6949_v6, %v1994_v60  ;;  %v2161_v1 = vrot.slane %v2160_v16, 1  ;;  %v2670_v2 = vmul.f32 %v7032_v27, %v7032_v27  ;;  %v398_v8 = vsel %vm7091_vm9, %v6970_v26, %v394_v45 }
 0x1c5   : > { %8571 = vst [vmem:[#allocation55_spill] sm:$0xff] %v7110_v38  ;;  %v2167_v29 = vadd.f32 %v2166_v52, %v2165_v35  ;;  %v2662_v50 = vmul.f32 %v6990_v32, %v6990_v32  ;;  %v2663_v33 = vmul.f32 %v7010_v31, %v7010_v31  ;;  %v403_v60 = vsel %vm7057_vm7, %v7042_v42, %v398_v8  ;;  %v7141_v32 = vpop.f32.mrf.mxu1 }
 0x1c6   : > { %8572 = vst [vmem:[#allocation56_spill] sm:$0xff] %v7115_v15  ;;  %v2173_v13 = vrot.slane %v2172_v22, 2  ;;  %v7132_v27 = vsub.f32 %v6974_v41, %v2001_v61  ;;  %v2664_v26 = vmul.f32 %v7012_v23, %v7012_v23  ;;  %v7137_v0 = vmul.f32 %v5459_v17, %v403_v60 }
 0x1c7   : > { %5207 = vlog2.f32 %v2155_v25  ;;  %v2008_v31 = vadd.f32 %v2007_v7, %v2006_v30  ;;  %v2671_v42 = vmul.f32 %v7066_v62, %v7066_v62  ;;  %v2672_v43 = vmul.f32 %v7068_v21, %v7068_v21  ;;  %8574 = vst [vmem:[#allocation58_spill] sm:$0xff] %v7150_v5  ;;  %4854 = vmatmul.msk.f32.gmra.mxu0 %vm458_vm0, %v7150_v5 }
 0x1c8   : > { %8573 = vst [vmem:[#allocation57_spill] sm:$0xff] %v7132_v27  ;;  %v2221_v11 = vrot.slane %v7110_v38, 1  ;;  %v2162_v45 = vadd.f32 %v2161_v1, %v2160_v16  ;;  %v2684_v35 = vadd.f32 %v2670_v2, %v2662_v50  ;;  %v405_v23 = vmax.f32 %v7137_v0, 1e-30  ;;  %4861 = vmatmul.msk.f32.gmra.mxu1 %vm458_vm0, %v7150_v5  ;;  %4868 = vmatmul.msk.f32.gmra.mxu2 %vm458_vm0, %v7150_v5  ;;  %v7175_v2 = vpop.f32.mrf.mxu3 }
 0x1c9   : > { %v2168_v59 = vrot.slane %v2167_v29, 1  ;;  %v7152_v57 = vadd.f32 %v2671_v42, %v2663_v33  ;;  %v7154_v14 = vadd.f32 %v2672_v43, %v2664_v26  ;;  %v2765_v30 = vand.u32 2147483647, %v7072_v34  ;;  %4875 = vmatmul.msk.f32.gmra.mxu3 %vm458_vm0, %v7150_v5  ;;  %v7173_v1 = vpop.f32.mrf.mxu2 }
 0x1ca   : > { %v2174_v62 = vadd.f32 %v2173_v13, %v2172_v22  ;;  %v2678_v16 = vrot.slane %v2677_v4, 4  ;;  %5209 = vlog2.f32 %v405_v23  ;;  %v2766_v21 = vand.u32 2147483647, %v7078_v18 }
 0x1cb   : > { %v2222_v55 = vrot.slane %v7115_v15, 1  ;;  %v2223_v52 = vrot.slane %v7132_v27, 1  ;;  %v7167_v36 = vsub.f32 %v6978_v49, %v2008_v31  ;;  %v2781_v61 = vsub.f32 0.0, %v2765_v30  ;;  %v7185_v42 = vpop.f32.mrf.mxu0  ;;  %v7199_v30 = vld [vmem:[%s5753_s21 + $0xd8] sm:$0xff]  ;;  %s8491_s21 = scalar_lea.vmem [#allocation9], %s8197_s17 }
 0x1cc   : > { %5211 = vlog2.f32 %v2162_v45  ;;  %v7171_v22 = vmul.f32 -0.5, %v1799_v37  ;;  %v2685_v25 = vrot.slane %v2684_v35, 4  ;;  %v2782_v7 = vsub.f32 0.0, %v2766_v21  ;;  %8579 = vst [vmem:[#allocation63_spill] sm:$0xff] %v7199_v30 }
 0x1cd   : > { %8575 = vst [vmem:[#allocation59_spill] sm:$0xff] %v7167_v36  ;;  %v5208_v8 = vpop.eup %5207  ;;  %v7178_v50 = vadd.f32 %v2221_v11, %v7095_v20  ;;  %v2169_v33 = vadd.f32 %v2168_v59, %v2167_v29  ;;  %v7180_v60 = vmul.f32 -0.5, %v1800_v10  ;;  %v2797_v13 = vmul.f32 1.442695, %v2781_v61  ;;  %v7194_v10 = vpop.f32.mrf.mxu1 }
 0x1ce   : > { %8576 = vst [vmem:[#allocation60_spill] sm:$0xff] %v7171_v22  ;;  %v2175_v26 = vrot.slane %v2174_v62, 1  ;;  %v7182_v17 = vadd.f32 %v2678_v16, %v2677_v4  ;;  %v2799_v37 = vmul.f32 1.442695, %v2782_v7  ;;  %v2767_v31 = vand.u32 2147483647, %v7107_v46 }
 0x1cf   : > { %8577 = vst [vmem:[#allocation61_spill] sm:$0xff] %v7180_v60  ;;  %v7188_v43 = vadd.f32 %v2222_v55, %v7097_v24  ;;  %v7191_v45 = vadd.f32 %v2223_v52, %v7171_v22  ;;  %5213 = vpow2.f32 %v2797_v13  ;;  %v2186_v23 = vmul.f32 0.6931472, %v5208_v8  ;;  %4855 = vmatmul.msk.f32.gmra.mxu0 %vm458_vm0, %v7199_v30 }
 0x1d0   : > { %v5210_v11 = vpop.eup %5209  ;;  %v7196_v4 = vadd.f32 %v2685_v25, %v2684_v35  ;;  %5215 = vpow2.f32 %v2799_v37  ;;  %v2783_v59 = vsub.f32 0.0, %v2767_v31  ;;  %v2768_v55 = vand.u32 2147483647, %v7122_v53  ;;  %4862 = vmatmul.msk.f32.gmra.mxu1 %vm458_vm0, %v7199_v30  ;;  %4869 = vmatmul.msk.f32.gmra.mxu2 %vm458_vm0, %v7199_v30 }
 0x1d1   : > { %8578 = vst [vmem:[#allocation62_spill] sm:$0xff] %v7191_v45  ;;  %5217 = vlog2.f32 %v2169_v33  ;;  %v407_v16 = vmul.f32 0.6931472, %v5210_v11  ;;  %v2176_v61 = vadd.f32 %v2175_v26, %v2174_v62  ;;  %v2692_v33 = vrot.slane %v7152_v57, 4  ;;  %4876 = vmatmul.msk.f32.gmra.mxu3 %vm458_vm0, %v7199_v30  ;;  %v7218_v11 = vpop.f32.mrf.mxu2 }
 0x1d2   : > { %v5212_v52 = vpop.eup %5211  ;;  %v2801_v7 = vmul.f32 1.442695, %v2783_v59  ;;  %v2784_v13 = vsub.f32 0.0, %v2768_v55  ;;  %v2773_v37 = vand.u32 2147483647, %v7139_v56  ;;  %v2197_v31 = vadd.f32 %v2186_v23, %v6972_v44  ;;  %v7220_v59 = vpop.f32.mrf.mxu3 }
 0x1d3   : > { %v408_v8 = vadd.f32 1.3862944, %v407_v16  ;;  %v2699_v62 = vrot.slane %v7154_v14, 4  ;;  %v2774_v26 = vand.u32 2147483647, %v7141_v32  ;;  %v7225_v38 = vadd.f32 %v2692_v33, %v7152_v57 }
 0x1d4   : > { %5219 = vpow2.f32 %v2801_v7  ;;  %v2188_v29 = vmul.f32 0.6931472, %v5212_v52  ;;  %v2803_v35 = vmul.f32 1.442695, %v2784_v13  ;;  %v2789_v25 = vsub.f32 0.0, %v2773_v37 }
 0x1d5   : > { %v5214_v16 = vpop.eup %5213  ;;  %v409_v55 = vmul.f32 %v408_v8, %v7137_v0  ;;  %5221 = vlog2.f32 %v2176_v61  ;;  %v2790_v23 = vsub.f32 0.0, %v2774_v26  ;;  %v2775_v0 = vand.u32 2147483647, %v7173_v1  ;;  %v7228_v8 = vpop.f32.mrf.mxu0 }
 0x1d6   : > { %v5216_v21 = vpop.eup %5215  ;;  %v2829_v27 = vadd.f32 1.0, %v5214_v16  ;;  %5223 = vpow2.f32 %v2803_v35  ;;  %v2813_v24 = vmul.f32 1.442695, %v2789_v25  ;;  %v7231_v61 = vsub.f32 %v6947_v54, %v2197_v31  ;;  %v7238_v35 = vpop.f32.mrf.mxu1 }
 0x1d7   : > { %v5218_v22 = vpop.eup %5217  ;;  %v411_v7 = vperm.slane %v409_v55, 0  ;;  %v2830_v15 = vadd.f32 1.0, %v5216_v21  ;;  %v2815_v52 = vmul.f32 1.442695, %v2790_v23  ;;  %v7235_v13 = vadd.f32 %v2699_v62, %v7154_v14  ;;  %4877 = vmatmul.msk.f32.vlgmr.msrb.gmra.mxu0 %vm458_vm0, %v6915_v39 }
 0x1d8   : > { %5225 = vlog2.f32 %v2829_v27  ;;  %8580 = vst [vmem:[#allocation64_spill] sm:$0xff] %v7231_v61  ;;  %v2776_v21 = vand.u32 2147483647, %v7175_v2  ;;  %v7243_v57 = vadd.f32 %v2188_v29, %v6976_v28  ;;  %v7245_v25 = vmul.f32 0.6931472, %v5218_v22  ;;  %4884 = vmatmul.msk.f32.vlgmr.msrb.gmra.mxu1 %vm458_vm0, %v6915_v39  ;;  %4891 = vmatmul.msk.f32.vlgmr.msrb.gmra.mxu2 %vm458_vm0, %v6915_v39 }
 0x1d9   : > { %412 = vrot.lane.b32.xlu2 %v411_v7, %s8492_s13  ;;  %5227 = vlog2.f32 %v2830_v15  ;;  %v2791_v54 = vsub.f32 0.0, %v2775_v0  ;;  %v2957_v33 = vmax.f32 %v7185_v42, %v7228_v8  ;;  %4898 = vmatmul.msk.f32.vlgmr.msrb.gmra.mxu3 %vm458_vm0, %v6915_v39  ;;  %v2964_v37 = vmax.f32 %v7194_v10, %v7238_v35  ;;  %v7259_v31 = vpop.f32.mrf.mxu2 }
 0x1da   : > { %v5220_v27 = vpop.eup %5219  ;;  %5229 = vpow2.f32 %v2813_v24  ;;  %v2792_v14 = vsub.f32 0.0, %v2776_v21  ;;  %v7261_v62 = vpop.f32.mrf.mxu3  ;;  %v2971_v39 = vmax.f32 %v7218_v11, %v7259_v31 }
 0x1db   : > { %v2831_v15 = vadd.f32 1.0, %v5220_v27  ;;  %5231 = vpow2.f32 %v2815_v52  ;;  %v5222_v28 = vpop.eup %5221  ;;  %v2817_v29 = vmul.f32 1.442695, %v2791_v54  ;;  %v2958_v55 = vrot.slane %v2957_v33, 4 }
 0x1dc   : > { %v5224_v26 = vpop.eup %5223  ;;  %v2819_v16 = vmul.f32 1.442695, %v2792_v14  ;;  %v2965_v52 = vrot.slane %v2964_v37, 4  ;;  %v2978_v0 = vmax.f32 %v7220_v59, %v7261_v62  ;;  %v7267_v27 = vmul.f32 0.6931472, %v5222_v28 }
 0x1dd   : > { %5233 = vlog2.f32 %v2831_v15  ;;  %v2832_v7 = vadd.f32 1.0, %v5224_v26  ;;  %v2959_v54 = vmax.f32 %v2957_v33, %v2958_v55  ;;  %v2972_v22 = vrot.slane %v2971_v39, 4 }
 0x1de   : > { %v5226_v23 = vpop.eup %5225  ;;  %5235 = vpow2.f32 %v2817_v29  ;;  %v2966_v14 = vmax.f32 %v2964_v37, %v2965_v52  ;;  %v2979_v44 = vrot.slane %v2978_v0, 4 }
 0x1df   : > { %v5228_v21 = vpop.eup %5227  ;;  %5237 = vpow2.f32 %v2819_v16  ;;  %v2960_v26 = vrot.slane %v2959_v54, 2  ;;  %v2973_v5 = vmax.f32 %v2971_v39, %v2972_v22  ;;  %4878 = vmatmul.msk.f32.gmra.mxu0 %vm458_vm0, %v6955_v3  ;;  %v2846_v28 = vmul.f32 0.6931472, %v5226_v23 }
 0x1e0   : > { %v5230_v24 = vpop.eup %5229  ;;  %5239 = vlog2.f32 %v2832_v7  ;;  %v2967_v16 = vrot.slane %v2966_v14, 2  ;;  %v2980_v33 = vmax.f32 %v2978_v0, %v2979_v44  ;;  %4885 = vmatmul.msk.f32.gmra.mxu1 %vm458_vm0, %v6955_v3  ;;  %4892 = vmatmul.msk.f32.gmra.mxu2 %vm458_vm0, %v6955_v3  ;;  %v2848_v55 = vmul.f32 0.6931472, %v5228_v21 }
 0x1e1   : > { %v5232_v20 = vpop.eup %5231  ;;  %v2837_v30 = vadd.f32 1.0, %v5230_v24  ;;  %v2961_v24 = vmax.f32 %v2959_v54, %v2960_v26  ;;  %v2974_v7 = vrot.slane %v2973_v5, 2  ;;  %4899 = vmatmul.msk.f32.gmra.mxu3 %vm458_vm0, %v6955_v3  ;;  %v2760_v0 = vmax.f32 %v7175_v2, 0.0 }
 0x1e2   : > { %v2838_v51 = vadd.f32 1.0, %v5232_v20  ;;  %v2968_v20 = vmax.f32 %v2966_v14, %v2967_v16  ;;  %v2981_v23 = vrot.slane %v2980_v33, 2  ;;  %v8581_v21 = vmax.f32 %v7072_v34, 0.0 }
 0x1e3   : > { %v5234_v37 = vpop.eup %5233  ;;  %5241 = vlog2.f32 %v2837_v30  ;;  %v2962_v29 = vrot.slane %v2961_v24, 1  ;;  %v2975_v15 = vmax.f32 %v2973_v5, %v2974_v7  ;;  %v8582_v3 = vmax.f32 %v7078_v18, 0.0 }
 0x1e4   : > { %v5236_v22 = vpop.eup %5235  ;;  %v2850_v39 = vmul.f32 0.6931472, %v5234_v37  ;;  %5243 = vlog2.f32 %v2838_v51  ;;  %v2877_v30 = vadd.f32 %v2846_v28, %v8581_v21  ;;  %v2969_v26 = vrot.slane %v2968_v20, 1 }
 0x1e5   : > { %v5238_v44 = vpop.eup %5237  ;;  %v2839_v52 = vadd.f32 1.0, %v5236_v22  ;;  %v2982_v63 = vmax.f32 %v2980_v33, %v2981_v23  ;;  %v2878_v45 = vadd.f32 %v2848_v55, %v8582_v3  ;;  %v7284_v51 = vmax.f32 %v2961_v24, %v2962_v29 }
 0x1e6   : > { %v5240_v9 = vpop.eup %5239  ;;  %v2840_v54 = vadd.f32 1.0, %v5238_v44  ;;  %v2976_v14 = vrot.slane %v2975_v15, 1  ;;  %v8583_v16 = vmax.f32 %v7107_v46, 0.0  ;;  %v7288_v2 = vmax.f32 %v2968_v20, %v2969_v26 }
 0x1e7   : > { %5245 = vlog2.f32 %v2839_v52  ;;  %v2983_v5 = vrot.slane %v2982_v63, 1  ;;  %v2852_v34 = vmul.f32 0.6931472, %v5240_v9  ;;  %v3013_v28 = vsub.f32 %v7185_v42, %v7284_v51  ;;  %4879 = vmatmul.msk.f32.gmra.mxu0 %vm458_vm0, %v6993_v48 }
 0x1e8   : > { %v2879_v37 = vadd.f32 %v2850_v39, %v8583_v16  ;;  %5247 = vlog2.f32 %v2840_v54  ;;  %v3021_v18 = vsub.f32 %v7228_v8, %v7284_v51  ;;  %v7294_v33 = vmax.f32 %v2975_v15, %v2976_v14  ;;  %4886 = vmatmul.msk.f32.gmra.mxu1 %vm458_vm0, %v6993_v48  ;;  %4893 = vmatmul.msk.f32.gmra.mxu2 %vm458_vm0, %v6993_v48 }
 0x1e9   : > { %v5242_v7 = vpop.eup %5241  ;;  %v3014_v55 = vsub.f32 %v7194_v10, %v7288_v2  ;;  %v3022_v24 = vsub.f32 %v7238_v35, %v7288_v2  ;;  %v7302_v9 = vmax.f32 %v2982_v63, %v2983_v5  ;;  %v3029_v8 = vmul.f32 1.442695, %v3013_v28  ;;  %4900 = vmatmul.msk.f32.gmra.mxu3 %vm458_vm0, %v6993_v48 }
 0x1ea   : > { %v5244_v29 = vpop.eup %5243  ;;  %v2862_v46 = vmul.f32 0.6931472, %v5242_v7  ;;  %v3045_v15 = vmul.f32 1.442695, %v3021_v18  ;;  %v3015_v22 = vsub.f32 %v7218_v11, %v7294_v33  ;;  %v8584_v10 = vmax.f32 %v7139_v56, 0.0 }
 0x1eb   : > { %v2864_v42 = vmul.f32 0.6931472, %v5244_v29  ;;  %v3031_v63 = vmul.f32 1.442695, %v3014_v55  ;;  %v3047_v39 = vmul.f32 1.442695, %v3022_v24  ;;  %v3023_v20 = vsub.f32 %v7259_v31, %v7294_v33 }
 0x1ec   : > { %v2885_v35 = vadd.f32 %v2862_v46, %v8584_v10  ;;  %v8585_v44 = vmax.f32 %v7141_v32, 0.0  ;;  %5249 = vpow2.f32 %v3029_v8  ;;  %v3033_v21 = vmul.f32 1.442695, %v3015_v22 }
 0x1ed   : > { %v5246_v23 = vpop.eup %5245  ;;  %v3016_v11 = vsub.f32 %v7220_v59, %v7302_v9  ;;  %5251 = vpow2.f32 %v3045_v15  ;;  %v3049_v56 = vmul.f32 1.442695, %v3023_v20  ;;  %v3024_v31 = vsub.f32 %v7261_v62, %v7302_v9 }
 0x1ee   : > { %v2886_v52 = vadd.f32 %v2864_v42, %v8585_v44  ;;  %v5248_v54 = vpop.eup %5247  ;;  %v2893_v26 = vadd.f32 %v2885_v35, %v2877_v30  ;;  %v2866_v48 = vmul.f32 0.6931472, %v5246_v23  ;;  %5253 = vpow2.f32 %v3031_v63 }
 0x1ef   : > { %v2868_v14 = vmul.f32 0.6931472, %v5248_v54  ;;  %v8586_v16 = vmax.f32 %v7122_v53, 0.0  ;;  %v8587_v5 = vmax.f32 %v7173_v1, 0.0  ;;  %5255 = vpow2.f32 %v3047_v39  ;;  %4880 = vmatmul.msk.f32.gmra.mxu0 %vm458_vm0, %v7046_v12  ;;  %v7362_v39 = vpop.f32.mrf.mxu0 }
 0x1f0   : > { %v2900_v3 = vadd.f32 %v2886_v52, %v2878_v45  ;;  %v3035_v28 = vmul.f32 1.442695, %v3016_v11  ;;  %v2894_v59 = vrot.slane %v2893_v26, 4  ;;  %5257 = vpow2.f32 %v3033_v21  ;;  %4887 = vmatmul.msk.f32.gmra.mxu1 %vm458_vm0, %v7046_v12  ;;  %4894 = vmatmul.msk.f32.gmra.mxu2 %vm458_vm0, %v7046_v12 }
 0x1f1   : > { %v2880_v32 = vadd.f32 %v2852_v34, %v8586_v16  ;;  %v2887_v7 = vadd.f32 %v2866_v48, %v8587_v5  ;;  %v2888_v18 = vadd.f32 %v2868_v14, %v2760_v0  ;;  %v3051_v30 = vmul.f32 1.442695, %v3024_v31  ;;  %4901 = vmatmul.msk.f32.gmra.mxu3 %vm458_vm0, %v7046_v12 }
 0x1f2   : > { %v2199_v45 = vadd.f32 %v7245_v25, %v6995_v47  ;;  %v2200_v62 = vadd.f32 %v7267_v27, %v7020_v19  ;;  %5259 = vpow2.f32 %v3049_v56  ;;  %v5250_v1 = vpop.eup %5249  ;;  %v2253_v0 = vrot.slane %v7231_v61, 2 }
 0x1f3   : > { %v7332_v53 = vadd.f32 %v2887_v7, %v2879_v37  ;;  %v2687_v34 = vrot.slane %v7196_v4, 2  ;;  %v7340_v29 = vadd.f32 %v2888_v18, %v2880_v32  ;;  %5261 = vpow2.f32 %v3035_v28  ;;  %v5252_v47 = vpop.eup %5251  ;;  %v7376_v28 = vpop.f32.mrf.mxu1 }
 0x1f4   : > { %v7346_v19 = vsub.f32 %v6949_v6, %v7243_v57  ;;  %v2901_v25 = vrot.slane %v2900_v3, 4  ;;  %5263 = vpow2.f32 %v3051_v30  ;;  %v8589_v27 = vrot.slane %v7182_v17, 2  ;;  %v5254_v46 = vpop.eup %5253 }
 0x1f5   : > { %v8590_v55 = vrot.slane %v7167_v36, 1  ;;  %v2694_v42 = vrot.slane %v7225_v38, 2  ;;  %v3061_v8 = vadd.f32 %v5252_v47, %v5250_v1  ;;  %v2895_v12 = vadd.f32 %v2894_v59, %v2893_v26  ;;  %v5256_v15 = vpop.eup %5255  ;;  %v7381_v47 = vpop.f32.mrf.mxu2 }
 0x1f6   : > { %8588 = vst [vmem:[#allocation65_spill] sm:$0xff] %v7346_v19  ;;  %v2681_v37 = vadd.f32 %v8589_v27, %v7182_v17  ;;  %v7356_v22 = vsub.f32 %v6974_v41, %v2199_v45  ;;  %v7359_v6 = vsub.f32 %v6978_v49, %v2200_v62  ;;  %v2701_v57 = vrot.slane %v7235_v13, 2  ;;  %v5258_v17 = vpop.eup %5257 }
 0x1f7   : > { %v2240_v24 = vadd.f32 %v8590_v55, %v7180_v60  ;;  %v3062_v35 = vrot.slane %v3061_v8, 4  ;;  %v3068_v63 = vadd.f32 %v5256_v15, %v5254_v46  ;;  %v2896_v20 = vrot.slane %v2895_v12, 2  ;;  %4881 = vmatmul.msk.f32.gmra.mxu0 %vm458_vm0, %v7085_v58 }
 0x1f8   : > { %8591 = vst [vmem:[#allocation66_spill] sm:$0xff] %v7356_v22  ;;  %v2682_v10 = vrot.slane %v2681_v37, 1  ;;  %v2688_v23 = vadd.f32 %v2687_v34, %v7196_v4  ;;  %v5260_v44 = vpop.eup %5259  ;;  %v2269_v52 = vadd.f32 %v2253_v0, %v7178_v50  ;;  %v2254_v41 = vrot.slane %v7346_v19, 2  ;;  %4888 = vmatmul.msk.f32.gmra.mxu1 %vm458_vm0, %v7085_v58  ;;  %4895 = vmatmul.msk.f32.gmra.mxu2 %vm458_vm0, %v7085_v58 }
 0x1f9   : > { %8592 = vst [vmem:[#allocation67_spill] sm:$0xff] %v7359_v6  ;;  %v2902_v11 = vadd.f32 %v2901_v25, %v2900_v3  ;;  %v5262_v49 = vpop.eup %5261  ;;  %v3063_v54 = vadd.f32 %v3062_v35, %v3061_v8  ;;  %v3069_v26 = vrot.slane %v3068_v63, 4  ;;  %v3075_v48 = vadd.f32 %v5260_v44, %v5258_v17  ;;  %4902 = vmatmul.msk.f32.gmra.mxu3 %vm458_vm0, %v7085_v58  ;;  %v8593_v17 = vld [vmem:[#allocation62_spill] sm:$0xff] }
 0x1fa   : > { %v2683_v21 = vadd.f32 %v2682_v10, %v2681_v37  ;;  %v2897_v56 = vadd.f32 %v2896_v20, %v2895_v12  ;;  %v5264_v14 = vpop.eup %5263  ;;  %v2255_v31 = vrot.slane %v7356_v22, 2  ;;  %v2689_v16 = vrot.slane %v2688_v23, 1  ;;  %v8595_v20 = vld [vmem:[#allocation51_spill] sm:$0xff] }
 0x1fb   : > { %v2903_v32 = vrot.slane %v2902_v11, 2  ;;  %v2256_v50 = vrot.slane %v7359_v6, 2  ;;  %v3070_v3 = vadd.f32 %v3069_v26, %v3068_v63  ;;  %v3082_v5 = vadd.f32 %v5264_v14, %v5262_v49  ;;  %v8594_v63 = vld [vmem:[#allocation50_spill] sm:$0xff] }
 0x1fc   : > { %v2733_v4 = vadd.f32 %v2683_v21, %v7362_v39  ;;  %v2898_v7 = vrot.slane %v2897_v56, 1  ;;  %v3064_v18 = vrot.slane %v3063_v54, 2  ;;  %v2690_v30 = vadd.f32 %v2689_v16, %v2688_v23  ;;  %v8597_v26 = vld [vmem:[#allocation58_spill] sm:$0xff] }
 0x1fd   : > { %v2904_v45 = vadd.f32 %v2903_v32, %v2902_v11  ;;  %v2908_v62 = vrot.slane %v7332_v53, 4  ;;  %v3076_v1 = vrot.slane %v3075_v48, 4  ;;  %v3071_v34 = vrot.slane %v3070_v3, 2  ;;  %v8596_v11 = vld [vmem:[#allocation52_spill] sm:$0xff]  ;;  %v7410_v32 = vpop.f32.mrf.mxu0 }
 0x1fe   : > { %v2741_v59 = vmul.f32 -0.5, %v2733_v4  ;;  %v2899_v0 = vadd.f32 %v2898_v7, %v2897_v56  ;;  %v3065_v25 = vadd.f32 %v3064_v18, %v3063_v54  ;;  %v2734_v37 = vadd.f32 %v2690_v30, %v7376_v28  ;;  %v7397_v54 = vpop.f32.mrf.mxu3 }
 0x1ff   : > { %v2905_v46 = vrot.slane %v2904_v45, 1  ;;  %v3072_v55 = vadd.f32 %v3071_v34, %v3070_v3  ;;  %v2270_v8 = vadd.f32 %v2254_v41, %v7188_v43  ;;  %v2272_v12 = vadd.f32 %v2256_v50, %v2240_v24  ;;  %4882 = vmatmul.msk.f32.gmra.mxu0 %vm458_vm0, %v8597_v26 }
 0x200   : > { %v7384_v27 = vadd.f32 %v2741_v59, %v6883_v40  ;;  %v7388_v58 = vsub.f32 %v7362_v39, %v2899_v0  ;;  %v3066_v15 = vrot.slane %v3065_v25, 1  ;;  %v2271_v35 = vadd.f32 %v2255_v31, %v8593_v17  ;;  %4889 = vmatmul.msk.f32.gmra.mxu1 %vm458_vm0, %v8597_v26  ;;  %v8598_v31 = vld [vmem:[#allocation38_spill] sm:$0xff]  ;;  %4896 = vmatmul.msk.f32.gmra.mxu2 %vm458_vm0, %v8597_v26  ;;  %v7423_v0 = vpop.f32.mrf.mxu1 }
 0x201   : > { %v2906_v10 = vadd.f32 %v2905_v46, %v2904_v45  ;;  %v2285_v23 = vadd.f32 %v8595_v20, %v8594_v63  ;;  %v3077_v44 = vadd.f32 %v3076_v1, %v3075_v48  ;;  %v3073_v21 = vrot.slane %v3072_v55, 1  ;;  %4903 = vmatmul.msk.f32.gmra.mxu3 %vm458_vm0, %v8597_v26  ;;  %v8599_v63 = vld [vmem:[#allocation63_spill] sm:$0xff] }
 0x202   : > { %v3157_v40 = vrot.slane %v7388_v58, 1  ;;  %v2286_v49 = vsel %vm1344_vm2, %v8596_v11, 0.0  ;;  %v3083_v43 = vrot.slane %v3082_v5, 4  ;;  %v3067_v24 = vadd.f32 %v3066_v15, %v3065_v25 }
 0x203   : > { %v7402_v41 = vsub.f32 %v7376_v28, %v2906_v10  ;;  %v2287_v56 = vadd.f32 %v2286_v49, %v2285_v23  ;;  %v3074_v14 = vadd.f32 %v3073_v21, %v3072_v55  ;;  %v2280_v4 = vmul.f32 %v8598_v31, %v2272_v12  ;;  %v7430_v55 = vpop.f32.mrf.mxu2 }
 0x204   : > { %v7406_v48 = vadd.f32 %v3157_v40, %v2741_v59  ;;  %v2288_v16 = vsel %vm1344_vm2, %v2269_v52, 0.0  ;;  %5265 = vlog2.f32 %v3067_v24  ;;  %v7416_v50 = vmul.f32 -0.5, %v2734_v37 }
 0x205   : > { %v3158_v3 = vrot.slane %v7402_v41, 1  ;;  %v2289_v7 = vadd.f32 %v2288_v16, %v2287_v56  ;;  %v2915_v59 = vrot.slane %v7340_v29, 4  ;;  %5267 = vlog2.f32 %v3074_v14 }
 0x206   : > { %v2290_v18 = vsel %vm1344_vm2, %v2270_v8, 0.0  ;;  %v2292_v52 = vsel %vm1344_vm2, %v2271_v35, 0.0  ;;  %v3084_v30 = vadd.f32 %v3083_v43, %v3082_v5  ;;  %v2294_v34 = vsel %vm1344_vm2, %v2280_v4, 0.0  ;;  %v7436_v35 = vpop.f32.mrf.mxu3 }
 0x207   : > { %v3174_v45 = vadd.f32 %v3158_v3, %v7416_v50  ;;  %v2291_v1 = vadd.f32 %v2290_v18, %v2289_v7  ;;  %v2695_v25 = vadd.f32 %v2694_v42, %v7225_v38  ;;  %v2909_v37 = vadd.f32 %v2908_v62, %v7332_v53  ;;  %4883 = vmatmul.msk.f32.gmra.mxu0 %vm458_vm0, %v8599_v63 }
 0x208   : > { %v3078_v46 = vrot.slane %v3077_v44, 2  ;;  %v2702_v5 = vadd.f32 %v2701_v57, %v7235_v13  ;;  %v2916_v17 = vadd.f32 %v2915_v59, %v7340_v29  ;;  %v3085_v62 = vrot.slane %v3084_v30, 2  ;;  %4890 = vmatmul.msk.f32.gmra.mxu1 %vm458_vm0, %v8599_v63  ;;  %4897 = vmatmul.msk.f32.gmra.mxu2 %vm458_vm0, %v8599_v63 }
 0x209   : > { %v2293_v8 = vadd.f32 %v2292_v52, %v2291_v1  ;;  %v2696_v12 = vrot.slane %v2695_v25, 1  ;;  %v2910_v15 = vrot.slane %v2909_v37, 2  ;;  %4904 = vmatmul.msk.f32.gmra.mxu3 %vm458_vm0, %v8599_v63 }
 0x20a   : > { %v3079_v10 = vadd.f32 %v3078_v46, %v3077_v44  ;;  %v5266_v38 = vpop.eup %5265  ;;  %v2703_v42 = vrot.slane %v2702_v5, 1  ;;  %v2529_v44 = vpop.f32.mrf.mxu0  ;;  %v2917_v11 = vrot.slane %v2916_v17, 2  ;;  %v3086_v49 = vadd.f32 %v3085_v62, %v3084_v30 }
 0x20b   : > { %v2295_v53 = vadd.f32 %v2294_v34, %v2293_v8  ;;  %v5268_v20 = vpop.eup %5267  ;;  %v3118_v23 = vmul.f32 0.6931472, %v5266_v38  ;;  %v2697_v13 = vadd.f32 %v2696_v12, %v2695_v25  ;;  %v2911_v57 = vadd.f32 %v2910_v15, %v2909_v37  ;;  %v2567_v30 = vpop.f32.mrf.mxu1 }
 0x20c   : > { %v3080_v40 = vrot.slane %v3079_v10, 1  ;;  %v3120_v29 = vmul.f32 0.6931472, %v5268_v20  ;;  %v2704_v21 = vadd.f32 %v2703_v42, %v2702_v5  ;;  %v2918_v16 = vadd.f32 %v2917_v11, %v2916_v17 }
 0x20d   : > { %2296 = vadd.xlane.f32.xlu2 %v2295_v53  ;;  %v3133_v26 = vadd.f32 %v3118_v23, %v7284_v51  ;;  %v2735_v43 = vadd.f32 %v2697_v13, %v7381_v47  ;;  %v2912_v24 = vrot.slane %v2911_v57, 1  ;;  %v3087_v3 = vrot.slane %v3086_v49, 1 }
 0x20e   : > { %v3081_v56 = vadd.f32 %v3080_v40, %v3079_v10  ;;  %v3134_v14 = vadd.f32 %v3120_v29, %v7288_v2  ;;  %v2736_v4 = vadd.f32 %v2704_v21, %v7397_v54  ;;  %v2919_v52 = vrot.slane %v2918_v16, 1  ;;  %v2605_v2 = vpop.f32.mrf.mxu2 }
 0x20f   : > { %v7451_v7 = vsub.f32 %v7362_v39, %v3133_v26  ;;  %v2913_v59 = vadd.f32 %v2912_v24, %v2911_v57  ;;  %v3088_v51 = vadd.f32 %v3087_v3, %v3086_v49  ;;  %v2643_v39 = vpop.f32.mrf.mxu3  ;;  %v7462_v8 = vmul.f32 -0.5, %v2735_v43 }
 0x210   : > { %5269 = vlog2.f32 %v3081_v56  ;;  %v7454_v18 = vsub.f32 %v7376_v28, %v3134_v14  ;;  %v2920_v37 = vadd.f32 %v2919_v52, %v2918_v16  ;;  %v7465_v12 = vmul.f32 -0.5, %v2736_v4 }
 0x211   : > { %8600 = vst [vmem:[#allocation62_spill] sm:$0xff] %v7451_v7  ;;  %v3189_v1 = vrot.slane %v7451_v7, 2  ;;  %v7458_v34 = vsub.f32 %v7381_v47, %v2913_v59  ;;  %5271 = vlog2.f32 %v3088_v51  ;;  %v2666_v53 = vmul.f32 %v7423_v0, %v7423_v0 }
 0x212   : > { %8601 = vst [vmem:[#allocation50_spill] sm:$0xff] %v7454_v18  ;;  %v3190_v25 = vrot.slane %v7454_v18, 2  ;;  %v7468_v15 = vsub.f32 %v7397_v54, %v2920_v37  ;;  %v7470_v10 = vpop.f32.mrf.mxu0  ;;  %v2667_v20 = vmul.f32 %v7430_v55, %v7430_v55  ;;  %v2673_v13 = vmul.f32 %v2529_v44, %v2529_v44 }
 0x213   : > { %8602 = vst [vmem:[#allocation51_spill] sm:$0xff] %v7458_v34  ;;  %v3205_v46 = vadd.f32 %v3189_v1, %v7406_v48  ;;  %v3159_v28 = vrot.slane %v7458_v34, 1  ;;  %v2665_v48 = vmul.f32 %v7410_v32, %v7410_v32  ;;  %v2674_v57 = vmul.f32 %v2567_v30, %v2567_v30  ;;  %v7494_v14 = vpop.f32.mrf.mxu1 }
 0x214   : > { %8603 = vst [vmem:[#allocation52_spill] sm:$0xff] %v7462_v8  ;;  %v3206_v5 = vadd.f32 %v3190_v25, %v3174_v45  ;;  %v3160_v62 = vrot.slane %v7468_v15, 1  ;;  %v2675_v40 = vmul.f32 %v2605_v2, %v2605_v2  ;;  %v2668_v0 = vmul.f32 %v7436_v35, %v7436_v35 }
 0x215   : > { %8604 = vst [vmem:[#allocation58_spill] sm:$0xff] %v7465_v12  ;;  %v3221_v63 = vsel %vm1344_vm2, %v3205_v46, 0.0  ;;  %v3175_v38 = vadd.f32 %v3159_v28, %v7462_v8  ;;  %v2676_v11 = vmul.f32 %v2643_v39, %v2643_v39  ;;  %v2705_v26 = vadd.f32 %v2673_v13, %v2665_v48 }
 0x216   : > { %8605 = vst [vmem:[#allocation38_spill] sm:$0xff] %v7468_v15  ;;  %v5270_v17 = vpop.eup %5269  ;;  %v3222_v45 = vsel %vm1344_vm2, %v3206_v5, 0.0  ;;  %v3176_v32 = vadd.f32 %v3160_v62, %v7465_v12  ;;  %v2712_v43 = vadd.f32 %v2674_v57, %v2666_v53  ;;  %v7486_v24 = vadd.f32 %v2675_v40, %v2667_v20  ;;  %v7497_v4 = vpop.f32.mrf.mxu2 }
 0x217   : > { %v3122_v42 = vmul.f32 0.6931472, %v5270_v17  ;;  %v3223_v23 = vadd.f32 %v3222_v45, %v3221_v63  ;;  %v5272_v29 = vpop.eup %5271  ;;  %v7491_v44 = vadd.f32 %v2676_v11, %v2668_v0  ;;  %v2769_v56 = vand.u32 2147483647, %v7470_v10  ;;  %v7500_v3 = vpop.f32.mrf.mxu3 }
 0x218   : > { %v3124_v49 = vmul.f32 0.6931472, %v5272_v29  ;;  %v2770_v51 = vand.u32 2147483647, %v7494_v14  ;;  %v2771_v39 = vand.u32 2147483647, %v7497_v4 }
 0x219   : > { %v3135_v21 = vadd.f32 %v3122_v42, %v7294_v33  ;;  %v2785_v16 = vsub.f32 0.0, %v2769_v56  ;;  %v2706_v0 = vrot.slane %v2705_v26, 4 }
 0x21a   : > { %v3136_v33 = vadd.f32 %v3124_v49, %v7302_v9  ;;  %v7506_v30 = vpop.f32.mrf.mxu0  ;;  %v2786_v37 = vsub.f32 0.0, %v2770_v51  ;;  %v2787_v17 = vsub.f32 0.0, %v2771_v39  ;;  %v2713_v49 = vrot.slane %v2712_v43, 4 }
 0x21b   : > { %v7489_v55 = vsub.f32 %v7381_v47, %v3135_v21  ;;  %v2805_v52 = vmul.f32 1.442695, %v2785_v16  ;;  %v2777_v28 = vand.u32 2147483647, %v7506_v30  ;;  %v7517_v5 = vpop.f32.mrf.mxu1  ;;  %v2720_v16 = vrot.slane %v7486_v24, 4 }
 0x21c   : > { %v7503_v59 = vsub.f32 %v7397_v54, %v3136_v33  ;;  %v2772_v54 = vand.u32 2147483647, %v7500_v3  ;;  %v2807_v46 = vmul.f32 1.442695, %v2786_v37  ;;  %v2714_v37 = vadd.f32 %v2713_v49, %v2712_v43 }
 0x21d   : > { %8606 = vst [vmem:[#allocation63_spill] sm:$0xff] %v7489_v55  ;;  %v3191_v35 = vrot.slane %v7489_v55, 2  ;;  %5273 = vpow2.f32 %v2805_v52  ;;  %v2793_v45 = vsub.f32 0.0, %v2777_v28  ;;  %v7536_v28 = vadd.f32 %v2720_v16, %v7486_v24 }
 0x21e   : > { %8607 = vst [vmem:[#allocation68_spill] sm:$0xff] %v7503_v59  ;;  %v3192_v1 = vrot.slane %v7503_v59, 2  ;;  %v2788_v63 = vsub.f32 0.0, %v2772_v54  ;;  %v7520_v48 = vpop.f32.mrf.mxu2  ;;  %5275 = vpow2.f32 %v2807_v46  ;;  %v2754_v24 = vmax.f32 %v7494_v14, 0.0 }
 0x21f   : > { %v3207_v47 = vadd.f32 %v3191_v35, %v3175_v38  ;;  %v2778_v38 = vand.u32 2147483647, %v7517_v5  ;;  %v2779_v42 = vand.u32 2147483647, %v7520_v48  ;;  %v7523_v62 = vpop.f32.mrf.mxu3  ;;  %v2821_v40 = vmul.f32 1.442695, %v2793_v45 }
 0x220   : > { %v7512_v25 = vadd.f32 %v3192_v1, %v3176_v32  ;;  %v2811_v13 = vmul.f32 1.442695, %v2788_v63  ;;  %v2780_v21 = vand.u32 2147483647, %v7523_v62 }
 0x221   : > { %v3224_v9 = vsel %vm1344_vm2, %v3207_v47, 0.0  ;;  %v2794_v57 = vsub.f32 0.0, %v2778_v38  ;;  %v2795_v29 = vsub.f32 0.0, %v2779_v42  ;;  %v2715_v42 = vrot.slane %v2714_v37, 2 }
 0x222   : > { %v7510_v2 = vadd.f32 %v3224_v9, %v3223_v23  ;;  %v2809_v23 = vmul.f32 1.442695, %v2787_v17  ;;  %v7526_v32 = vpop.f32.mrf.mxu0  ;;  %v2796_v33 = vsub.f32 0.0, %v2780_v21  ;;  %v2707_v9 = vadd.f32 %v2706_v0, %v2705_v26 }
 0x223   : > { %v5274_v53 = vpop.eup %5273  ;;  %v2823_v11 = vmul.f32 1.442695, %v2794_v57  ;;  %v2825_v56 = vmul.f32 1.442695, %v2795_v29  ;;  %v7529_v52 = vpop.f32.mrf.mxu1  ;;  %v2727_v17 = vrot.slane %v7491_v44, 4 }
 0x224   : > { %v2833_v20 = vadd.f32 1.0, %v5274_v53  ;;  %v5276_v35 = vpop.eup %5275  ;;  %v2827_v47 = vmul.f32 1.442695, %v2796_v33  ;;  %v2708_v45 = vrot.slane %v2707_v9, 2 }
 0x225   : > { %v2834_v51 = vadd.f32 1.0, %v5276_v35  ;;  %v7547_v0 = vadd.f32 %v2727_v17, %v7491_v44 }
 0x226   : > { %5277 = vlog2.f32 %v2833_v20  ;;  %v7531_v1 = vpop.f32.mrf.mxu2  ;;  %v2753_v20 = vmax.f32 %v7470_v10, 0.0 }
 0x227   : > { %5279 = vpow2.f32 %v2809_v23  ;;  %v7533_v39 = vpop.f32.mrf.mxu3 }
 0x228   : > { %5281 = vpow2.f32 %v2811_v13 }
 0x229   : > { %5283 = vpow2.f32 %v2821_v40 }
 0x22a   : > { %5285 = vpow2.f32 %v2823_v11  ;;  %v7539_v63 = vpop.f32.mrf.mxu0 }
 0x22b   : > { %5287 = vpow2.f32 %v2825_v56  ;;  %v2985_v26 = vmax.f32 %v7526_v32, %v7539_v63  ;;  %v7549_v49 = vpop.f32.mrf.mxu1 }
 0x22c   : > { %v5278_v54 = vpop.eup %5277  ;;  %5289 = vlog2.f32 %v2834_v51  ;;  %v2992_v14 = vmax.f32 %v7529_v52, %v7549_v49  ;;  %v7557_v51 = vadd.f32 %v2715_v42, %v2714_v37  ;;  %v2755_v37 = vmax.f32 %v7497_v4, 0.0 }
 0x22d   : > { %v5280_v46 = vpop.eup %5279  ;;  %5291 = vpow2.f32 %v2827_v47  ;;  %v2986_v40 = vrot.slane %v2985_v26, 4  ;;  %v7555_v47 = vadd.f32 %v2708_v45, %v2707_v9 }
 0x22e   : > { %v5282_v38 = vpop.eup %5281  ;;  %v2835_v53 = vadd.f32 1.0, %v5280_v46  ;;  %v7553_v35 = vpop.f32.mrf.mxu2 }
 0x22f   : > { %v5284_v43 = vpop.eup %5283  ;;  %v2836_v23 = vadd.f32 1.0, %v5282_v38  ;;  %v2987_v33 = vmax.f32 %v2985_v26, %v2986_v40  ;;  %v2999_v44 = vmax.f32 %v7531_v1, %v7553_v35  ;;  %v7561_v46 = vpop.f32.mrf.mxu3  ;;  %v2854_v26 = vmul.f32 0.6931472, %v5278_v54 }
 0x230   : > { %v5286_v13 = vpop.eup %5285  ;;  %5293 = vlog2.f32 %v2835_v53  ;;  %v2841_v57 = vadd.f32 1.0, %v5284_v43  ;;  %v2993_v53 = vrot.slane %v2992_v14, 4  ;;  %v2761_v40 = vmax.f32 %v7506_v30, 0.0 }
 0x231   : > { %v5288_v29 = vpop.eup %5287  ;;  %5295 = vlog2.f32 %v2836_v23  ;;  %v2842_v11 = vadd.f32 1.0, %v5286_v13  ;;  %v2988_v38 = vrot.slane %v2987_v33, 2  ;;  %v3000_v23 = vrot.slane %v2999_v44, 4 }
 0x232   : > { %v5290_v56 = vpop.eup %5289  ;;  %5297 = vlog2.f32 %v2841_v57  ;;  %v2843_v10 = vadd.f32 1.0, %v5288_v29  ;;  %v3006_v13 = vmax.f32 %v7533_v39, %v7561_v46  ;;  %v2994_v42 = vmax.f32 %v2992_v14, %v2993_v53 }
 0x233   : > { %v5292_v16 = vpop.eup %5291  ;;  %5299 = vlog2.f32 %v2842_v11  ;;  %v2856_v43 = vmul.f32 0.6931472, %v5290_v56  ;;  %v2989_v45 = vmax.f32 %v2987_v33, %v2988_v38  ;;  %v2762_v29 = vmax.f32 %v7517_v5, 0.0 }
 0x234   : > { %5301 = vlog2.f32 %v2843_v10  ;;  %v2844_v17 = vadd.f32 1.0, %v5292_v16  ;;  %v3001_v11 = vmax.f32 %v2999_v44, %v3000_v23  ;;  %v3007_v10 = vrot.slane %v3006_v13, 4 }
 0x235   : > { %v2763_v54 = vmax.f32 %v7520_v48, 0.0  ;;  %v2764_v56 = vmax.f32 %v7523_v62, 0.0  ;;  %v2990_v21 = vrot.slane %v2989_v45, 1  ;;  %v2995_v22 = vrot.slane %v2994_v42, 2 }
 0x236   : > { %v5294_v9 = vpop.eup %5293  ;;  %5303 = vlog2.f32 %v2844_v17  ;;  %v2881_v61 = vadd.f32 %v2854_v26, %v2753_v20  ;;  %v2882_v4 = vadd.f32 %v2856_v43, %v2754_v24  ;;  %v3002_v33 = vrot.slane %v3001_v11, 2 }
 0x237   : > { %v5296_v57 = vpop.eup %5295  ;;  %v2858_v38 = vmul.f32 0.6931472, %v5294_v9  ;;  %v7570_v30 = vmax.f32 %v2989_v45, %v2990_v21  ;;  %v2996_v5 = vmax.f32 %v2994_v42, %v2995_v22  ;;  %v3008_v36 = vmax.f32 %v3006_v13, %v3007_v10 }
 0x238   : > { %v5298_v16 = vpop.eup %5297  ;;  %v3003_v6 = vmax.f32 %v3001_v11, %v3002_v33  ;;  %v2860_v26 = vmul.f32 0.6931472, %v5296_v57 }
 0x239   : > { %v5300_v19 = vpop.eup %5299  ;;  %v2870_v17 = vmul.f32 0.6931472, %v5298_v16  ;;  %v3017_v62 = vsub.f32 %v7526_v32, %v7570_v30  ;;  %v3025_v20 = vsub.f32 %v7539_v63, %v7570_v30  ;;  %v2997_v24 = vrot.slane %v2996_v5, 1 }
 0x23a   : > { %v5302_v14 = vpop.eup %5301  ;;  %v2872_v53 = vmul.f32 0.6931472, %v5300_v19  ;;  %v3004_v19 = vrot.slane %v3003_v6, 1  ;;  %v2883_v63 = vadd.f32 %v2858_v38, %v2755_v37  ;;  %v2710_v37 = vrot.slane %v7555_v47, 1 }
 0x23b   : > { %v2889_v44 = vadd.f32 %v2870_v17, %v2761_v40  ;;  %v2874_v23 = vmul.f32 0.6931472, %v5302_v14  ;;  %v3037_v45 = vmul.f32 1.442695, %v3017_v62  ;;  %v3053_v22 = vmul.f32 1.442695, %v3025_v20 }
 0x23c   : > { %v5304_v48 = vpop.eup %5303  ;;  %v2890_v60 = vadd.f32 %v2872_v53, %v2762_v29  ;;  %v7576_v42 = vmax.f32 %v2996_v5, %v2997_v24  ;;  %v7578_v11 = vmax.f32 %v3003_v6, %v3004_v19  ;;  %v3009_v29 = vrot.slane %v3008_v36, 2 }
 0x23d   : > { %v2921_v43 = vadd.f32 %v2889_v44, %v2881_v61  ;;  %v2876_v9 = vmul.f32 0.6931472, %v5304_v48  ;;  %v2891_v13 = vadd.f32 %v2874_v23, %v2763_v54  ;;  %5305 = vpow2.f32 %v3037_v45  ;;  %v7593_v44 = vpop.f32.mrf.mxu0  ;;  %v7596_v48 = vpop.f32.mrf.mxu1 }
 0x23e   : > { %v2928_v21 = vadd.f32 %v2890_v60, %v2882_v4  ;;  %v3018_v32 = vsub.f32 %v7529_v52, %v7576_v42  ;;  %v3026_v61 = vsub.f32 %v7549_v49, %v7576_v42  ;;  %v2756_v60 = vmax.f32 %v7500_v3, 0.0 }
 0x23f   : > { %v2922_v40 = vrot.slane %v2921_v43, 4  ;;  %v2892_v57 = vadd.f32 %v2876_v9, %v2764_v56  ;;  %5307 = vpow2.f32 %v3053_v22  ;;  %v3019_v6 = vsub.f32 %v7531_v1, %v7578_v11 }
 0x240   : > { %v2929_v10 = vrot.slane %v2928_v21, 4  ;;  %v3039_v4 = vmul.f32 1.442695, %v3018_v32  ;;  %v3055_v17 = vmul.f32 1.442695, %v3026_v61  ;;  %v2884_v54 = vadd.f32 %v2860_v26, %v2756_v60 }
 0x241   : > { %v2923_v16 = vadd.f32 %v2922_v40, %v2921_v43  ;;  %v3027_v14 = vsub.f32 %v7553_v35, %v7578_v11  ;;  %v3010_v52 = vmax.f32 %v3008_v36, %v3009_v29  ;;  %v2935_v53 = vadd.f32 %v2891_v13, %v2883_v63  ;;  %v7607_v40 = vpop.f32.mrf.mxu2  ;;  %v7609_v13 = vpop.f32.mrf.mxu3 }
 0x242   : > { %v2930_v33 = vadd.f32 %v2929_v10, %v2928_v21  ;;  %5309 = vpow2.f32 %v3039_v4  ;;  %v3041_v49 = vmul.f32 1.442695, %v3019_v6  ;;  %v8608_v3 = vrot.slane %v7536_v28, 2 }
 0x243   : > { %5311 = vpow2.f32 %v3055_v17  ;;  %v3057_v38 = vmul.f32 1.442695, %v3027_v14  ;;  %v3011_v5 = vrot.slane %v3010_v52, 1  ;;  %v5306_v1 = vpop.eup %5305  ;;  %v2942_v23 = vadd.f32 %v2892_v57, %v2884_v54 }
 0x244   : > { %v2723_v56 = vadd.f32 %v8608_v3, %v7536_v28  ;;  %5313 = vpow2.f32 %v3041_v49  ;;  %v2711_v35 = vadd.f32 %v2710_v37, %v7555_v47  ;;  %v2924_v36 = vrot.slane %v2923_v16, 2 }
 0x245   : > { %v5308_v62 = vpop.eup %5307  ;;  %5315 = vpow2.f32 %v3057_v38  ;;  %v7598_v20 = vmax.f32 %v3010_v52, %v3011_v5  ;;  %v2717_v24 = vrot.slane %v7557_v51, 1  ;;  %v2931_v28 = vrot.slane %v2930_v33, 2 }
 0x246   : > { %v2936_v26 = vrot.slane %v2935_v53, 4  ;;  %v3089_v43 = vadd.f32 %v5308_v62, %v5306_v1  ;;  %v2737_v9 = vadd.f32 %v2711_v35, %v7593_v44  ;;  %v2925_v19 = vadd.f32 %v2924_v36, %v2923_v16 }
 0x247   : > { %v3020_v21 = vsub.f32 %v7533_v39, %v7598_v20  ;;  %v3028_v47 = vsub.f32 %v7561_v46, %v7598_v20  ;;  %v2718_v45 = vadd.f32 %v2717_v24, %v7557_v51  ;;  %v2932_v22 = vadd.f32 %v2931_v28, %v2930_v33  ;;  %v3314_v28 = vpop.f32.mrf.mxu0 }
 0x248   : > { %v5310_v29 = vpop.eup %5309  ;;  %v2729_v10 = vrot.slane %v7547_v0, 2  ;;  %v2943_v32 = vrot.slane %v2942_v23, 4  ;;  %v3090_v61 = vrot.slane %v3089_v43, 4  ;;  %v2926_v63 = vrot.slane %v2925_v19, 1 }
 0x249   : > { %v5312_v60 = vpop.eup %5311  ;;  %v3043_v57 = vmul.f32 1.442695, %v3020_v21  ;;  %v3059_v16 = vmul.f32 1.442695, %v3028_v47  ;;  %v2738_v39 = vadd.f32 %v2718_v45, %v7596_v48  ;;  %v2933_v4 = vrot.slane %v2932_v22, 1 }
 0x24a   : > { %v5314_v46 = vpop.eup %5313  ;;  %v3091_v17 = vadd.f32 %v3090_v61, %v3089_v43  ;;  %v3096_v51 = vadd.f32 %v5312_v60, %v5310_v29  ;;  %v2927_v6 = vadd.f32 %v2926_v63, %v2925_v19  ;;  %v2937_v33 = vadd.f32 %v2936_v26, %v2935_v53  ;;  %v3352_v26 = vpop.f32.mrf.mxu1 }
 0x24b   : > { %v5316_v54 = vpop.eup %5315  ;;  %5317 = vpow2.f32 %v3043_v57  ;;  %v2934_v14 = vadd.f32 %v2933_v4, %v2932_v22  ;;  %v2724_v52 = vrot.slane %v2723_v56, 1  ;;  %v2730_v38 = vadd.f32 %v2729_v10, %v7547_v0  ;;  %v3390_v0 = vpop.f32.mrf.mxu2 }
 0x24c   : > { %v3097_v49 = vrot.slane %v3096_v51, 4  ;;  %v3103_v37 = vadd.f32 %v5316_v54, %v5314_v46  ;;  %5319 = vpow2.f32 %v3059_v16  ;;  %v7614_v3 = vsub.f32 %v7593_v44, %v2927_v6 }
 0x24d   : > { %v2944_v5 = vadd.f32 %v2943_v32, %v2942_v23  ;;  %v3092_v1 = vrot.slane %v3091_v17, 2  ;;  %v7618_v35 = vsub.f32 %v7596_v48, %v2934_v14  ;;  %v7620_v24 = vmul.f32 -0.5, %v2737_v9  ;;  %v3428_v23 = vpop.f32.mrf.mxu3 }
 0x24e   : > { %8609 = vst [vmem:[#allocation69_spill] sm:$0xff] %v7614_v3  ;;  %v3098_v36 = vadd.f32 %v3097_v49, %v3096_v51  ;;  %v3104_v62 = vrot.slane %v3103_v37, 4  ;;  %v3161_v53 = vrot.slane %v7614_v3, 1  ;;  %v7623_v19 = vmul.f32 -0.5, %v2738_v39 }
 0x24f   : > { %8610 = vst [vmem:[#allocation70_spill] sm:$0xff] %v7618_v35  ;;  %v3093_v43 = vadd.f32 %v3092_v1, %v3091_v17  ;;  %v3162_v21 = vrot.slane %v7618_v35, 1  ;;  %v2725_v47 = vadd.f32 %v2724_v52, %v2723_v56  ;;  %v2938_v10 = vrot.slane %v2937_v33, 2  ;;  %v3317_v1 = vpop.f32.mrf.mxu0 }
 0x250   : > { %8611 = vst [vmem:[#allocation71_spill] sm:$0xff] %v7620_v24  ;;  %v3105_v45 = vadd.f32 %v3104_v62, %v3103_v37  ;;  %v7627_v22 = vadd.f32 %v3161_v53, %v7620_v24  ;;  %v3099_v29 = vrot.slane %v3098_v36, 2  ;;  %v2731_v46 = vrot.slane %v2730_v38, 1 }
 0x251   : > { %8612 = vst [vmem:[#allocation72_spill] sm:$0xff] %v7623_v19  ;;  %v5318_v9 = vpop.eup %5317  ;;  %v3094_v32 = vrot.slane %v3093_v43, 1  ;;  %v7630_v61 = vadd.f32 %v3162_v21, %v7623_v19  ;;  %v2739_v57 = vadd.f32 %v2725_v47, %v7607_v40  ;;  %v2939_v16 = vadd.f32 %v2938_v10, %v2937_v33 }
 0x252   : > { %v5320_v63 = vpop.eup %5319  ;;  %v3100_v60 = vadd.f32 %v3099_v29, %v3098_v36  ;;  %v3106_v39 = vrot.slane %v3105_v45, 2  ;;  %v2945_v17 = vrot.slane %v2944_v5, 2  ;;  %v3355_v62 = vpop.f32.mrf.mxu1  ;;  %v2732_v21 = vadd.f32 %v2731_v46, %v2730_v38 }
 0x253   : > { %v3110_v56 = vadd.f32 %v5320_v63, %v5318_v9  ;;  %v3095_v4 = vadd.f32 %v3094_v32, %v3093_v43  ;;  %v2940_v6 = vrot.slane %v2939_v16, 1  ;;  %v7633_v36 = vmul.f32 -0.5, %v2739_v57  ;;  %v3393_v47 = vpop.f32.mrf.mxu2 }
 0x254   : > { %v3101_v51 = vrot.slane %v3100_v60, 1  ;;  %v2946_v14 = vadd.f32 %v2945_v17, %v2944_v5  ;;  %v3107_v37 = vadd.f32 %v3106_v39, %v3105_v45  ;;  %v3601_v29 = vmul.f32 %v3314_v28, %v3314_v28 }
 0x255   : > { %v3111_v54 = vrot.slane %v3110_v56, 4  ;;  %5321 = vlog2.f32 %v3095_v4  ;;  %v2941_v49 = vadd.f32 %v2940_v6, %v2939_v16  ;;  %8613 = vst [vmem:[#allocation73_spill] sm:$0xff] %v7633_v36  ;;  %v3602_v10 = vmul.f32 %v3352_v26, %v3352_v26  ;;  %v3431_v9 = vpop.f32.mrf.mxu3 }
 0x256   : > { %v3102_v52 = vadd.f32 %v3101_v51, %v3100_v60  ;;  %v2947_v33 = vrot.slane %v2946_v14, 1  ;;  %v2740_v5 = vadd.f32 %v2732_v21, %v7609_v13  ;;  %v3609_v63 = vmul.f32 %v3317_v1, %v3317_v1 }
 0x257   : > { %v3112_v53 = vadd.f32 %v3111_v54, %v3110_v56  ;;  %v7636_v43 = vsub.f32 %v7607_v40, %v2941_v49  ;;  %v3610_v45 = vmul.f32 %v3355_v62, %v3355_v62  ;;  %v3108_v60 = vrot.slane %v3107_v37, 1  ;;  %v7654_v1 = vpop.f32.mrf.mxu0 }
 0x258   : > { %5323 = vlog2.f32 %v3102_v52  ;;  %v2948_v32 = vadd.f32 %v2947_v33, %v2946_v14  ;;  %v3603_v57 = vmul.f32 %v3390_v0, %v3390_v0  ;;  %v3604_v39 = vmul.f32 %v3428_v23, %v3428_v23 }
 0x259   : > { %8614 = vst [vmem:[#allocation74_spill] sm:$0xff] %v7636_v43  ;;  %v3163_v16 = vrot.slane %v7636_v43, 1  ;;  %v3113_v4 = vrot.slane %v3112_v53, 2  ;;  %v3617_v46 = vadd.f32 %v3609_v63, %v3601_v29  ;;  %v3624_v17 = vadd.f32 %v3610_v45, %v3602_v10  ;;  %v8620_v45 = vld [vmem:[#allocation41_spill] sm:$0xff] }
 0x25a   : > { %v7641_v56 = vsub.f32 %v7609_v13, %v2948_v32  ;;  %v3611_v51 = vmul.f32 %v3393_v47, %v3393_v47  ;;  %v3612_v6 = vmul.f32 %v3431_v9, %v3431_v9  ;;  %v7646_v54 = vmul.f32 -0.5, %v2740_v5  ;;  %v7659_v47 = vpop.f32.mrf.mxu1 }
 0x25b   : > { %v5322_v38 = vpop.eup %5321  ;;  %v7644_v26 = vadd.f32 %v3163_v16, %v7633_v36  ;;  %v3109_v21 = vadd.f32 %v3108_v60, %v3107_v37  ;;  %v3114_v33 = vadd.f32 %v3113_v4, %v3112_v53  ;;  %v7664_v9 = vpop.f32.mrf.mxu2  ;;  %v8619_v53 = vld [vmem:[#allocation15_spill] sm:$0xff]  ;;  %v7754_v24 = vsel %vm1344_vm2, %v7512_v25, 0.0 }
 0x25c   : > { %8615 = vst [vmem:[#allocation75_spill] sm:$0xff] %v7641_v56  ;;  %v3126_v28 = vmul.f32 0.6931472, %v5322_v38  ;;  %v3164_v14 = vrot.slane %v7641_v56, 1  ;;  %v7650_v23 = vadd.f32 %v3611_v51, %v3603_v57  ;;  %v7652_v49 = vadd.f32 %v3612_v6, %v3604_v39  ;;  %v8622_v57 = vld [vmem:[#allocation46_spill] sm:$0xff]  ;;  %v8625_v38 = vld [vmem:[#allocation43_spill] sm:$0xff] }
 0x25d   : > { %8616 = vst [vmem:[#allocation76_spill] sm:$0xff] %v7646_v54  ;;  %v7668_v32 = vpop.f32.mrf.mxu3  ;;  %5325 = vlog2.f32 %v3109_v21  ;;  %v3115_v37 = vrot.slane %v3114_v33, 1  ;;  %v2312_v60 = vadd.f32 %v8620_v45, %v8619_v53  ;;  %v8627_v51 = vld [vmem:[#allocation42_spill] sm:$0xff]  ;;  %v3706_v21 = vand.u32 2147483647, %v7659_v47 }
 0x25e   : > { %v5324_v52 = vpop.eup %5323  ;;  %v3137_v0 = vadd.f32 %v3126_v28, %v7570_v30  ;;  %v7657_v29 = vadd.f32 %v3164_v14, %v7646_v54  ;;  %v8626_v28 = vld [vmem:[#allocation16_spill] sm:$0xff]  ;;  %v8628_v14 = vld [vmem:[#allocation22_spill] sm:$0xff]  ;;  %v3689_v25 = vmax.f32 %v7654_v1, 0.0 }
 0x25f   : > { %v3128_v62 = vmul.f32 0.6931472, %v5324_v52  ;;  %v2313_v6 = vadd.f32 %v8627_v51, %v8626_v28  ;;  %v8629_v52 = vld [vmem:[#allocation47_spill] sm:$0xff]  ;;  %v3722_v28 = vsub.f32 0.0, %v3706_v21 }
 0x260   : > { %v7662_v10 = vsub.f32 %v7593_v44, %v3137_v0  ;;  %v8621_v44 = vld [vmem:[#allocation21_spill] sm:$0xff]  ;;  %v7689_v0 = vadd.f32 %v8629_v52, %v8628_v14  ;;  %v8631_v14 = vld [vmem:[#allocation19_spill] sm:$0xff]  ;;  %v8632_v52 = vld [vmem:[#allocation44_spill] sm:$0xff] }
 0x261   : > { %v3138_v30 = vadd.f32 %v3128_v62, %v7576_v42  ;;  %v7680_v39 = vadd.f32 %v8622_v57, %v8621_v44  ;;  %v8624_v42 = vld [vmem:[#allocation14_spill] sm:$0xff]  ;;  %v3618_v62 = vrot.slane %v3617_v46, 4  ;;  %v3116_v44 = vadd.f32 %v3115_v37, %v3114_v33 }
 0x262   : > { %8617 = vst [vmem:[#allocation77_spill] sm:$0xff] %v7662_v10  ;;  %v3193_v5 = vrot.slane %v7662_v10, 2  ;;  %v2305_v4 = vadd.f32 %v8625_v38, %v8624_v42  ;;  %v7705_v57 = vadd.f32 %v7402_v41, %v2313_v6  ;;  %v3625_v42 = vrot.slane %v3624_v17, 4 }
 0x263   : > { %v7671_v63 = vsub.f32 %v7596_v48, %v3138_v30  ;;  %8623 = vst [vmem:[#allocation15_spill] sm:$0xff] %v7680_v39  ;;  %v7693_v30 = vpop.f32.mrf.mxu0  ;;  %v5326_v51 = vpop.eup %5325  ;;  %v3619_v33 = vadd.f32 %v3618_v62, %v3617_v46  ;;  %v3739_v41 = vmul.f32 1.442695, %v3722_v28  ;;  %5327 = vlog2.f32 %v3116_v44  ;;  %v8635_v28 = vld [vmem:[#allocation39_spill] sm:$0xff] }
 0x264   : > { %v7676_v16 = vadd.f32 %v3193_v5, %v7627_v22  ;;  %8630 = vst [vmem:[#allocation41_spill] sm:$0xff] %v7689_v0  ;;  %v3705_v22 = vand.u32 2147483647, %v7654_v1  ;;  %v7696_v5 = vadd.f32 %v7388_v58, %v2312_v60  ;;  %v7699_v53 = vadd.f32 %v7416_v50, %v2305_v4  ;;  %v7717_v6 = vpop.f32.mrf.mxu2 }
 0x265   : > { %8618 = vst [vmem:[#allocation78_spill] sm:$0xff] %v7671_v63  ;;  %v3194_v48 = vrot.slane %v7671_v63, 2  ;;  %v7709_v63 = vadd.f32 %v8632_v52, %v8631_v14  ;;  %v3632_v58 = vrot.slane %v7650_v23, 4  ;;  %v3707_v50 = vand.u32 2147483647, %v7664_v9  ;;  %v7720_v56 = vpop.f32.mrf.mxu3 }
 0x266   : > { %v3721_v38 = vsub.f32 0.0, %v3705_v22  ;;  %v3708_v60 = vand.u32 2147483647, %v7668_v32  ;;  %v3713_v4 = vand.u32 2147483647, %v7693_v30  ;;  %v3626_v52 = vadd.f32 %v3625_v42, %v3624_v17 }
 0x267   : > { %v7702_v45 = vadd.f32 %v3194_v48, %v7630_v61  ;;  %8633 = vst [vmem:[#allocation21_spill] sm:$0xff] %v7709_v63  ;;  %v7714_v61 = vpop.f32.mrf.mxu1  ;;  %v3723_v48 = vsub.f32 0.0, %v3707_v50  ;;  %v3130_v14 = vmul.f32 0.6931472, %v5326_v51  ;;  %v3639_v44 = vrot.slane %v7652_v49, 4 }
 0x268   : > { %v3737_v37 = vmul.f32 1.442695, %v3721_v38  ;;  %v3724_v22 = vsub.f32 0.0, %v3708_v60  ;;  %v3714_v21 = vand.u32 2147483647, %v7714_v61  ;;  %v3729_v10 = vsub.f32 0.0, %v3713_v4 }
 0x269   : > { %v3741_v54 = vmul.f32 1.442695, %v3723_v48  ;;  %v8634_v38 = vld [vmem:[#allocation17_spill] sm:$0xff]  ;;  %v3715_v60 = vand.u32 2147483647, %v7717_v6  ;;  %v3633_v51 = vadd.f32 %v3632_v58, %v7650_v23  ;;  %v8638_v4 = vld [vmem:[#allocation48_spill] sm:$0xff]  ;;  %v7744_v3 = vadd.f32 %v3639_v44, %v7652_v49 }
 0x26a   : > { %5329 = vpow2.f32 %v3737_v37  ;;  %v3743_v46 = vmul.f32 1.442695, %v3724_v22  ;;  %v3730_v62 = vsub.f32 0.0, %v3714_v21  ;;  %v7724_v43 = vadd.f32 %v8635_v28, %v8634_v38  ;;  %v5328_v38 = vpop.eup %5327  ;;  %v8640_v58 = vld [vmem:[#allocation20_spill] sm:$0xff] }
 0x26b   : > { %5331 = vpow2.f32 %v3739_v41  ;;  %v3753_v50 = vmul.f32 1.442695, %v3729_v10  ;;  %v3716_v42 = vand.u32 2147483647, %v7720_v56  ;;  %v7730_v37 = vpop.f32.mrf.mxu0  ;;  %v8637_v41 = vld [vmem:[#allocation23_spill] sm:$0xff]  ;;  %v3139_v22 = vadd.f32 %v3130_v14, %v7578_v11 }
 0x26c   : > { %8636 = vst [vmem:[#allocation46_spill] sm:$0xff] %v7724_v43  ;;  %5333 = vpow2.f32 %v3741_v54  ;;  %v3755_v17 = vmul.f32 1.442695, %v3730_v62  ;;  %v7734_v48 = vadd.f32 %v8638_v4, %v8637_v41  ;;  %v3731_v21 = vsub.f32 0.0, %v3715_v60  ;;  %v8641_v62 = vld [vmem:[#allocation45_spill] sm:$0xff]  ;;  %v7746_v11 = vpop.f32.mrf.mxu2  ;;  %v8644_v60 = vld [vmem:[#allocation40_spill] sm:$0xff] }
 0x26d   : > { %5335 = vpow2.f32 %v3743_v46  ;;  %v3620_v10 = vrot.slane %v3619_v33, 2  ;;  %v3627_v28 = vrot.slane %v3626_v52, 2  ;;  %v3732_v36 = vsub.f32 0.0, %v3716_v42  ;;  %v8643_v46 = vld [vmem:[#allocation18_spill] sm:$0xff]  ;;  %v7759_v44 = vpop.f32.mrf.mxu3 }
 0x26e   : > { %8639 = vst [vmem:[#allocation14_spill] sm:$0xff] %v7734_v48  ;;  %5337 = vpow2.f32 %v3753_v50  ;;  %v7741_v35 = vadd.f32 %v8641_v62, %v8640_v58  ;;  %v3757_v41 = vmul.f32 1.442695, %v3731_v21  ;;  %v7750_v4 = vadd.f32 %v8644_v60, %v8643_v46 }
 0x26f   : > { %v7737_v23 = vpop.f32.mrf.mxu1  ;;  %5339 = vpow2.f32 %v3755_v17  ;;  %v3634_v50 = vrot.slane %v3633_v51, 2  ;;  %v3759_v19 = vmul.f32 1.442695, %v3732_v36  ;;  %v7757_v58 = vsub.f32 %v7607_v40, %v3139_v22 }
 0x270   : > { %v5330_v54 = vpop.eup %5329  ;;  %8642 = vst [vmem:[#allocation43_spill] sm:$0xff] %v7741_v35  ;;  %5341 = vpow2.f32 %v3757_v41  ;;  %v3132_v21 = vmul.f32 0.6931472, %v5328_v38  ;;  %v7761_v62 = vadd.f32 %v3620_v10, %v3619_v33  ;;  %v7763_v46 = vadd.f32 %v3627_v28, %v3626_v52 }
 0x271   : > { %v5332_v14 = vpop.eup %5331  ;;  %8645 = vst [vmem:[#allocation16_spill] sm:$0xff] %v7750_v4  ;;  %v3769_v42 = vadd.f32 1.0, %v5330_v54  ;;  %v7767_v22 = vadd.f32 %v3634_v50, %v3633_v51  ;;  %v3690_v41 = vmax.f32 %v7659_v47, 0.0 }
 0x272   : > { %v3770_v49 = vadd.f32 1.0, %v5332_v14  ;;  %v5334_v17 = vpop.eup %5333  ;;  %v3140_v1 = vadd.f32 %v3132_v21, %v7598_v20 }
 0x273   : > { %5343 = vlog2.f32 %v3769_v42  ;;  %v5336_v54 = vpop.eup %5335  ;;  %v3771_v60 = vadd.f32 1.0, %v5334_v17  ;;  %v7770_v38 = vpop.f32.mrf.mxu0  ;;  %v3691_v42 = vmax.f32 %v7664_v9, 0.0 }
 0x274   : > { %5345 = vlog2.f32 %v3770_v49  ;;  %v5338_v40 = vpop.eup %5337  ;;  %v3772_v14 = vadd.f32 1.0, %v5336_v54  ;;  %v3897_v28 = vmax.f32 %v7730_v37, %v7770_v38  ;;  %v7782_v54 = vpop.f32.mrf.mxu2  ;;  %v7791_v59 = vsub.f32 %v7609_v13, %v3140_v1 }
 0x275   : > { %5347 = vpow2.f32 %v3759_v19  ;;  %v5340_v33 = vpop.eup %5339  ;;  %v3777_v10 = vadd.f32 1.0, %v5338_v40  ;;  %v3697_v40 = vmax.f32 %v7693_v30, 0.0  ;;  %v3911_v9 = vmax.f32 %v7746_v11, %v7782_v54  ;;  %v7788_v36 = vpop.f32.mrf.mxu3 }
 0x276   : > { %5349 = vlog2.f32 %v3771_v60  ;;  %v3778_v51 = vadd.f32 1.0, %v5340_v33  ;;  %v5342_v47 = vpop.eup %5341  ;;  %v3898_v49 = vrot.slane %v3897_v28, 4  ;;  %v3698_v33 = vmax.f32 %v7714_v61, 0.0 }
 0x277   : > { %5351 = vlog2.f32 %v3772_v14  ;;  %v7777_v50 = vpop.f32.mrf.mxu1  ;;  %v3779_v20 = vadd.f32 1.0, %v5342_v47  ;;  %v3912_v55 = vrot.slane %v3911_v9, 4  ;;  %v3918_v30 = vmax.f32 %v7759_v44, %v7788_v36 }
 0x278   : > { %5353 = vlog2.f32 %v3777_v10  ;;  %v3904_v17 = vmax.f32 %v7737_v23, %v7777_v50  ;;  %v3899_v52 = vmax.f32 %v3897_v28, %v3898_v49  ;;  %v3699_v61 = vmax.f32 %v7717_v6, 0.0 }
 0x279   : > { %v5344_v60 = vpop.eup %5343  ;;  %5355 = vlog2.f32 %v3778_v51  ;;  %v3700_v28 = vmax.f32 %v7720_v56, 0.0  ;;  %v3913_v49 = vmax.f32 %v3911_v9, %v3912_v55  ;;  %v3919_v7 = vrot.slane %v3918_v30, 4 }
 0x27a   : > { %v5346_v21 = vpop.eup %5345  ;;  %v3786_v14 = vmul.f32 0.6931472, %v5344_v60  ;;  %v3905_v10 = vrot.slane %v3904_v17, 4  ;;  %5357 = vlog2.f32 %v3779_v20  ;;  %v3900_v18 = vrot.slane %v3899_v52, 2 }
 0x27b   : > { %v5348_v19 = vpop.eup %5347  ;;  %v3788_v47 = vmul.f32 0.6931472, %v5346_v21  ;;  %v3914_v35 = vrot.slane %v3913_v49, 2  ;;  %v3920_v21 = vmax.f32 %v3918_v30, %v3919_v7 }
 0x27c   : > { %v5350_v51 = vpop.eup %5349  ;;  %v3780_v48 = vadd.f32 1.0, %v5348_v19  ;;  %v3906_v60 = vmax.f32 %v3904_v17, %v3905_v10  ;;  %v3817_v13 = vadd.f32 %v3786_v14, %v3689_v25  ;;  %v3901_v1 = vmax.f32 %v3899_v52, %v3900_v18 }
 0x27d   : > { %v5352_v0 = vpop.eup %5351  ;;  %v3790_v4 = vmul.f32 0.6931472, %v5350_v51  ;;  %v3818_v19 = vadd.f32 %v3788_v47, %v3690_v41  ;;  %v3915_v56 = vmax.f32 %v3913_v49, %v3914_v35  ;;  %v3921_v55 = vrot.slane %v3920_v21, 2 }
 0x27e   : > { %v5354_v39 = vpop.eup %5353  ;;  %5359 = vlog2.f32 %v3780_v48  ;;  %v3907_v20 = vrot.slane %v3906_v60, 2  ;;  %v3902_v17 = vrot.slane %v3901_v1, 1  ;;  %v3792_v6 = vmul.f32 0.6931472, %v5352_v0 }
 0x27f   : > { %v5356_v15 = vpop.eup %5355  ;;  %v3802_v12 = vmul.f32 0.6931472, %v5354_v39  ;;  %v3819_v48 = vadd.f32 %v3790_v4, %v3691_v42  ;;  %v3916_v14 = vrot.slane %v3915_v56, 1  ;;  %v3622_v39 = vrot.slane %v7761_v62, 1 }
 0x280   : > { %v3804_v34 = vmul.f32 0.6931472, %v5356_v15  ;;  %v3908_v10 = vmax.f32 %v3906_v60, %v3907_v20  ;;  %v5358_v43 = vpop.eup %5357  ;;  %v7797_v25 = vmax.f32 %v3901_v1, %v3902_v17 }
 0x281   : > { %v3825_v8 = vadd.f32 %v3802_v12, %v3697_v40  ;;  %v3806_v63 = vmul.f32 0.6931472, %v5358_v43  ;;  %v7806_v0 = vmax.f32 %v3915_v56, %v3916_v14  ;;  %v3922_v40 = vmax.f32 %v3920_v21, %v3921_v55 }
 0x282   : > { %v3826_v9 = vadd.f32 %v3804_v34, %v3698_v33  ;;  %v3909_v18 = vrot.slane %v3908_v10, 1  ;;  %v3953_v30 = vsub.f32 %v7730_v37, %v7797_v25  ;;  %v3961_v12 = vsub.f32 %v7770_v38, %v7797_v25 }
 0x283   : > { %v3833_v52 = vadd.f32 %v3825_v8, %v3817_v13  ;;  %v3827_v15 = vadd.f32 %v3806_v63, %v3699_v61  ;;  %v8646_v38 = vmax.f32 %v7668_v32, 0.0  ;;  %v3955_v60 = vsub.f32 %v7746_v11, %v7806_v0  ;;  %v7816_v61 = vpop.f32.mrf.mxu0 }
 0x284   : > { %v5360_v7 = vpop.eup %5359  ;;  %v3840_v41 = vadd.f32 %v3826_v9, %v3818_v19  ;;  %v7804_v43 = vmax.f32 %v3908_v10, %v3909_v18  ;;  %v3969_v8 = vmul.f32 1.442695, %v3953_v30  ;;  %v3985_v42 = vmul.f32 1.442695, %v3961_v12  ;;  %v7835_v12 = vpop.f32.mrf.mxu1 }
 0x285   : > { %v3834_v35 = vrot.slane %v3833_v52, 4  ;;  %v3808_v34 = vmul.f32 0.6931472, %v5360_v7  ;;  %v3820_v47 = vadd.f32 %v3792_v6, %v8646_v38  ;;  %v3623_v49 = vadd.f32 %v3622_v39, %v7761_v62 }
 0x286   : > { %v3841_v4 = vrot.slane %v3840_v41, 4  ;;  %v3954_v63 = vsub.f32 %v7737_v23, %v7804_v43  ;;  %v3962_v37 = vsub.f32 %v7777_v50, %v7804_v43  ;;  %5361 = vpow2.f32 %v3969_v8 }
 0x287   : > { %v3835_v33 = vadd.f32 %v3834_v35, %v3833_v52  ;;  %v3828_v51 = vadd.f32 %v3808_v34, %v3700_v28  ;;  %v3847_v13 = vadd.f32 %v3827_v15, %v3819_v48  ;;  %5363 = vpow2.f32 %v3985_v42 }
 0x288   : > { %v3971_v28 = vmul.f32 1.442695, %v3954_v63  ;;  %v3987_v1 = vmul.f32 1.442695, %v3962_v37  ;;  %v3963_v23 = vsub.f32 %v7782_v54, %v7806_v0  ;;  %v3973_v50 = vmul.f32 1.442695, %v3955_v60 }
 0x289   : > { %v3854_v20 = vadd.f32 %v3828_v51, %v3820_v47  ;;  %v3923_v21 = vrot.slane %v3922_v40, 1  ;;  %v3842_v32 = vadd.f32 %v3841_v4, %v3840_v41  ;;  %v3673_v19 = vadd.f32 %v3623_v49, %v7816_v61 }
 0x28a   : > { %5365 = vpow2.f32 %v3971_v28  ;;  %v3836_v17 = vrot.slane %v3835_v33, 2  ;;  %v3989_v11 = vmul.f32 1.442695, %v3963_v23  ;;  %v3227_v62 = vadd.f32 %v7754_v24, %v7510_v2 }
 0x28b   : > { %5367 = vpow2.f32 %v3987_v1  ;;  %v7822_v10 = vmax.f32 %v3922_v40, %v3923_v21  ;;  %v3848_v6 = vrot.slane %v3847_v13, 4  ;;  %v3681_v56 = vmul.f32 -0.5, %v3673_v19 }
 0x28c   : > { %5369 = vpow2.f32 %v3973_v50  ;;  %v3837_v55 = vadd.f32 %v3836_v17, %v3835_v33  ;;  %v5362_v9 = vpop.eup %5361  ;;  %v3855_v54 = vrot.slane %v3854_v20, 4  ;;  %v3629_v2 = vrot.slane %v7763_v46, 1 }
 0x28d   : > { %5371 = vpow2.f32 %v3989_v11  ;;  %v3956_v18 = vsub.f32 %v7759_v44, %v7822_v10  ;;  %v3964_v48 = vsub.f32 %v7788_v36, %v7822_v10  ;;  %v5364_v52 = vpop.eup %5363  ;;  %v7831_v39 = vadd.f32 %v3681_v56, %v7384_v27 }
 0x28e   : > { %v3838_v14 = vrot.slane %v3837_v55, 1  ;;  %v3843_v24 = vrot.slane %v3842_v32, 2  ;;  %v3196_v7 = vrot.slane %v7791_v59, 2  ;;  %v4001_v41 = vadd.f32 %v5364_v52, %v5362_v9 }
 0x28f   : > { %v3975_v15 = vmul.f32 1.442695, %v3956_v18  ;;  %v3991_v30 = vmul.f32 1.442695, %v3964_v48  ;;  %v8647_v44 = vrot.slane %v7744_v3, 2  ;;  %v3630_v27 = vadd.f32 %v3629_v2, %v7763_v46  ;;  %v7863_v48 = vpop.f32.mrf.mxu3 }
 0x290   : > { %v5366_v35 = vpop.eup %5365  ;;  %v3839_v34 = vadd.f32 %v3838_v14, %v3837_v55  ;;  %v3844_v4 = vadd.f32 %v3843_v24, %v3842_v32  ;;  %v7843_v42 = vadd.f32 %v3848_v6, %v3847_v13  ;;  %v7845_v40 = vadd.f32 %v3855_v54, %v3854_v20 }
 0x291   : > { %v7840_v36 = vadd.f32 %v8647_v44, %v7744_v3  ;;  %v5368_v8 = vpop.eup %5367  ;;  %v4002_v33 = vrot.slane %v4001_v41, 4  ;;  %5373 = vpow2.f32 %v3975_v15  ;;  %v3674_v38 = vadd.f32 %v3630_v27, %v7835_v12  ;;  %v7849_v3 = vpop.f32.mrf.mxu2 }
 0x292   : > { %v5370_v51 = vpop.eup %5369  ;;  %v4008_v63 = vadd.f32 %v5368_v8, %v5366_v35  ;;  %5375 = vpow2.f32 %v3991_v30  ;;  %v3889_v37 = vsub.f32 %v7816_v61, %v3839_v34  ;;  %v3845_v46 = vrot.slane %v3844_v4, 1  ;;  %v7871_v35 = vpop.f32.mrf.mxu1 }
 0x293   : > { %v5372_v47 = vpop.eup %5371  ;;  %v4003_v60 = vadd.f32 %v4002_v33, %v4001_v41  ;;  %v8648_v49 = vrot.slane %v7757_v58, 2  ;;  %v3212_v28 = vadd.f32 %v3196_v7, %v7657_v29  ;;  %v3682_v32 = vmul.f32 -0.5, %v3674_v38  ;;  %v7868_v7 = vpop.f32.mrf.mxu0 }
 0x294   : > { %v4009_v1 = vrot.slane %v4008_v63, 4  ;;  %v4015_v20 = vadd.f32 %v5372_v47, %v5370_v51  ;;  %v4097_v23 = vrot.slane %v3889_v37, 1  ;;  %v4192_v50 = vadd.f32 %v3889_v37, %v7696_v5 }
 0x295   : > { %v3211_v13 = vadd.f32 %v8648_v49, %v7644_v26  ;;  %v4004_v21 = vrot.slane %v4003_v60, 2  ;;  %v3846_v19 = vadd.f32 %v3845_v46, %v3844_v4  ;;  %v3220_v17 = vmul.f32 %v8598_v31, %v3212_v28 }
 0x296   : > { %v4010_v11 = vadd.f32 %v4009_v1, %v4008_v63  ;;  %v4016_v6 = vrot.slane %v4015_v20, 4  ;;  %v7857_v55 = vadd.f32 %v4097_v23, %v3681_v56  ;;  %4324 = vst [vmem:[#allocation1] sm:$0xff] %v4192_v50  ;;  %v3228_v26 = vsel %vm1344_vm2, %v7676_v16, 0.0 }
 0x297   : > { %v5374_v9 = vpop.eup %5373  ;;  %v4005_v29 = vadd.f32 %v4004_v21, %v4003_v60  ;;  %v3890_v54 = vsub.f32 %v7835_v12, %v3846_v19  ;;  %v4185_v18 = vadd.f32 %v3682_v32, %v7699_v53  ;;  %v3229_v5 = vadd.f32 %v3228_v26, %v3227_v62  ;;  %v7889_v50 = vpop.f32.mrf.mxu3  ;;  %v8649_v21 = vld [vmem:[#allocation21_spill] sm:$0xff] }
 0x298   : > { %v5376_v52 = vpop.eup %5375  ;;  %v4017_v14 = vadd.f32 %v4016_v6, %v4015_v20  ;;  %v4011_v2 = vrot.slane %v4010_v11, 2  ;;  %v3230_v56 = vsel %vm1344_vm2, %v7702_v45, 0.0  ;;  %v3232_v24 = vsel %vm1344_vm2, %v3211_v13, 0.0 }
 0x299   : > { %v4022_v16 = vadd.f32 %v5376_v52, %v5374_v9  ;;  %v4006_v41 = vrot.slane %v4005_v29, 1  ;;  %v4098_v15 = vrot.slane %v3890_v54, 1  ;;  %v4193_v30 = vadd.f32 %v3890_v54, %v7705_v57  ;;  %v7874_v27 = vpop.f32.mrf.mxu2  ;;  %v8651_v54 = vld [vmem:[#allocation46_spill] sm:$0xff]  ;;  %v8653_v52 = vld [vmem:[#allocation43_spill] sm:$0xff] }
 0x29a   : > { %v4012_v53 = vadd.f32 %v4011_v2, %v4010_v11  ;;  %v4286_v62 = vrot.slane %v4185_v18, 7  ;;  %v3231_v44 = vadd.f32 %v3230_v56, %v3229_v5  ;;  %v3234_v34 = vsel %vm1344_vm2, %v3220_v17, 0.0  ;;  %v8652_v18 = vld [vmem:[#allocation51_spill] sm:$0xff] }
 0x29b   : > { %v4023_v4 = vrot.slane %v4022_v16, 4  ;;  %v4007_v45 = vadd.f32 %v4006_v41, %v4005_v29  ;;  %v7876_v8 = vadd.f32 %v4098_v15, %v3682_v32  ;;  %4325 = vst [vmem:[#allocation1 + $0x9] sm:$0xff] %v4193_v30  ;;  %v3636_v33 = vrot.slane %v7767_v22, 1  ;;  %v8650_v32 = vld [vmem:[#allocation52_spill] sm:$0xff]  ;;  %v7894_v11 = vpop.f32.mrf.mxu0  ;;  %v7897_v29 = vpop.f32.mrf.mxu1 }
 0x29c   : > { %v4013_v51 = vrot.slane %v4012_v53, 1  ;;  %v7881_v57 = vsel %vm1344_vm2, %v7831_v39, %v4286_v62  ;;  %v3233_v63 = vadd.f32 %v3232_v24, %v3231_v44  ;;  %v3850_v37 = vrot.slane %v7843_v42, 2  ;;  %v8656_v62 = vld [vmem:[#allocation38_spill] sm:$0xff] }
 0x29d   : > { %v4024_v38 = vadd.f32 %v4023_v4, %v4022_v16  ;;  %5377 = vlog2.f32 %v4007_v45  ;;  %v3637_v47 = vadd.f32 %v3636_v33, %v7767_v22  ;;  %v4018_v60 = vrot.slane %v4017_v14, 2 }
 0x29e   : > { %v4014_v46 = vadd.f32 %v4013_v51, %v4012_v53  ;;  %v3235_v49 = vadd.f32 %v3234_v34, %v3233_v63  ;;  %v3851_v13 = vadd.f32 %v3850_v37, %v7843_v42  ;;  %v3643_v28 = vrot.slane %v7840_v36, 1 }
 0x29f   : > { %v3675_v1 = vadd.f32 %v3637_v47, %v7849_v3  ;;  %v4019_v20 = vadd.f32 %v4018_v60, %v4017_v14  ;;  %v3857_v39 = vrot.slane %v7845_v40, 2  ;;  %v4025_v23 = vrot.slane %v4024_v38, 2  ;;  %v8654_v14 = vld [vmem:[#allocation58_spill] sm:$0xff] }
 0x2a0   : > { %v3246_v19 = vadd.f32 %v8650_v32, %v8649_v21  ;;  %5379 = vlog2.f32 %v4014_v46  ;;  %3236 = vadd.xlane.f32.xlu1 %v3235_v49  ;;  %v3852_v22 = vrot.slane %v3851_v13, 1  ;;  %v3644_v17 = vadd.f32 %v3643_v28, %v7840_v36 }
 0x2a1   : > { %v3683_v42 = vmul.f32 -0.5, %v3675_v1  ;;  %v4020_v6 = vrot.slane %v4019_v20, 1  ;;  %v3858_v26 = vadd.f32 %v3857_v39, %v7845_v40  ;;  %v4026_v9 = vadd.f32 %v4025_v23, %v4024_v38  ;;  %v7904_v53 = vpop.f32.mrf.mxu2  ;;  %v8655_v40 = vld [vmem:[#allocation16_spill] sm:$0xff]  ;;  %v7909_v38 = vpop.permute.xlu2 %412  ;;  %v8659_v39 = vld [vmem:[#allocation62_spill] sm:$0xff] }
 0x2a2   : > { %v3254_v5 = vadd.f32 %v8652_v18, %v8651_v54  ;;  %v3247_v2 = vadd.f32 %v8654_v14, %v8653_v52  ;;  %v3853_v56 = vadd.f32 %v3852_v22, %v3851_v13  ;;  %v3676_v24 = vadd.f32 %v3644_v17, %v7863_v48  ;;  %8657 = vst [vmem:[#allocation42_spill] sm:$0xff] %v7909_v38  ;;  %v3583_v1 = vpop.f32.mrf.mxu3  ;;  %v8661_v17 = vld [vmem:[#allocation49_spill] sm:$0xff] }
 0x2a3   : > { %v5378_v16 = vpop.eup %5377  ;;  %v4021_v36 = vadd.f32 %v4020_v6, %v4019_v20  ;;  %v4186_v41 = vadd.f32 %v3683_v42, %v3246_v19  ;;  %v3859_v15 = vrot.slane %v3858_v26, 1  ;;  %v4027_v30 = vrot.slane %v4026_v9, 1  ;;  %v8658_v20 = vld [vmem:[#allocation15_spill] sm:$0xff]  ;;  %v7916_v22 = vpop.f32.mrf.mxu0  ;;  %v8662_v18 = vld [vmem:[#allocation41_spill] sm:$0xff] }
 0x2a4   : > { %v3255_v44 = vadd.f32 %v8656_v62, %v8655_v40  ;;  %v4058_v34 = vmul.f32 0.6931472, %v5378_v16  ;;  %v3891_v4 = vsub.f32 %v7849_v3, %v3853_v56  ;;  %v3684_v45 = vmul.f32 -0.5, %v3676_v24  ;;  %v8665_v24 = vld [vmem:[#allocation63_spill] sm:$0xff]  ;;  %v8667_v40 = vld [vmem:[#allocation28_spill] sm:$0xff]  ;;  %v8668_v62 = vld [vmem:[#allocation53_spill] sm:$0xff] }
 0x2a5   : > { %5381 = vlog2.f32 %v4021_v36  ;;  %v4287_v33 = vrot.slane %v4186_v41, 6  ;;  %v3860_v51 = vadd.f32 %v3859_v15, %v3858_v26  ;;  %v4028_v63 = vadd.f32 %v4027_v30, %v4026_v9  ;;  %v8666_v36 = vld [vmem:[#allocation68_spill] sm:$0xff] }
 0x2a6   : > { %v5380_v37 = vpop.eup %5379  ;;  %v4073_v47 = vadd.f32 %v4058_v34, %v7797_v25  ;;  %v4099_v60 = vrot.slane %v3891_v4, 1  ;;  %v4194_v46 = vadd.f32 %v3891_v4, %v3254_v5  ;;  %v4187_v49 = vadd.f32 %v3684_v45, %v3247_v2  ;;  %v8660_v25 = vld [vmem:[#allocation24_spill] sm:$0xff]  ;;  %v8663_v5 = vld [vmem:[#allocation50_spill] sm:$0xff]  ;;  %v8669_v34 = vld [vmem:[#allocation25_spill] sm:$0xff] }
 0x2a7   : > { %v4060_v13 = vmul.f32 0.6931472, %v5380_v37  ;;  %v3892_v28 = vsub.f32 %v7863_v48, %v3860_v51  ;;  %5383 = vlog2.f32 %v4028_v63  ;;  %v3260_v23 = vadd.f32 %v8659_v39, %v8658_v20  ;;  %v8670_v4 = vld [vmem:[#allocation55_spill] sm:$0xff]  ;;  %v8674_v20 = vld [vmem:[#allocation56_spill] sm:$0xff] }
 0x2a8   : > { %v4081_v21 = vsub.f32 %v7816_v61, %v4073_v47  ;;  %v4115_v32 = vadd.f32 %v4099_v60, %v3683_v42  ;;  %4326 = vst [vmem:[#allocation1 + $0x12] sm:$0xff] %v4194_v46  ;;  %v4288_v19 = vrot.slane %v4187_v49, 5  ;;  %v2323_v6 = vadd.f32 %v8661_v17, %v8660_v25  ;;  %v8664_v42 = vld [vmem:[#allocation14_spill] sm:$0xff]  ;;  %v8677_v17 = vld [vmem:[#allocation71_spill] sm:$0xff] }
 0x2a9   : > { %v4074_v26 = vadd.f32 %v4060_v13, %v7804_v43  ;;  %v4100_v9 = vrot.slane %v3892_v28, 1  ;;  %v4195_v54 = vadd.f32 %v3892_v28, %v3255_v44  ;;  %v3261_v52 = vadd.f32 %v8663_v5, %v8662_v18  ;;  %v7931_v43 = vpop.f32.mrf.mxu1  ;;  %v8671_v47 = vld [vmem:[#allocation30_spill] sm:$0xff]  ;;  %v7946_v13 = vpop.f32.mrf.mxu2 }
 0x2aa   : > { %v4129_v14 = vrot.slane %v4081_v21, 2  ;;  %v7923_v2 = vadd.f32 %v4081_v21, %v3260_v23  ;;  %v7925_v56 = vsel %vm4294_vm10, %v4287_v33, %v4288_v19  ;;  %v3262_v16 = vadd.f32 %v8665_v24, %v8664_v42  ;;  %v8672_v60 = vld [vmem:[#allocation54_spill] sm:$0xff]  ;;  %v8675_v23 = vld [vmem:[#allocation31_spill] sm:$0xff]  ;;  %v8676_v21 = vld [vmem:[#allocation60_spill] sm:$0xff] }
 0x2ab   : > { %v5382_v61 = vpop.eup %5381  ;;  %v3263_v41 = vadd.f32 %v8666_v36, %v2323_v6  ;;  %v4082_v15 = vsub.f32 %v7835_v12, %v4074_v26  ;;  %v4116_v30 = vadd.f32 %v4100_v9, %v3684_v45  ;;  %4327 = vst [vmem:[#allocation1 + $0x1b] sm:$0xff] %v4195_v54  ;;  %v2308_v44 = vadd.f32 %v8668_v62, %v8667_v40  ;;  %v8673_v28 = vld [vmem:[#allocation26_spill] sm:$0xff]  ;;  %v7964_v54 = vpop.f32.mrf.mxu3  ;;  %v7981_v40 = vld [vmem:[%s5799_s8] sm:$0x1]  ;;  %s8250_s8 = sshll.u32 %s5714_s28, 3 }
 0x2ac   : > { %v7937_v51 = vadd.f32 %v8670_v4, %v8669_v34  ;;  %v4145_v33 = vadd.f32 %v4129_v14, %v7857_v55  ;;  %v4062_v63 = vmul.f32 0.6931472, %v5382_v61  ;;  %v2309_v46 = vadd.f32 %v8672_v60, %v8671_v47  ;;  %v7972_v61 = vpop.f32.mrf.mxu0 }
 0x2ad   : > { %v5384_v37 = vpop.eup %5383  ;;  %v4130_v49 = vrot.slane %v4082_v15, 2  ;;  %v7942_v12 = vadd.f32 %v4082_v15, %v3261_v52  ;;  %v3613_v45 = vmul.f32 %v7894_v11, %v7894_v11  ;;  %v7950_v39 = vadd.f32 %v8674_v20, %v8673_v28  ;;  %v2297_v52 = vpop.xlane.xlu2 %2296 }
 0x2ae   : > { %v7954_v55 = vadd.f32 %v8676_v21, %v8675_v23  ;;  %v4075_v19 = vadd.f32 %v4062_v63, %v7806_v0  ;;  %v4064_v25 = vmul.f32 0.6931472, %v5384_v37  ;;  %v7958_v6 = vadd.f32 %v8677_v17, %v2308_v44  ;;  %v8678_v23 = vld [vmem:[#allocation72_spill] sm:$0xff] }
 0x2af   : > { %v4161_v26 = vsel %vm1344_vm2, %v4145_v33, 0.0  ;;  %v4146_v11 = vadd.f32 %v4130_v49, %v7876_v8  ;;  %v3605_v9 = vmul.f32 %v7868_v7, %v7868_v7  ;;  %v3606_v0 = vmul.f32 %v7871_v35, %v7871_v35 }
 0x2b0   : > { %v4083_v18 = vsub.f32 %v7849_v3, %v4075_v19  ;;  %v4076_v5 = vadd.f32 %v4064_v25, %v7822_v10  ;;  %v3614_v14 = vmul.f32 %v7897_v29, %v7897_v29  ;;  %v3615_v7 = vmul.f32 %v7904_v53, %v7904_v53 }
 0x2b1   : > { %v4162_v8 = vsel %vm1344_vm2, %v4146_v11, 0.0  ;;  %v3645_v42 = vadd.f32 %v3613_v45, %v3605_v9  ;;  %v3616_v24 = vmul.f32 %v3583_v1, %v3583_v1  ;;  %v2298_v35 = vmul.f32 %v7981_v40, %v2297_v52  ;;  %v7991_v4 = vpop.f32.mrf.mxu1  ;;  %v7998_v49 = vpop.f32.mrf.mxu2 }
 0x2b2   : > { %v4163_v36 = vadd.f32 %v4162_v8, %v4161_v26  ;;  %v4131_v3 = vrot.slane %v4083_v18, 2  ;;  %v7977_v15 = vadd.f32 %v4083_v18, %v3262_v16  ;;  %v4084_v10 = vsub.f32 %v7863_v48, %v4076_v5 }
 0x2b3   : > { %v3607_v29 = vmul.f32 %v7874_v27, %v7874_v27  ;;  %v3608_v62 = vmul.f32 %v7889_v50, %v7889_v50  ;;  %v3709_v44 = vand.u32 2147483647, %v7916_v22  ;;  %v3652_v16 = vadd.f32 %v3614_v14, %v3606_v0  ;;  %v8003_v20 = vpop.f32.mrf.mxu3 }
 0x2b4   : > { %v4147_v53 = vadd.f32 %v4131_v3, %v4115_v32  ;;  %v4132_v1 = vrot.slane %v4084_v10, 2  ;;  %v7989_v34 = vadd.f32 %v4084_v10, %v3263_v41  ;;  %v3646_v48 = vrot.slane %v3645_v42, 4  ;;  %v8009_v9 = vpop.f32.mrf.mxu0 }
 0x2b5   : > { %v3659_v33 = vadd.f32 %v3615_v7, %v3607_v29  ;;  %v3725_v63 = vsub.f32 0.0, %v3709_v44  ;;  %v3710_v37 = vand.u32 2147483647, %v7931_v43  ;;  %v3666_v60 = vadd.f32 %v3616_v24, %v3608_v62  ;;  %v8679_v29 = vld [vmem:[#allocation69_spill] sm:$0xff] }
 0x2b6   : > { %v4164_v47 = vsel %vm1344_vm2, %v4147_v53, 0.0  ;;  %v7995_v27 = vadd.f32 %v4132_v1, %v4116_v30  ;;  %v3711_v50 = vand.u32 2147483647, %v7946_v13  ;;  %v3712_v28 = vand.u32 2147483647, %v7964_v54 }
 0x2b7   : > { %v8000_v32 = vadd.f32 %v4164_v47, %v4163_v36  ;;  %v3745_v41 = vmul.f32 1.442695, %v3725_v63  ;;  %v3726_v45 = vsub.f32 0.0, %v3710_v37  ;;  %v8006_v21 = vadd.f32 %v8678_v23, %v2309_v46  ;;  %v8680_v63 = vld [vmem:[#allocation70_spill] sm:$0xff] }
 0x2b8   : > { %v3653_v19 = vrot.slane %v3652_v16, 4  ;;  %v3727_v25 = vsub.f32 0.0, %v3711_v50  ;;  %v3717_v30 = vand.u32 2147483647, %v7972_v61  ;;  %v3660_v17 = vrot.slane %v3659_v33, 4 }
 0x2b9   : > { %5385 = vpow2.f32 %v3745_v41  ;;  %v3747_v26 = vmul.f32 1.442695, %v3726_v45  ;;  %2300 = vrot.lane.b32.xlu1 %v2298_v35, %s5649_s15  ;;  %v3728_v11 = vsub.f32 0.0, %v3712_v28  ;;  %v8011_v18 = vadd.f32 %v3646_v48, %v3645_v42  ;;  %v8016_v3 = vpop.f32.mrf.mxu1  ;;  %v8026_v1 = vpop.f32.mrf.mxu2 }
 0x2ba   : > { %v3749_v5 = vmul.f32 1.442695, %v3727_v25  ;;  %v3733_v52 = vsub.f32 0.0, %v3717_v30  ;;  %v3718_v0 = vand.u32 2147483647, %v7991_v4  ;;  %v3667_v46 = vrot.slane %v3666_v60, 4 }
 0x2bb   : > { %5387 = vpow2.f32 %v3747_v26  ;;  %v3751_v14 = vmul.f32 1.442695, %v3728_v11  ;;  %v3719_v8 = vand.u32 2147483647, %v7998_v49  ;;  %v3720_v36 = vand.u32 2147483647, %v8003_v20  ;;  %v8038_v41 = vpop.f32.mrf.mxu3 }
 0x2bc   : > { %5389 = vpow2.f32 %v3749_v5  ;;  %v3761_v7 = vmul.f32 1.442695, %v3733_v52  ;;  %v3734_v24 = vsub.f32 0.0, %v3718_v0  ;;  %v8018_v10 = vadd.f32 %v3653_v19, %v3652_v16  ;;  %v8681_v16 = vld [vmem:[#allocation73_spill] sm:$0xff] }
 0x2bd   : > { %v8020_v42 = vadd.f32 %v3660_v17, %v3659_v33  ;;  %5391 = vpow2.f32 %v3751_v14  ;;  %v3735_v35 = vsub.f32 0.0, %v3719_v8  ;;  %v8024_v62 = vadd.f32 %v8679_v29, %v7937_v51 }
 0x2be   : > { %5393 = vpow2.f32 %v3761_v7  ;;  %v3763_v44 = vmul.f32 1.442695, %v3734_v24  ;;  %v3736_v53 = vsub.f32 0.0, %v3720_v36  ;;  %v8030_v37 = vadd.f32 %v8680_v63, %v7950_v39 }
 0x2bf   : > { %v5386_v48 = vpop.eup %5385  ;;  %v8034_v33 = vadd.f32 %v8681_v16, %v7954_v55  ;;  %v8036_v47 = vadd.f32 %v3667_v46, %v3666_v60  ;;  %v3765_v50 = vmul.f32 1.442695, %v3735_v35  ;;  %v3693_v51 = vmax.f32 %v7916_v22, 0.0  ;;  %v8044_v55 = vpop.f32.mrf.mxu0 }
 0x2c0   : > { %v3773_v45 = vadd.f32 1.0, %v5386_v48  ;;  %5395 = vpow2.f32 %v3763_v44  ;;  %v3767_v28 = vmul.f32 1.442695, %v3736_v53  ;;  %v3694_v30 = vmax.f32 %v7931_v43, 0.0 }
 0x2c1   : > { %v5388_v23 = vpop.eup %5387  ;;  %5397 = vpow2.f32 %v3765_v50  ;;  %v3925_v26 = vmax.f32 %v8009_v9, %v8044_v55  ;;  %v3695_v52 = vmax.f32 %v7946_v13, 0.0  ;;  %v8052_v24 = vpop.f32.mrf.mxu1  ;;  %v3701_v13 = vmax.f32 %v7972_v61, 0.0 }
 0x2c2   : > { %v5390_v60 = vpop.eup %5389  ;;  %5399 = vlog2.f32 %v3773_v45  ;;  %v3774_v17 = vadd.f32 1.0, %v5388_v23  ;;  %v3932_v36 = vmax.f32 %v8016_v3, %v8052_v24  ;;  %v8057_v44 = vpop.f32.mrf.mxu2  ;;  %v8061_v53 = vsel %vm4296_vm11, %v7881_v57, %v7925_v56 }
 0x2c3   : > { %v5392_v11 = vpop.eup %5391  ;;  %v3775_v0 = vadd.f32 1.0, %v5390_v60  ;;  %5401 = vpow2.f32 %v3767_v28  ;;  %v3926_v7 = vrot.slane %v3925_v26, 4  ;;  %v3939_v50 = vmax.f32 %v8026_v1, %v8057_v44  ;;  %v8065_v45 = vpop.f32.mrf.mxu3 }
 0x2c4   : > { %v5394_v46 = vpop.eup %5393  ;;  %5403 = vlog2.f32 %v3774_v17  ;;  %v3776_v8 = vadd.f32 1.0, %v5392_v11  ;;  %v3933_v16 = vrot.slane %v3932_v36, 4  ;;  %v3702_v23 = vmax.f32 %v7991_v4, 0.0 }
 0x2c5   : > { %5405 = vlog2.f32 %v3775_v0  ;;  %v3781_v43 = vadd.f32 1.0, %v5394_v46  ;;  %v3927_v29 = vmax.f32 %v3925_v26, %v3926_v7  ;;  %v3946_v17 = vmax.f32 %v8038_v41, %v8065_v45 }
 0x2c6   : > { %v5396_v35 = vpop.eup %5395  ;;  %5407 = vlog2.f32 %v3776_v8  ;;  %v3934_v56 = vmax.f32 %v3932_v36, %v3933_v16  ;;  %v3940_v11 = vrot.slane %v3939_v50, 4  ;;  %v3703_v5 = vmax.f32 %v7998_v49, 0.0 }
 0x2c7   : > { %v5398_v48 = vpop.eup %5397  ;;  %5409 = vlog2.f32 %v3781_v43  ;;  %v3782_v63 = vadd.f32 1.0, %v5396_v35  ;;  %v3928_v60 = vrot.slane %v3927_v29, 2  ;;  %v3947_v7 = vrot.slane %v3946_v17, 4 }
 0x2c8   : > { %v5400_v28 = vpop.eup %5399  ;;  %v3783_v61 = vadd.f32 1.0, %v5398_v48  ;;  %v3935_v4 = vrot.slane %v3934_v56, 2  ;;  %v3941_v48 = vmax.f32 %v3939_v50, %v3940_v11 }
 0x2c9   : > { %v5402_v26 = vpop.eup %5401  ;;  %v3794_v57 = vmul.f32 0.6931472, %v5400_v28  ;;  %5411 = vlog2.f32 %v3782_v63  ;;  %v3929_v8 = vmax.f32 %v3927_v29, %v3928_v60  ;;  %v3948_v19 = vmax.f32 %v3946_v17, %v3947_v7 }
 0x2ca   : > { %v5404_v0 = vpop.eup %5403  ;;  %5413 = vlog2.f32 %v3783_v61  ;;  %v3784_v46 = vadd.f32 1.0, %v5402_v26  ;;  %v3704_v63 = vmax.f32 %v8003_v20, 0.0  ;;  %v3936_v16 = vmax.f32 %v3934_v56, %v3935_v4 }
 0x2cb   : > { %v5406_v43 = vpop.eup %5405  ;;  %v3796_v35 = vmul.f32 0.6931472, %v5404_v0  ;;  %v3930_v14 = vrot.slane %v3929_v8, 1  ;;  %v3821_v36 = vadd.f32 %v3794_v57, %v3693_v51  ;;  %v3942_v29 = vrot.slane %v3941_v48, 2 }
 0x2cc   : > { %v5408_v25 = vpop.eup %5407  ;;  %v3798_v39 = vmul.f32 0.6931472, %v5406_v43  ;;  %5415 = vlog2.f32 %v3784_v46  ;;  %v3949_v49 = vrot.slane %v3948_v19, 2  ;;  %v3937_v43 = vrot.slane %v3936_v16, 1 }
 0x2cd   : > { %v5410_v28 = vpop.eup %5409  ;;  %v3822_v61 = vadd.f32 %v3796_v35, %v3694_v30  ;;  %v8074_v26 = vmax.f32 %v3929_v8, %v3930_v14  ;;  %v3800_v11 = vmul.f32 0.6931472, %v5408_v25  ;;  %v3943_v46 = vmax.f32 %v3941_v48, %v3942_v29 }
 0x2ce   : > { %v3810_v60 = vmul.f32 0.6931472, %v5410_v28  ;;  %v3823_v50 = vadd.f32 %v3798_v39, %v3695_v52  ;;  %v8080_v30 = vmax.f32 %v3936_v16, %v3937_v43  ;;  %v3950_v57 = vmax.f32 %v3948_v19, %v3949_v49 }
 0x2cf   : > { %v5412_v0 = vpop.eup %5411  ;;  %v3957_v22 = vsub.f32 %v8009_v9, %v8074_v26  ;;  %v3965_v20 = vsub.f32 %v8044_v55, %v8074_v26  ;;  %v3944_v14 = vrot.slane %v3943_v46, 1  ;;  %v8682_v19 = vrot.slane %v8011_v18, 2 }
 0x2d0   : > { %v5414_v38 = vpop.eup %5413  ;;  %v3829_v17 = vadd.f32 %v3810_v60, %v3701_v13  ;;  %v3812_v7 = vmul.f32 0.6931472, %v5412_v0  ;;  %v3958_v13 = vsub.f32 %v8016_v3, %v8080_v30  ;;  %v3966_v9 = vsub.f32 %v8052_v24, %v8080_v30 }
 0x2d1   : > { %v3814_v51 = vmul.f32 0.6931472, %v5414_v38  ;;  %v3977_v25 = vmul.f32 1.442695, %v3957_v22  ;;  %v3993_v52 = vmul.f32 1.442695, %v3965_v20  ;;  %v8086_v38 = vmax.f32 %v3943_v46, %v3944_v14  ;;  %v8103_v46 = vpop.f32.mrf.mxu0 }
 0x2d2   : > { %v5416_v56 = vpop.eup %5415  ;;  %v3861_v8 = vadd.f32 %v3829_v17, %v3821_v36  ;;  %v3830_v39 = vadd.f32 %v3812_v7, %v3702_v23  ;;  %v3649_v55 = vadd.f32 %v8682_v19, %v8011_v18  ;;  %v3979_v36 = vmul.f32 1.442695, %v3958_v13 }
 0x2d3   : > { %v3831_v35 = vadd.f32 %v3814_v51, %v3703_v5  ;;  %v3816_v4 = vmul.f32 0.6931472, %v5416_v56  ;;  %5417 = vpow2.f32 %v3977_v25  ;;  %v3995_v16 = vmul.f32 1.442695, %v3966_v9  ;;  %v8118_v9 = vpop.f32.mrf.mxu1 }
 0x2d4   : > { %v3868_v48 = vadd.f32 %v3830_v39, %v3822_v61  ;;  %v3862_v28 = vrot.slane %v3861_v8, 4  ;;  %5419 = vpow2.f32 %v3993_v52  ;;  %v3959_v3 = vsub.f32 %v8026_v1, %v8086_v38 }
 0x2d5   : > { %v3832_v23 = vadd.f32 %v3816_v4, %v3704_v63  ;;  %v8091_v5 = vadd.f32 %v3831_v35, %v3823_v50  ;;  %v3967_v24 = vsub.f32 %v8057_v44, %v8086_v38  ;;  %v8683_v29 = vmax.f32 %v7964_v54, 0.0 }
 0x2d6   : > { %v3869_v60 = vrot.slane %v3868_v48, 4  ;;  %5421 = vpow2.f32 %v3979_v36  ;;  %v3951_v49 = vrot.slane %v3950_v57, 1  ;;  %v3981_v18 = vmul.f32 1.442695, %v3959_v3 }
 0x2d7   : > { %v3824_v61 = vadd.f32 %v3800_v11, %v8683_v29  ;;  %5423 = vpow2.f32 %v3995_v16  ;;  %v3997_v63 = vmul.f32 1.442695, %v3967_v24  ;;  %v3650_v0 = vrot.slane %v3649_v55, 1 }
 0x2d8   : > { %v8101_v50 = vmax.f32 %v3950_v57, %v3951_v49  ;;  %v3863_v1 = vadd.f32 %v3862_v28, %v3861_v8  ;;  %v8684_v44 = vrot.slane %v8018_v10, 2  ;;  %v3876_v11 = vrot.slane %v8091_v5, 4 }
 0x2d9   : > { %v8099_v43 = vadd.f32 %v3832_v23, %v3824_v61  ;;  %v5418_v54 = vpop.eup %5417  ;;  %5425 = vpow2.f32 %v3981_v18  ;;  %v3651_v7 = vadd.f32 %v3650_v0, %v3649_v55  ;;  %v8685_v22 = vrot.slane %v8020_v42, 2  ;;  %v8125_v61 = vpop.f32.mrf.mxu2 }
 0x2da   : > { %v3656_v17 = vadd.f32 %v8684_v44, %v8018_v10  ;;  %v5420_v51 = vpop.eup %5419  ;;  %5427 = vpow2.f32 %v3997_v63  ;;  %v3960_v14 = vsub.f32 %v8038_v41, %v8101_v50  ;;  %v3968_v57 = vsub.f32 %v8065_v45, %v8101_v50 }
 0x2db   : > { %v3663_v20 = vadd.f32 %v8685_v22, %v8020_v42  ;;  %v3864_v56 = vrot.slane %v3863_v1, 2  ;;  %v4029_v8 = vadd.f32 %v5420_v51, %v5418_v54  ;;  %v3677_v10 = vadd.f32 %v3651_v7, %v8103_v46 }
 0x2dc   : > { %v3657_v39 = vrot.slane %v3656_v17, 1  ;;  %v3870_v25 = vadd.f32 %v3869_v60, %v3868_v48  ;;  %v5422_v52 = vpop.eup %5421  ;;  %v3883_v35 = vrot.slane %v8099_v43, 4  ;;  %v3983_v4 = vmul.f32 1.442695, %v3960_v14 }
 0x2dd   : > { %v3999_v13 = vmul.f32 1.442695, %v3968_v57  ;;  %v3865_v42 = vadd.f32 %v3864_v56, %v3863_v1  ;;  %v5424_v19 = vpop.eup %5423  ;;  %v4030_v55 = vrot.slane %v4029_v8, 4  ;;  %v8120_v41 = vmul.f32 -0.5, %v3677_v10 }
 0x2de   : > { %v3658_v28 = vadd.f32 %v3657_v39, %v3656_v17  ;;  %v3871_v45 = vrot.slane %v3870_v25, 2  ;;  %v4036_v23 = vadd.f32 %v5424_v19, %v5422_v52  ;;  %5429 = vpow2.f32 %v3983_v4 }
 0x2df   : > { %v3866_v36 = vrot.slane %v3865_v42, 1  ;;  %v3664_v16 = vrot.slane %v3663_v20, 1  ;;  %v5426_v3 = vpop.eup %5425  ;;  %v4031_v48 = vadd.f32 %v4030_v55, %v4029_v8  ;;  %5431 = vpow2.f32 %v3999_v13 }
 0x2e0   : > { %v4188_v24 = vadd.f32 %v8120_v41, %v7958_v6  ;;  %v3678_v29 = vadd.f32 %v3658_v28, %v8118_v9  ;;  %v5428_v60 = vpop.eup %5427  ;;  %v4037_v49 = vrot.slane %v4036_v23, 4  ;;  %v3872_v63 = vadd.f32 %v3871_v45, %v3870_v25 }
 0x2e1   : > { %v3867_v18 = vadd.f32 %v3866_v36, %v3865_v42  ;;  %v3665_v0 = vadd.f32 %v3664_v16, %v3663_v20  ;;  %v4043_v1 = vadd.f32 %v5428_v60, %v5426_v3  ;;  %v4032_v44 = vrot.slane %v4031_v48, 2 }
 0x2e2   : > { %v4289_v17 = vrot.slane %v4188_v24, 4  ;;  %v8127_v54 = vmul.f32 -0.5, %v3678_v29  ;;  %v4038_v7 = vadd.f32 %v4037_v49, %v4036_v23  ;;  %v3873_v51 = vrot.slane %v3872_v63, 1 }
 0x2e3   : > { %v8130_v22 = vsub.f32 %v8103_v46, %v3867_v18  ;;  %v3679_v6 = vadd.f32 %v3665_v0, %v8125_v61  ;;  %v4044_v14 = vrot.slane %v4043_v1, 4  ;;  %v4033_v57 = vadd.f32 %v4032_v44, %v4031_v48  ;;  %v8156_v44 = vpop.f32.mrf.mxu3 }
 0x2e4   : > { %v4189_v56 = vadd.f32 %v8127_v54, %v8006_v21  ;;  %v3877_v8 = vadd.f32 %v3876_v11, %v8091_v5  ;;  %v5430_v20 = vpop.eup %5429  ;;  %v3874_v39 = vadd.f32 %v3873_v51, %v3872_v63  ;;  %v4039_v25 = vrot.slane %v4038_v7, 2  ;;  %v8687_v51 = vld [vmem:[#allocation27_spill] sm:$0xff] }
 0x2e5   : > { %v4196_v10 = vadd.f32 %v8130_v22, %v8024_v62  ;;  %v5432_v52 = vpop.eup %5431  ;;  %v4045_v4 = vadd.f32 %v4044_v14, %v4043_v1  ;;  %v4034_v13 = vrot.slane %v4033_v57, 1  ;;  %v8138_v19 = vmul.f32 -0.5, %v3679_v6  ;;  %v8688_v6 = vld [vmem:[#allocation57_spill] sm:$0xff] }
 0x2e6   : > { %v4290_v42 = vrot.slane %v4189_v56, 3  ;;  %v4050_v55 = vadd.f32 %v5432_v52, %v5430_v20  ;;  %v8141_v28 = vsub.f32 %v8118_v9, %v3874_v39  ;;  %v4040_v21 = vadd.f32 %v4039_v25, %v4038_v7  ;;  %v8690_v20 = vld [vmem:[#allocation61_spill] sm:$0xff] }
 0x2e7   : > { %4328 = vst [vmem:[#allocation1 + $0x24] sm:$0xff] %v4196_v10  ;;  %v8686_v5 = vrot.slane %v8036_v47, 2  ;;  %v4035_v62 = vadd.f32 %v4034_v13, %v4033_v57  ;;  %v3878_v23 = vrot.slane %v3877_v8, 2  ;;  %v4046_v36 = vrot.slane %v4045_v4, 2 }
 0x2e8   : > { %v8146_v45 = vsel %vm4298_vm12, %v4289_v17, %v4290_v42  ;;  %v4051_v16 = vrot.slane %v4050_v55, 4  ;;  %v4041_v3 = vrot.slane %v4040_v21, 1  ;;  %v4197_v48 = vadd.f32 %v8141_v28, %v8030_v37 }
 0x2e9   : > { %v3670_v11 = vadd.f32 %v8686_v5, %v8036_v47  ;;  %5433 = vlog2.f32 %v4035_v62  ;;  %v3879_v24 = vadd.f32 %v3878_v23, %v3877_v8  ;;  %v4047_v29 = vadd.f32 %v4046_v36, %v4045_v4  ;;  %v8691_v4 = vld [vmem:[#allocation74_spill] sm:$0xff] }
 0x2ea   : > { %v8152_v60 = vadd.f32 %v8138_v19, %v8034_v33  ;;  %v4052_v49 = vadd.f32 %v4051_v16, %v4050_v55  ;;  %v4042_v18 = vadd.f32 %v4041_v3, %v4040_v21  ;;  %4329 = vst [vmem:[#allocation1 + $0x2d] sm:$0xff] %v4197_v48  ;;  %v4166_v63 = vsel %vm1344_vm2, %v7995_v27, 0.0  ;;  %v8689_v27 = vld [vmem:[#allocation32_spill] sm:$0xff] }
 0x2eb   : > { %v3671_v47 = vrot.slane %v3670_v11, 1  ;;  %v3880_v0 = vrot.slane %v3879_v24, 1  ;;  %v4048_v1 = vrot.slane %v4047_v29, 1  ;;  %v3884_v37 = vadd.f32 %v3883_v35, %v8099_v43 }
 0x2ec   : > { %5435 = vlog2.f32 %v4042_v18  ;;  %v4053_v7 = vrot.slane %v4052_v49, 2  ;;  %v4167_v33 = vadd.f32 %v4166_v63, %v8000_v32  ;;  %v2318_v14 = vadd.f32 %v8688_v6, %v8687_v51  ;;  %v8692_v32 = vld [vmem:[#allocation76_spill] sm:$0xff] }
 0x2ed   : > { %v3672_v17 = vadd.f32 %v3671_v47, %v3670_v11  ;;  %v3881_v57 = vadd.f32 %v3880_v0, %v3879_v24  ;;  %v4049_v56 = vadd.f32 %v4048_v1, %v4047_v29  ;;  %v3885_v8 = vrot.slane %v3884_v37, 2  ;;  %v8693_v24 = vld [vmem:[#allocation29_spill] sm:$0xff]  ;;  %v8694_v29 = vld [vmem:[#allocation59_spill] sm:$0xff] }
 0x2ee   : > { %v2311_v10 = vadd.f32 %v8690_v20, %v8689_v27  ;;  %v4054_v25 = vadd.f32 %v4053_v7, %v4052_v49  ;;  %v3258_v43 = vadd.f32 %v8691_v4, %v2318_v14  ;;  %v4101_v16 = vrot.slane %v8130_v22, 1  ;;  %v8695_v1 = vld [vmem:[#allocation75_spill] sm:$0xff] }
 0x2ef   : > { %v3680_v39 = vadd.f32 %v3672_v17, %v8156_v44  ;;  %v5434_v52 = vpop.eup %5433  ;;  %v3895_v35 = vsub.f32 %v8125_v61, %v3881_v57  ;;  %5437 = vlog2.f32 %v4049_v56  ;;  %v3886_v13 = vadd.f32 %v3885_v8, %v3884_v37 }
 0x2f0   : > { %v3251_v42 = vadd.f32 %v8692_v32, %v2311_v10  ;;  %v4066_v55 = vmul.f32 0.6931472, %v5434_v52  ;;  %v4055_v5 = vrot.slane %v4054_v25, 1  ;;  %v2319_v49 = vadd.f32 %v8694_v29, %v8693_v24 }
 0x2f1   : > { %v8170_v21 = vmul.f32 -0.5, %v3680_v39  ;;  %v4198_v11 = vadd.f32 %v3895_v35, %v3258_v43  ;;  %v3887_v62 = vrot.slane %v3886_v13, 1  ;;  %v4102_v22 = vrot.slane %v8141_v28, 1  ;;  %v8697_v43 = vld [vmem:[#allocation67_spill] sm:$0xff] }
 0x2f2   : > { %v5436_v23 = vpop.eup %5435  ;;  %v4077_v36 = vadd.f32 %v4066_v55, %v8074_v26  ;;  %v4056_v3 = vadd.f32 %v4055_v5, %v4054_v25  ;;  %v3259_v37 = vadd.f32 %v8695_v1, %v2319_v49  ;;  %v4117_v7 = vadd.f32 %v4101_v16, %v8120_v41  ;;  %v8700_v16 = vld [vmem:[#allocation34_spill] sm:$0xff] }
 0x2f3   : > { %v4191_v48 = vadd.f32 %v8170_v21, %v3251_v42  ;;  %v4068_v18 = vmul.f32 0.6931472, %v5436_v23  ;;  %4330 = vst [vmem:[#allocation1 + $0x36] sm:$0xff] %v4198_v11  ;;  %v3888_v47 = vadd.f32 %v3887_v62, %v3886_v13  ;;  %v4103_v27 = vrot.slane %v3895_v35, 1  ;;  %v8704_v1 = vld [vmem:[#allocation66_spill] sm:$0xff] }
 0x2f4   : > { %v8178_v63 = vsub.f32 %v8103_v46, %v4077_v36  ;;  %5439 = vlog2.f32 %v4056_v3  ;;  %v4291_v32 = vrot.slane %v8152_v60, 2  ;;  %v8698_v60 = vld [vmem:[#allocation33_spill] sm:$0xff]  ;;  %v8699_v36 = vld [vmem:[#allocation64_spill] sm:$0xff] }
 0x2f5   : > { %v5438_v0 = vpop.eup %5437  ;;  %v4078_v26 = vadd.f32 %v4068_v18, %v8080_v30  ;;  %v3896_v17 = vsub.f32 %v8156_v44, %v3888_v47  ;;  %v4277_v14 = vmul.f32 %v8598_v31, %v4191_v48  ;;  %v4118_v30 = vadd.f32 %v4102_v22, %v8127_v54  ;;  %v8701_v3 = vld [vmem:[#allocation65_spill] sm:$0xff]  ;;  %v8705_v22 = vld [vmem:[#allocation78_spill] sm:$0xff] }
 0x2f6   : > { %v4133_v51 = vrot.slane %v8178_v63, 2  ;;  %v4070_v6 = vmul.f32 0.6931472, %v5438_v0  ;;  %v4119_v54 = vadd.f32 %v4103_v27, %v8138_v19  ;;  %v2325_v48 = vadd.f32 %v8701_v3, %v8700_v16  ;;  %v8703_v0 = vld [vmem:[#allocation35_spill] sm:$0xff] }
 0x2f7   : > { %v4086_v46 = vsub.f32 %v8118_v9, %v4078_v26  ;;  %v4199_v57 = vadd.f32 %v3896_v17, %v3259_v37  ;;  %v4292_v25 = vrot.slane %v4277_v14, 1  ;;  %v4104_v55 = vrot.slane %v3896_v17, 1 }
 0x2f8   : > { %v4149_v56 = vadd.f32 %v4133_v51, %v4117_v7  ;;  %v4079_v8 = vadd.f32 %v4070_v6, %v8086_v38  ;;  %v8696_v38 = vld [vmem:[#allocation37_spill] sm:$0xff]  ;;  %v2326_v37 = vadd.f32 %v8704_v1, %v8703_v0  ;;  %v3265_v17 = vadd.f32 %v8705_v22, %v2325_v48 }
 0x2f9   : > { %v4134_v28 = vrot.slane %v4086_v46, 2  ;;  %v4315_v41 = vmul.f32 %v8598_v31, %v4199_v57  ;;  %v2327_v35 = vadd.f32 %v8697_v43, %v8696_v38  ;;  %v4120_v49 = vadd.f32 %v4104_v55, %v8170_v21 }
 0x2fa   : > { %v5440_v20 = vpop.eup %5439  ;;  %v4168_v10 = vsel %vm1344_vm2, %v4149_v56, 0.0  ;;  %v4087_v39 = vsub.f32 %v8125_v61, %v4079_v8  ;;  %v4205_v6 = vadd.f32 %v4086_v46, %v3265_v17  ;;  %v379_v46 = vpop.xlane.xlu0 %378 }
 0x2fb   : > { %v4150_v9 = vadd.f32 %v4134_v28, %v4118_v30  ;;  %v4072_v52 = vmul.f32 0.6931472, %v5440_v20  ;;  %4331 = vst [vmem:[#allocation1 + $0x3f] sm:$0xff] %v4315_v41  ;;  %v4169_v4 = vadd.f32 %v4168_v10, %v4167_v33  ;;  %v4301_v33 = vsel %vm4300_vm13, %v4291_v32, %v4292_v25 }
 0x2fc   : > { %v4135_v13 = vrot.slane %v4087_v39, 2  ;;  %v3267_v62 = vadd.f32 %v7791_v59, %v2327_v35  ;;  %v4303_v19 = vsel %vm4302_vm14, %v8146_v45, %v4301_v33  ;;  %v8702_v45 = vld [vmem:[#allocation77_spill] sm:$0xff]  ;;  %v5652_v28 = vmov 16  }
 0x2fd   : > { %v4080_v42 = vadd.f32 %v4072_v52, %v8101_v50  ;;  %v4170_v61 = vsel %vm1344_vm2, %v4150_v9, 0.0  ;;  %v2324_v50 = vadd.f32 %v8699_v36, %v8698_v60  ;;  %v4305_v29 = vsel %vm4304_vm15, %v8061_v53, %v4303_v19  ;;  %4983 = vset.pattern.permute.xlu0 %v5652_v28  ;;  %4982 = vset.pattern.permute.xlu1 %v5652_v28 }
 0x2fe   : > { %v4151_v5 = vadd.f32 %v4135_v13, %v4119_v54  ;;  %v4171_v11 = vadd.f32 %v4170_v61, %v4169_v4  ;;  %4307 = vst [vmem:[%s8490_s18] sm:$0xff] %v4305_v29  ;;  %v3266_v53 = vadd.f32 %v7757_v58, %v2326_v37  ;;  %v8242_v32 = vmul.f32 0.5, %v379_v46 }
 0x2ff   : > { %v4088_v23 = vsub.f32 %v8156_v44, %v4080_v42  ;;  %v3264_v44 = vadd.f32 %v8702_v45, %v2324_v50 }
 0x300   : > { %v4172_v24 = vsel %vm1344_vm2, %v4151_v5, 0.0  ;;  %v4206_v57 = vadd.f32 %v4087_v39, %v3266_v53 }
 0x301   : > { %v4136_v18 = vrot.slane %v4088_v23, 2  ;;  %v4207_v47 = vadd.f32 %v4088_v23, %v3267_v62  ;;  %v4173_v59 = vadd.f32 %v4172_v24, %v4171_v11  ;;  %v4204_v21 = vadd.f32 %v8178_v63, %v3264_v44  ;;  %v8707_v62 = vld [vmem:[#allocation13_spill] sm:$0xff] }
 0x302   : > { %v4333_v26 = vld [vmem:[#allocation1 + $0x1] ss:$9 sm:$0xff]  ;;  %v4248_v56 = vpop.xlane.xlu0 %4247 }
 0x303   : > { %v4152_v7 = vadd.f32 %v4136_v18, %v4120_v49  ;;  %v4343_v51 = vmul.f32 %v8598_v31, %v4207_v47  ;;  %4352 = vst [vmem:[#allocation1] sm:$0xff] %v7923_v2  ;;  %5441 = vrcp.f32 %v4248_v56  ;;  %vm4254_vm0 = vweird.f32 %v4248_v56 }
 0x304   : > { %4353 = vst [vmem:[#allocation1 + $0x9] sm:$0xff] %v7942_v12  ;;  %v4260_v38 = vand.u32 2147483648, %v4248_v56  ;;  %v4258_v54 = vand.u32 2147483647, %v4248_v56 }
 0x305   : > { %4359 = vst [vmem:[#allocation1 + $0x3f] sm:$0xff] %v4343_v51  ;;  %v4160_v14 = vmul.f32 %v8598_v31, %v4152_v7 }
 0x306   : > { %4354 = vst [vmem:[#allocation1 + $0x12] sm:$0xff] %v7977_v15  ;;  %v8706_v15 = vld [vmem:[#allocation42_spill] sm:$0xff]  ;;  %v4261_v55 = vor.u32 1.1754944e-38, %v4260_v38  ;;  %vm4259_vm4 = vcmp.eq.f32.partialorder %v4258_v54, 8.507059e+37 }
 0x307   : > { %4355 = vst [vmem:[#allocation1 + $0x1b] sm:$0xff] %v7989_v34  ;;  %v4174_v2 = vsel %vm1344_vm2, %v4160_v14, 0.0  ;;  %v415_v34 = vsel %vm386_vm3, %v8706_v15, 0.0 }
 0x308   : > { %4356 = vst [vmem:[#allocation1 + $0x24] sm:$0xff] %v4204_v21  ;;  %v4175_v58 = vadd.f32 %v4174_v2, %v4173_v59 }
 0x309   : > { %4357 = vst [vmem:[#allocation1 + $0x2d] sm:$0xff] %v4205_v6  ;;  %v5442_v41 = vpop.eup %5441 }
 0x30a   : > { %4358 = vst [vmem:[#allocation1 + $0x36] sm:$0xff] %v4206_v57  ;;  %4176 = vadd.xlane.f32.xlu0 %v4175_v58  ;;  %v1361_v8 = vpop.xlane.xlu0 %1360  ;;  %v4250_v20 = vmul.f32 %v5442_v41, %v4248_v56  ;;  %vm4255_vm1 = vweird.f32 %v5442_v41 }
 0x30b   : > { %4335 = vst [vmem:[%s323_s19] sm:$0xff] %v4333_v26  ;;  %v1362_v9 = vmul.f32 %v7981_v40, %v1361_v8  ;;  %vm4256_vm2 = vmor %vm4254_vm0, %vm4255_vm1 }
 0x30c   : > { %v4251_v10 = vsub.f32 1.0, %v4250_v20 }
 0x30e   : > { %v4252_v25 = vmul.f32 %v5442_v41, %v4251_v10 }
 0x310   : > { %v4253_v35 = vadd.f32 %v5442_v41, %v4252_v25 }
 0x311   : > { %v4361_v63 = vld [vmem:[#allocation1 + $0x2] ss:$9 sm:$0xff] }
 0x312   : > { %4363 = vst [vmem:[%s8491_s21] sm:$0xff] %v4361_v63  ;;  %v4257_v61 = vsel %vm4256_vm2, %v5442_v41, %v4253_v35 }
 0x313   : > { %v3237_v12 = vpop.xlane.xlu1 %3236  ;;  %v4262_v33 = vsel %vm4259_vm4, %v4261_v55, %v4257_v61 }
 0x314   : > { %v3238_v31 = vmul.f32 %v7981_v40, %v3237_v12  ;;  %v4263_v23 = vmul.f32 %v8707_v62, %v4262_v33 }
 0x316   : > { %3240 = vrot.lane.b32.xlu2 %v3238_v31, %s5650_s20  ;;  %s4433_s20 = scalar_lea.hbm %s8414_s6, %s8250_s8 }
 0x32b   : > { %v2301_v39 = vpop.permute.xlu1 %2300 }
 0x32c   : > { %v2303_v4 = vadd.f32 %v2301_v39, %v1362_v9 }
 0x33f   : > { %416 = vadd.xlane.f32.xlu2 %v415_v34 }
 0x370   : > { %v3241_v52 = vpop.permute.xlu2 %3240 }
 0x371   : > { %v3243_v43 = vadd.f32 %v3241_v52, %v2303_v4 }
 0x37d   : > { %v4177_v27 = vpop.xlane.xlu0 %4176 }
 0x37e   : > { %v4178_v30 = vmul.f32 %v7981_v40, %v4177_v27 }
 0x380   : > { %4180 = vrot.lane.b32.xlu0 %v4178_v30, %s5651_s22  ;;  %s4437_s22 = sshll.u32 %s4433_s20, 4  ;;  %s4438_s22 = int_to_ptr.hbm [resolvable:$true] %s4437_s22 }
 0x381   : > { %s5475_s18 = sshra.s32 %s4438_s22, 4  ;;  %s5476_s18 = int_to_ptr.hbm [resolvable:$true] %s5475_s18 }
 0x382   : > { %s5477_s21 = scalar_lea.hbm %s5476_s18, 8  ;;  %p5482_p0 = scmp.lt.s32.totalorder %s5476_s18, %s8414_s6 }
 0x383   : > { %p5478_p11 = scmp.ne.s32.totalorder %s5476_s18, %s5477_s21  ;;  %p5483_p1 = scmp.lt.s32.totalorder %s5481_s14, %s5477_s21 }
 0x385   : > { %p5479_p12 = pnand %p5478_p11, %p5733_p5  ;;  %p5484_p2 = por %p5483_p1, %p5482_p0 }
 0x387   : > { %p5480_p13 = pneg %p5479_p12 }
 0x389   : > { %p5485_p3 = pnand %p5484_p2, %p5480_p13 }
 0x3b2   : > { %v8246_v5 = vpop.xlane.xlu2 %416 }
 0x3f2   : > { %v4181_v13 = vpop.permute.xlu0 %4180 }
 0x3f3   : > { %v4183_v42 = vadd.f32 %v4181_v13, %v3243_v43 }
 0x3f5   : > { %v4208_v40 = vsub.f32 %v4183_v42, %v8242_v32  ;;  %4221 = vperm.xlu0 %4983, %v4183_v42  }
 0x3f7   : > { %v4209_v11 = vsub.f32 %v4208_v40, %v8246_v5 }
 0x3f9   : > { %4213 = vperm.xlu1 %4982, %v4209_v11  }
 0x3fa   : > { %5488 = shalt.err (!%p5485_p3)
}
 0x3fb   : > { %4918 = dma.vmem_to_hbm [thread:$0]  (%p5733_p5), %s4436_s9, 128, %s4438_s22, %s8261_s29   ;;  %v4265_v19 = vperm.slane %v4263_v23, 0 }
 0x3fc   : > { %s8708_s20 = smov 112   ;;  %s4447_s23 = scalar_lea.hbm %s8415_s7, %s8250_s8 }
 0x3fd   : > { %s8709_s0 = scalar_lea.vmem [#allocation9], %s8197_s17  ;;  %s4451_s21 = sshll.u32 %s4447_s23, 4  ;;  %s4452_s21 = int_to_ptr.hbm [resolvable:$true] %s4451_s21 }
 0x3fe   : > { %s4449_s18 = sshll.u32 %s8709_s0, 4  ;;  %s5503_s14 = sshra.s32 %s4452_s21, 4  ;;  %s4450_s18 = int_to_ptr.vmem [resolvable:$true] %s4449_s18  ;;  %s5504_s14 = int_to_ptr.hbm [resolvable:$true] %s5503_s14 }
 0x3ff   : > { %s5505_s15 = scalar_lea.hbm %s5504_s14, 8  ;;  %p5510_p9 = scmp.lt.s32.totalorder %s5504_s14, %s8415_s7 }
 0x400   : > { %p5506_p4 = scmp.ne.s32.totalorder %s5504_s14, %s5505_s15 }
 0x401   : > { %4266 = vrot.lane.b32.xlu1 %v4265_v19, %s8708_s20  ;;  %s5509_s20 = scalar_lea.hbm %s8415_s7, 16 }
 0x402   : > { %p5507_p7 = pnand %p5506_p4, %p5733_p5  ;;  %p5511_p10 = scmp.lt.s32.totalorder %s5509_s20, %s5505_s15 }
 0x404   : > { %p5508_p8 = pneg %p5507_p7  ;;  %p5512_p11 = por %p5511_p10, %p5510_p9 }
 0x406   : > { %p5513_p12 = pnand %p5512_p11, %p5508_p8 }
 0x408   : > { %5516 = shalt.err (!%p5513_p12)
}
 0x409   : > { %4919 = dma.vmem_to_hbm [thread:$0]  (%p5733_p5), %s4450_s18, 128, %s4452_s21, %s8261_s29   ;;  %v8710_v50 = vld [vmem:[#allocation36_spill] sm:$0xff] }
 0x40a   : > { %vm4218_vm5 = vcmp.eq.s32.totalorder %v8710_v50, 1  ;;  %vm4210_vm6 = vcmp.eq.s32.totalorder %v8710_v50, 0  ;;  %s4405_s23 = scalar_lea.hbm %s8412_s4, %s5714_s28  ;;  %s309_s13 = scalar_lea.vmem [#allocation4], %s8190_s16  ;;  %vm4227_vm7 = vcmp.eq.s32.totalorder %v8710_v50, 2  ;;  %vm4230_vm8 = vcmp.eq.s32.totalorder %v8710_v50, 3 }
 0x40b   : > { %s8299_s19 = sshll.u32 %s309_s13, 4  ;;  %s4392_s18 = scalar_lea.hbm %s8411_s3, %s5714_s28  ;;  %v4228_v49 = vsel %vm4227_vm7, %v8242_v32, 0.0  ;;  %v4231_v47 = vsel %vm4230_vm8, %v8246_v5, 0.0  ;;  %s4408_s19 = int_to_ptr.vmem [resolvable:$true] %s8299_s19 }
 0x40c   : > { %s4419_s15 = scalar_lea.hbm %s8413_s5, %s8250_s8  ;;  %s8312_s9 = sshll.u32 %s4405_s23, 4  ;;  %s4410_s9 = int_to_ptr.hbm [resolvable:$true] %s8312_s9 }
 0x40d   : > { %s303_s22 = scalar_lea.vmem [#allocation2], %s8190_s16  ;;  %s8320_s1 = sshll.u32 %s4392_s18, 4  ;;  %s4397_s1 = int_to_ptr.hbm [resolvable:$true] %s8320_s1 }
 0x40e   : > { %s8318_s20 = sshll.u32 %s303_s22, 4  ;;  %s8712_s8 = scalar_lea.vmem [#allocation6], %s8197_s17 }
 0x40f   : > { %8711 = sst [smem:[#allocation79_spill]] %s8318_s20  ;;  %s8324_s2 = sshll.u32 %s8712_s8, 4  ;;  %s4422_s2 = int_to_ptr.vmem [resolvable:$true] %s8324_s2 }
 0x410   : > { %s8326_s23 = sshll.u32 %s4419_s15, 4  ;;  %s8713_s29 = sand.u32 1, %s5714_s28   ;;  %s4424_s23 = int_to_ptr.hbm [resolvable:$true] %s8326_s23 }
 0x411   : > { %s8337_s17 = scalar_lea.sflag [#allocation5], %s8713_s29  ;;  %s5531_s0 = sshra.s32 %s4410_s9, 4  ;;  %s5532_s0 = int_to_ptr.hbm [resolvable:$true] %s5531_s0 }
 0x412   : > { %s5533_s18 = scalar_lea.hbm %s5532_s0, 1  ;;  %s5537_s15 = scalar_lea.hbm %s8412_s4, 2 }
 0x413   : > { %p5534_p13 = scmp.ne.s32.totalorder %s5532_s0, %s5533_s18  ;;  %p5538_p2 = scmp.lt.s32.totalorder %s5532_s0, %s8412_s4 }
 0x414   : > { %p5539_p3 = scmp.lt.s32.totalorder %s5537_s15, %s5533_s18 }
 0x415   : > { %p5535_p0 = pnand %p5534_p13, %p5733_p5 }
 0x416   : > { %p5540_p4 = por %p5539_p3, %p5538_p2 }
 0x417   : > { %p5536_p1 = pneg %p5535_p0 }
 0x419   : > { %p5541_p7 = pnand %p5540_p4, %p5536_p1 }
 0x467   : > { %v4222_v60 = vpop.permute.xlu0 %4221 }
 0x468   : > { %v4224_v36 = vperm.slane %v4222_v60, 0 }
 0x46a   : > { %v4225_v48 = vsel %vm4218_vm5, %v4224_v36, 0.0 }
 0x46b   : > { %v4214_v16 = vpop.permute.xlu1 %4213 }
 0x46c   : > { %v4216_v3 = vperm.slane %v4214_v16, 0 }
 0x46e   : > { %v4217_v24 = vsel %vm4210_vm6, %v4216_v3, 0.0 }
 0x46f   : > { %v4226_v29 = vadd.f32 %v4225_v48, %v4217_v24 }
 0x471   : > { %v4229_v18 = vadd.f32 %v4228_v49, %v4226_v29 }
 0x473   : > { %v4232_v59 = vadd.f32 %v4231_v47, %v4229_v18  ;;  %v4267_v45 = vpop.permute.xlu1 %4266 }
 0x474   : > { %4269 = vst.msk [vmem:[%s309_s13] sm:$0x1] %vm386_vm3, %v4267_v45 }
 0x475   : > { %5544 = shalt.err (!%p5541_p7)
}
 0x476   : > { %4916 = dma.vmem_to_hbm [thread:$0]  (%p5733_p5), %s4408_s19, 16, %s4410_s9, %s8337_s17   ;;  %4233 = vst.msk [vmem:[%s303_s22] sm:$0x1] %vm386_vm3, %v4232_v59 }
 0x477   : > { %s4365_s28 = scalar_lea.sflag [#allocation3], %s8190_s16  ;;  %s5559_s13 = sshra.s32 %s4397_s1, 4  ;;  %s5560_s13 = int_to_ptr.hbm [resolvable:$true] %s5559_s13 }
 0x478   : > { %s5561_s20 = scalar_lea.hbm %s5560_s13, 1  ;;  %s5565_s18 = scalar_lea.hbm %s8411_s3, 2 }
 0x479   : > { %p5562_p8 = scmp.ne.s32.totalorder %s5560_s13, %s5561_s20  ;;  %p5566_p11 = scmp.lt.s32.totalorder %s5560_s13, %s8411_s3 }
 0x47a   : > { %p5567_p12 = scmp.lt.s32.totalorder %s5565_s18, %s5561_s20 }
 0x47b   : > { %p5563_p9 = pnand %p5562_p8, %p5733_p5 }
 0x47c   : > { %p5568_p13 = por %p5567_p12, %p5566_p11 }
 0x47d   : > { %p5564_p10 = pneg %p5563_p9 }
 0x47f   : > { %p5569_p0 = pnand %p5568_p13, %p5564_p10 }
 0x481   : > { %5572 = shalt.err (!%p5569_p0)
}
 0x482   : > { %s8714_s16 = sld [smem:[#allocation79_spill]]  ;;  %s5587_s9 = sshra.s32 %s4424_s23, 4  ;;  %s5588_s9 = int_to_ptr.hbm [resolvable:$true] %s5587_s9 }
 0x483   : > { %s5589_s22 = scalar_lea.hbm %s5588_s9, 8  ;;  %s5593_s13 = scalar_lea.hbm %s8413_s5, 16 }
 0x484   : > { %p5590_p1 = scmp.ne.s32.totalorder %s5588_s9, %s5589_s22  ;;  %p5594_p4 = scmp.lt.s32.totalorder %s5588_s9, %s8413_s5 }
 0x485   : > { %p5595_p7 = scmp.lt.s32.totalorder %s5593_s13, %s5589_s22 }
 0x486   : > { %p5591_p2 = pnand %p5590_p1, %p5733_p5 }
 0x487   : > { %p5596_p8 = por %p5595_p7, %p5594_p4 }
 0x488   : > { %s8715_s19 = int_to_ptr.vmem [resolvable:$true] %s8714_s16  ;;  %p5592_p3 = pneg %p5591_p2 }
 0x489   : > { %4915 = dma.vmem_to_hbm [thread:$0]  (%p5733_p5), %s8715_s19, 16, %s4397_s1, %s4365_s28  }
 0x48a   : > { %p5597_p9 = pnand %p5596_p8, %p5592_p3 }
 0x48c   : > { %5600 = shalt.err (!%p5597_p9)
}
 0x48d   : > { %4917 = dma.vmem_to_hbm [thread:$0]  (%p5733_p5), %s4422_s2, 128, %s4424_s23, %s8337_s17  }
 0x48e PF: > { %p4941_p10 = scmp.ge.s32.totalorder %s5643_s27, 2  ;;  %s4463_s1 = sand.u32 1, %s5631_s24  }
 0x48f   : > { %s4464_s28 = scalar_lea.sflag [#allocation3], %s4463_s1 }
 0x490   : > { %p4926_p11 = pnand %p4941_p10, %p5737_p6 }
 0x492   : > { %p4927_p12 = pneg %p4926_p11 }
 0x494   : > { %5618 = dma.done.wait (%p4927_p12), %s4464_s28, 16  }
 0x495   : > { %5620 = vsyncadd (%p4927_p12), %s4464_s28, 4294967280  ;;  %s8716_s11 = sadd.s32 4294967294, %s5643_s27  }
 0x496   : > { %s4472_s0 = sand.u32 1, %s8716_s11  }
 0x497   : > { %s4473_s18 = scalar_lea.sflag [#allocation5], %s4472_s0 }
 0x498   : > { %5622 = dma.done.wait (%p4927_p12), %s4473_s18, 144  }
 0x499   : > { %5624 = vsyncadd (%p4927_p12), %s4473_s18, 4294967152  ;;  %s4492_s21 = scalar_lea.sflag [#allocation8], %s4472_s0 }
 0x49a   : > { %5626 = dma.done.wait (%p4927_p12), %s4492_s21, 256  }
 0x49b   : > { %5628 = vsyncadd (%p4927_p12), %s4492_s21, 4294967040  ;;  %p24_p5 = scmp.ge.s32.totalorder %s5718_s30, 4   ;;  %s8717_s24 = smov %s5635_s25 }
 0x49c   : > { %s8718_s25 = smov %s5639_s26  ;;  %s8719_s26 = smov %s5731_s10 }
 0x49d   : > { %s8720_s27 = smov %s5718_s30  ;;  %26 = sbr.rel (!%p24_p5) target bundleno = 11 (0xb), region = 142 }
 0x4a2   :  { %4508 = vsyncpa [#allocation3], 1 }
 0x4a3   :  { %4510 = vsyncpa [#allocation3 + $0x1], 1 }
 0x4a4   :  { %4511 = vsyncpa [#allocation5], 1 }
 0x4a5   :  { %4513 = vsyncpa [#allocation5 + $0x1], 1 }
 0x4a6   :  { %4514 = vsyncpa [#allocation8], 1 }
 0x4a7   :  { %4516 = vsyncpa [#allocation8 + $0x1], 1 }

</bundles_post_ra>
